<compile_context>
chip_gen: v6e
topology: v6e:2x2x1
jax: 0.10.0
libtpu: 0.0.40
codegen_flags: <defaults>
</compile_context>

<pallas_src>
import jax
import jax.numpy as jnp
from jax import lax
from jax.experimental import pallas as pl
from jax.experimental.pallas import tpu as pltpu


def _round_up(x, m):
    return (x + m - 1) // m * m


# --------------------------------------------------------------------------- #
# Kernel: one time block, both directions interleaved
# --------------------------------------------------------------------------- #
def _bilstm_kernel(len_ref, gxf_ref, gxb_ref, whf_ref, whb_ref,
                   outf_ref, outb_ref,
                   hf_scr, cf_scr, hb_scr, cb_scr):
    """One time-block grid step of the interleaved bidirectional LSTM.

    len_ref : (Bp, 1)          int32  valid length per (padded) batch row
    gxf_ref : (T_blk, Bp, 4Hp) bf16   x@W_ih + b, forward dir, this time block
    gxb_ref : (T_blk, Bp, 4Hp) bf16   x@W_ih + b, backward dir, mirrored block
    whf_ref : (Hp, 4Hp)        bf16   recurrent weights, forward
    whb_ref : (Hp, 4Hp)        bf16   recurrent weights, backward
    outf_ref: (T_blk, Bp, Hp)  f32    forward outputs, this time block
    outb_ref: (T_blk, Bp, Hp)  f32    backward outputs, mirrored block
    *_scr   : (Bp, Hp)         f32    h/c state per direction (carried over tb)
    """
    tb = pl.program_id(0)
    nb = pl.num_programs(0)
    t_blk, bp, four_hp = gxf_ref.shape
    hp = four_hp // 4

    # Fresh recurrent state at the start of the sequence sweep.
    @pl.when(tb == 0)
    def _():
        hf_scr[...] = jnp.zeros_like(hf_scr)
        cf_scr[...] = jnp.zeros_like(cf_scr)
        hb_scr[...] = jnp.zeros_like(hb_scr)
        cb_scr[...] = jnp.zeros_like(cb_scr)

    base_f = tb * t_blk                 # forward walks blocks 0..nb-1
    base_b = (nb - 1 - tb) * t_blk      # backward walks blocks nb-1..0
    lens = len_ref[...]                 # (Bp, 1) int32, loaded once per block

    def cell(gates, c_prev):
        i_g = jax.nn.sigmoid(gates[:, 0 * hp:1 * hp])
        f_g = jax.nn.sigmoid(gates[:, 1 * hp:2 * hp])
        g_g = jnp.tanh(gates[:, 2 * hp:3 * hp])
        o_g = jax.nn.sigmoid(gates[:, 3 * hp:4 * hp])
        c_new = f_g * c_prev + i_g * g_g
        h_new = o_g * jnp.tanh(c_new)
        return h_new, c_new

    def step(s, carry):
        # ---------------- forward direction: time increasing ---------------- #
        t_f = base_f + s
        h_prev = hf_scr[...]
        c_prev = cf_scr[...]
        gates_f = gxf_ref[s].astype(jnp.float32) + jnp.dot(
            h_prev.astype(jnp.bfloat16), whf_ref[...],
            preferred_element_type=jnp.float32)
        h_f, c_f = cell(gates_f, c_prev)
        # pack_padded semantics: state advances only while t < length, padded
        # outputs are zero.  One compare + one lane-broadcast, reused 3x.
        m_f = jnp.broadcast_to(lens > t_f, (bp, hp))
        hf_scr[...] = jnp.where(m_f, h_f, h_prev)
        cf_scr[...] = jnp.where(m_f, c_f, c_prev)
        outf_ref[s] = jnp.where(m_f, h_f, 0.0)

        # --------------- backward direction: time decreasing ---------------- #
        k = t_blk - 1 - s
        t_b = base_b + k
        hb_prev = hb_scr[...]
        cb_prev = cb_scr[...]
        gates_b = gxb_ref[k].astype(jnp.float32) + jnp.dot(
            hb_prev.astype(jnp.bfloat16), whb_ref[...],
            preferred_element_type=jnp.float32)
        h_b, c_b = cell(gates_b, cb_prev)
        m_b = jnp.broadcast_to(lens > t_b, (bp, hp))
        hb_scr[...] = jnp.where(m_b, h_b, hb_prev)
        cb_scr[...] = jnp.where(m_b, c_b, cb_prev)
        outb_ref[k] = jnp.where(m_b, h_b, 0.0)
        return carry

    # Adaptive unroll: each unrolled step keeps ~2*(Bp/8)*(4Hp/128) gate vregs
    # live (both directions); back off before the 64-vreg file spills.
    vregs_per_step = 2 * (bp // 8) * (four_hp // 128)
    unroll = 8 if vregs_per_step <= 16 else (4 if vregs_per_step <= 32 else 2)
    lax.fori_loop(0, t_blk, step, 0, unroll=min(t_blk, unroll))


# --------------------------------------------------------------------------- #
# Wrapper
# --------------------------------------------------------------------------- #
def _pad_gate_cols(w_t, H, Hp):
    """(rows, 4H) in PyTorch gate order [i,f,g,o] -> (rows, 4Hp), each gate's H
    valid columns at the start of its own Hp-wide, lane-aligned slab."""
    gates = jnp.split(w_t, 4, axis=1)
    gates = [jnp.pad(g, ((0, 0), (0, Hp - H))) for g in gates]
    return jnp.concatenate(gates, axis=1)


def _prep_dir(wih, whh, b_ih, b_hh, H, Hp):
    wih_t = _pad_gate_cols(wih.T, H, Hp)                        # (D, 4Hp) f32
    whh_t = _pad_gate_cols(whh.T, H, Hp)                        # (H, 4Hp)
    whh_t = jnp.pad(whh_t, ((0, Hp - H), (0, 0)))               # (Hp, 4Hp)
    b = _pad_gate_cols((b_ih + b_hh).reshape(1, -1), H, Hp)     # (1, 4Hp)
    return wih_t, whh_t.astype(jnp.bfloat16), b


def bilstm_forward(x, lengths, params):
    """x: (B, T, D) f32, lengths: (B,) int -> (B, T, 2H) f32.

    params use the PyTorch layout:
      wih_* : (4H, D), whh_* : (4H, H), b_ih_* / b_hh_* : (4H,)
    """
    B, T, D = x.shape
    H = params["whh_f"].shape[1]

    Hp = _round_up(H, 128)                    # lane padding
    Bp = _round_up(B, 8)                      # sublane padding

    # Time tile: large blocks amortize per-grid-step overhead, but both
    # directions' double-buffered (bf16 gx + f32 out) blocks must fit VMEM.
    # Budget ~40 MiB of streamed blocks -> safe on v7x (64 MiB/TC) and leaves
    # v5e/v6e plenty of headroom.
    bytes_per_t = 2 * 2 * Bp * (4 * Hp * 2 + Hp * 4)   # dirs x dbl-buf x (gx+out)
    budget = 40 * 1024 * 1024
    T_blk = max(8, min(128, _round_up(T, 8), (budget // bytes_per_t) // 8 * 8))
    Tp = _round_up(T, T_blk)
    NB = Tp // T_blk
    nbm1 = NB - 1

    wih_f, whh_f_p, b_f = _prep_dir(params["wih_f"], params["whh_f"],
                                    params["b_ih_f"], params["b_hh_f"], H, Hp)
    wih_b, whh_b_p, b_b = _prep_dir(params["wih_b"], params["whh_b"],
                                    params["b_ih_b"], params["b_hh_b"], H, Hp)

    # Hoisted input projection: ONE fused einsum over stacked per-direction
    # weights, emitted time-major and cast to bf16 (dominant HBM stream).
    x_pad = jnp.pad(x.astype(jnp.float32), ((0, Bp - B), (0, Tp - T), (0, 0)))
    wih_stack = jnp.stack([wih_f, wih_b], axis=0)               # (2, D, 4Hp)
    b_stack = jnp.stack([b_f, b_b], axis=0)                     # (2, 1, 4Hp)
    gx = (jnp.einsum('btd,ndg->ntbg', x_pad, wih_stack)
          + b_stack[:, None]).astype(jnp.bfloat16)              # (2, Tp, Bp, 4Hp)

    len_col = jnp.pad(lengths.astype(jnp.int32), (0, Bp - B)).reshape(Bp, 1)

    out_f, out_b = pl.pallas_call(
        _bilstm_kernel,
        out_shape=(jax.ShapeDtypeStruct((Tp, Bp, Hp), jnp.float32),
                   jax.ShapeDtypeStruct((Tp, Bp, Hp), jnp.float32)),
        grid=(NB,),
        in_specs=[
            pl.BlockSpec((Bp, 1), lambda tb: (0, 0)),                       # lengths
            # Same stacked gx array passed twice with different index maps:
            # forward reads block tb of dir 0, backward reads the mirrored
            # block of dir 1 (no slicing/copy in the wrapper).
            pl.BlockSpec((None, T_blk, Bp, 4 * Hp),
                         lambda tb: (0, tb, 0, 0)),                         # gx fwd
            pl.BlockSpec((None, T_blk, Bp, 4 * Hp),
                         lambda tb: (1, nbm1 - tb, 0, 0)),                  # gx bwd
            pl.BlockSpec((Hp, 4 * Hp), lambda tb: (0, 0)),                  # W_hh fwd
            pl.BlockSpec((Hp, 4 * Hp), lambda tb: (0, 0)),                  # W_hh bwd
        ],
        out_specs=(
            pl.BlockSpec((T_blk, Bp, Hp), lambda tb: (tb, 0, 0)),           # out fwd
            pl.BlockSpec((T_blk, Bp, Hp), lambda tb: (nbm1 - tb, 0, 0)),    # out bwd
        ),
        scratch_shapes=[pltpu.VMEM((Bp, Hp), jnp.float32)] * 4,   # h_f, c_f, h_b, c_b
        compiler_params=pltpu.CompilerParams(
            dimension_semantics=("arbitrary",),       # serial recurrence over time
            vmem_limit_bytes=48 * 1024 * 1024),
    )(len_col, gx, gx, whh_f_p, whh_b_p)

    # Epilogue: drop padding, combine directions, back to batch-first.
    out = jnp.concatenate([out_f[:T, :B, :H], out_b[:T, :B, :H]], axis=-1)
    return jnp.transpose(out, (1, 0, 2))                          # (B, T, 2H)


# --------------------------------------------------------------------------- #
# Deterministic parameter init (mirrors LSTM.reset_params)
# --------------------------------------------------------------------------- #
def _orthogonal(key, shape):
    rows, cols = shape
    a = jax.random.normal(key, (rows, cols), dtype=jnp.float32)
    q, r = jnp.linalg.qr(a)
    s = jnp.where(jnp.diagonal(r) >= 0, 1.0, -1.0)
    return q * s[None, :]


def _kaiming_normal(key, shape):
    fan_in = shape[1]
    std = (2.0 / fan_in) ** 0.5
    return std * jax.random.normal(key, shape, dtype=jnp.float32)


# --------------------------------------------------------------------------- #
# Pure-JAX f32 reference (straightforward per-step loop) for self-check
# --------------------------------------------------------------------------- #
def _lstm_reference(x, lengths, params):
    B, T, D = x.shape
    H = params["whh_f"].shape[1]

    def run_dir(wih, whh, b, reverse):
        h = jnp.zeros((B, H), jnp.float32)
        c = jnp.zeros((B, H), jnp.float32)
        outs = [None] * T
        order = range(T - 1, -1, -1) if reverse else range(T)
        for t in order:
            gates = x[:, t, :] @ wih.T + h @ whh.T + b
            i_g = jax.nn.sigmoid(gates[:, 0:H])
            f_g = jax.nn.sigmoid(gates[:, H:2 * H])
            g_g = jnp.tanh(gates[:, 2 * H:3 * H])
            o_g = jax.nn.sigmoid(gates[:, 3 * H:4 * H])
            c_new = f_g * c + i_g * g_g
            h_new = o_g * jnp.tanh(c_new)
            m = (lengths > t)[:, None]
            h = jnp.where(m, h_new, h)
            c = jnp.where(m, c_new, c)
            outs[t] = jnp.where(m, h_new, 0.0)
        return jnp.stack(outs, axis=1)   # (B, T, H)

    fwd = run_dir(params["wih_f"], params["whh_f"],
                  params["b_ih_f"] + params["b_hh_f"], False)
    bwd = run_dir(params["wih_b"], params["whh_b"],
                  params["b_ih_b"] + params["b_hh_b"], True)
    return jnp.concatenate([fwd, bwd], axis=-1)


if __name__ == "__main__":
    B, T, D, H = 2, 8, 16, 32

    key = jax.random.PRNGKey(0)
    k_x, k1, k2, k3, k4 = jax.random.split(key, 5)

    x = jax.random.normal(k_x, (B, T, D), dtype=jnp.float32)
    lengths_host = [8, 5]                               # variable sequence lengths
    lengths = jnp.array(lengths_host, dtype=jnp.int32)

    params = {
        "wih_f": _kaiming_normal(k1, (4 * H, D)),       # (4H, D)  PyTorch layout
        "whh_f": _orthogonal(k2, (4 * H, H)),           # (4H, H)
        "b_ih_f": jnp.zeros((4 * H,), jnp.float32),
        "b_hh_f": jnp.zeros((4 * H,), jnp.float32),
        "wih_b": _kaiming_normal(k3, (4 * H, D)),
        "whh_b": _orthogonal(k4, (4 * H, H)),
        "b_ih_b": jnp.zeros((4 * H,), jnp.float32),
        "b_hh_b": jnp.zeros((4 * H,), jnp.float32),
    }

    run = jax.jit(bilstm_forward)
    out = run(x, lengths, params)                        # (B, T, 2H)
    # pad_packed_sequence pads the time axis only to max(lengths):
    max_len = int(max(lengths_host))
    out = out[:, :max_len, :]
    jax.block_until_ready(out)
    assert out.shape == (B, max_len, 2 * H)

    ref = _lstm_reference(x, lengths, params)[:, :max_len, :]
    err = float(jnp.max(jnp.abs(out - ref)))
    # bf16 gx / bf16 recurrent matmul vs f32 reference: expect ~1e-2 worst case.
    assert err < 3e-2, f"mismatch vs reference, max abs err = {err}"

    print("KERNEL_OK")
</pallas_src>

<mosaic_0001>
module attributes {stable_mosaic.version = 11 : i64} {
  func.func @_bilstm_kernel(%arg0: i32, %arg1: memref<8x1xi32, #tpu.memory_space<vmem>>, %arg2: memref<1x8x8x512xbf16, #tpu.memory_space<vmem>>, %arg3: memref<1x8x8x512xbf16, #tpu.memory_space<vmem>>, %arg4: memref<128x512xbf16, #tpu.memory_space<vmem>>, %arg5: memref<128x512xbf16, #tpu.memory_space<vmem>>, %arg6: memref<8x8x128xf32, #tpu.memory_space<vmem>>, %arg7: memref<8x8x128xf32, #tpu.memory_space<vmem>>, %arg8: memref<8x128xf32, #tpu.memory_space<vmem>>, %arg9: memref<8x128xf32, #tpu.memory_space<vmem>>, %arg10: memref<8x128xf32, #tpu.memory_space<vmem>>, %arg11: memref<8x128xf32, #tpu.memory_space<vmem>>) attributes {dimension_semantics = [#tpu.dimension_semantics<arbitrary>], iteration_bounds = array<i64: 1>, scalar_prefetch = 0 : i64, scratch_operands = 4 : i64, tpu.core_type = #tpu.core_type<tc>, window_params = [{pipeline_mode = #tpu.pipeline_mode<synchronous>, transform_indices = @transform_0, window_bounds = array<i64: 8, 1>}, {transform_indices = @transform_1, window_bounds = array<i64: 1, 8, 8, 512>}, {transform_indices = @transform_2, window_bounds = array<i64: 1, 8, 8, 512>}, {pipeline_mode = #tpu.pipeline_mode<synchronous>, transform_indices = @transform_3, window_bounds = array<i64: 128, 512>}, {pipeline_mode = #tpu.pipeline_mode<synchronous>, transform_indices = @transform_4, window_bounds = array<i64: 128, 512>}, {transform_indices = @transform_5, window_bounds = array<i64: 8, 8, 128>}, {transform_indices = @transform_6, window_bounds = array<i64: 8, 8, 128>}]} {
    %c0_i32 = arith.constant 0 : i32
    %0 = arith.cmpi eq, %arg0, %c0_i32 : i32
    %1 = arith.extui %0 : i1 to i32
    %c0_i32_0 = arith.constant 0 : i32
    %2 = arith.cmpi ne, %1, %c0_i32_0 : i32
    scf.if %2 {
      %cst_333 = arith.constant 0.000000e+00 : f32
      %815 = vector.broadcast %cst_333 : f32 to vector<8x128xf32>
      %c0_334 = arith.constant 0 : index
      %c0_335 = arith.constant 0 : index
      %816 = vector.load %arg8[%c0_334, %c0_335] : memref<8x128xf32, #tpu.memory_space<vmem>>, vector<8x128xf32>
      tpu.vector_store %arg8[%c0_334, %c0_335], %815 {strides = array<i32>} : memref<8x128xf32, #tpu.memory_space<vmem>>, vector<8x128xf32>,
      %cst_336 = arith.constant 0.000000e+00 : f32
      %817 = vector.broadcast %cst_336 : f32 to vector<8x128xf32>
      %c0_337 = arith.constant 0 : index
      %c0_338 = arith.constant 0 : index
      %818 = vector.load %arg9[%c0_337, %c0_338] : memref<8x128xf32, #tpu.memory_space<vmem>>, vector<8x128xf32>
      tpu.vector_store %arg9[%c0_337, %c0_338], %817 {strides = array<i32>} : memref<8x128xf32, #tpu.memory_space<vmem>>, vector<8x128xf32>,
      %cst_339 = arith.constant 0.000000e+00 : f32
      %819 = vector.broadcast %cst_339 : f32 to vector<8x128xf32>
      %c0_340 = arith.constant 0 : index
      %c0_341 = arith.constant 0 : index
      %820 = vector.load %arg10[%c0_340, %c0_341] : memref<8x128xf32, #tpu.memory_space<vmem>>, vector<8x128xf32>
      tpu.vector_store %arg10[%c0_340, %c0_341], %819 {strides = array<i32>} : memref<8x128xf32, #tpu.memory_space<vmem>>, vector<8x128xf32>,
      %cst_342 = arith.constant 0.000000e+00 : f32
      %821 = vector.broadcast %cst_342 : f32 to vector<8x128xf32>
      %c0_343 = arith.constant 0 : index
      %c0_344 = arith.constant 0 : index
      %822 = vector.load %arg11[%c0_343, %c0_344] : memref<8x128xf32, #tpu.memory_space<vmem>>, vector<8x128xf32>
      tpu.vector_store %arg11[%c0_343, %c0_344], %821 {strides = array<i32>} : memref<8x128xf32, #tpu.memory_space<vmem>>, vector<8x128xf32>,
    } else {
    }
    %c8_i32 = arith.constant 8 : i32
    %3 = arith.muli %arg0, %c8_i32 : i32
    %c0_i32_1 = arith.constant 0 : i32
    %4 = arith.subi %c0_i32_1, %arg0 : i32
    %c8_i32_2 = arith.constant 8 : i32
    %5 = arith.muli %4, %c8_i32_2 : i32
    %c0 = arith.constant 0 : index
    %c0_3 = arith.constant 0 : index
    %6 = vector.load %arg1[%c0, %c0_3] : memref<8x1xi32, #tpu.memory_space<vmem>>, vector<8x1xi32>
    %c0_i32_4 = arith.constant 0 : i32
    %7 = arith.addi %3, %c0_i32_4 : i32
    %c0_5 = arith.constant 0 : index
    %c0_6 = arith.constant 0 : index
    %8 = vector.load %arg8[%c0_5, %c0_6] : memref<8x128xf32, #tpu.memory_space<vmem>>, vector<8x128xf32>
    %c0_7 = arith.constant 0 : index
    %c0_8 = arith.constant 0 : index
    %9 = vector.load %arg9[%c0_7, %c0_8] : memref<8x128xf32, #tpu.memory_space<vmem>>, vector<8x128xf32>
    %c0_9 = arith.constant 0 : index
    %10 = arith.index_cast %c0_i32_4 : i32 to index
    %c0_10 = arith.constant 0 : index
    %c0_11 = arith.constant 0 : index
    %11 = vector.load %arg2[%c0_9, %10, %c0_10, %c0_11] : memref<1x8x8x512xbf16, #tpu.memory_space<vmem>>, vector<1x1x8x512xbf16>
    %12 = vector.shape_cast %11 : vector<1x1x8x512xbf16> to vector<8x512xbf16>
    %13 = arith.extf %12 : vector<8x512xbf16> to vector<8x512xf32>
    %14 = arith.truncf %8 : vector<8x128xf32> to vector<8x128xbf16>
    %c0_12 = arith.constant 0 : index
    %c0_13 = arith.constant 0 : index
    %15 = vector.load %arg4[%c0_12, %c0_13] : memref<128x512xbf16, #tpu.memory_space<vmem>>, vector<128x512xbf16>
    %cst = arith.constant dense<0.000000e+00> : vector<8x512xf32>
    %16 = tpu.matmul %14, %15, %cst {dimension_numbers = #tpu.dot_dimension_numbers<[1], [0], [0], [1], [0, 0, 1, 1], [], []>} : vector<8x128xbf16>, vector<128x512xbf16>, vector<8x512xf32> -> vector<8x512xf32>
    %17 = arith.addf %13, %16 : vector<8x512xf32>
    %18 = vector.extract_strided_slice %17 {offsets = [0, 0], sizes = [8, 128], strides = [1, 1]} : vector<8x512xf32> to vector<8x128xf32>
    %19 = arith.negf %18 : vector<8x128xf32>
    %20 = math.exp %19 : vector<8x128xf32>
    %cst_14 = arith.constant 1.000000e+00 : f32
    %21 = vector.broadcast %cst_14 : f32 to vector<8x128xf32>
    %22 = arith.addf %21, %20 : vector<8x128xf32>
    %23 = arith.divf %21, %22 : vector<8x128xf32>
    %24 = vector.extract_strided_slice %17 {offsets = [0, 128], sizes = [8, 128], strides = [1, 1]} : vector<8x512xf32> to vector<8x128xf32>
    %25 = arith.negf %24 : vector<8x128xf32>
    %26 = math.exp %25 : vector<8x128xf32>
    %cst_15 = arith.constant 1.000000e+00 : f32
    %27 = vector.broadcast %cst_15 : f32 to vector<8x128xf32>
    %28 = arith.addf %27, %26 : vector<8x128xf32>
    %29 = arith.divf %27, %28 : vector<8x128xf32>
    %30 = vector.extract_strided_slice %17 {offsets = [0, 256], sizes = [8, 128], strides = [1, 1]} : vector<8x512xf32> to vector<8x128xf32>
    %31 = math.tanh %30 : vector<8x128xf32>
    %32 = vector.extract_strided_slice %17 {offsets = [0, 384], sizes = [8, 128], strides = [1, 1]} : vector<8x512xf32> to vector<8x128xf32>
    %33 = arith.negf %32 : vector<8x128xf32>
    %34 = math.exp %33 : vector<8x128xf32>
    %cst_16 = arith.constant 1.000000e+00 : f32
    %35 = vector.broadcast %cst_16 : f32 to vector<8x128xf32>
    %36 = arith.addf %35, %34 : vector<8x128xf32>
    %37 = arith.divf %35, %36 : vector<8x128xf32>
    %38 = arith.mulf %29, %9 : vector<8x128xf32>
    %39 = arith.mulf %23, %31 : vector<8x128xf32>
    %40 = arith.addf %38, %39 : vector<8x128xf32>
    %41 = math.tanh %40 : vector<8x128xf32>
    %42 = arith.mulf %37, %41 : vector<8x128xf32>
    %43 = vector.broadcast %7 : i32 to vector<8x1xi32>
    %44 = arith.cmpi sgt, %6, %43 : vector<8x1xi32>
    %45 = vector.shape_cast %44 : vector<8x1xi1> to vector<8x1xi1>
    %46 = vector.broadcast %45 : vector<8x1xi1> to vector<8x128xi1>
    %47 = arith.select %46, %42, %8 : vector<8x128xi1>, vector<8x128xf32>
    %c0_17 = arith.constant 0 : index
    %c0_18 = arith.constant 0 : index
    %48 = vector.load %arg8[%c0_17, %c0_18] : memref<8x128xf32, #tpu.memory_space<vmem>>, vector<8x128xf32>
    tpu.vector_store %arg8[%c0_17, %c0_18], %47 {strides = array<i32>} : memref<8x128xf32, #tpu.memory_space<vmem>>, vector<8x128xf32>,
    %49 = arith.select %46, %40, %9 : vector<8x128xi1>, vector<8x128xf32>
    %c0_19 = arith.constant 0 : index
    %c0_20 = arith.constant 0 : index
    %50 = vector.load %arg9[%c0_19, %c0_20] : memref<8x128xf32, #tpu.memory_space<vmem>>, vector<8x128xf32>
    tpu.vector_store %arg9[%c0_19, %c0_20], %49 {strides = array<i32>} : memref<8x128xf32, #tpu.memory_space<vmem>>, vector<8x128xf32>,
    %cst_21 = arith.constant 0.000000e+00 : f32
    %51 = vector.broadcast %cst_21 : f32 to vector<8x128xf32>
    %52 = arith.select %46, %42, %51 : vector<8x128xi1>, vector<8x128xf32>
    %53 = arith.index_cast %c0_i32_4 : i32 to index
    %c0_22 = arith.constant 0 : index
    %c0_23 = arith.constant 0 : index
    %54 = vector.load %arg6[%53, %c0_22, %c0_23] : memref<8x8x128xf32, #tpu.memory_space<vmem>>, vector<1x8x128xf32>
    %55 = vector.shape_cast %54 : vector<1x8x128xf32> to vector<8x128xf32>
    %56 = vector.shape_cast %52 : vector<8x128xf32> to vector<1x8x128xf32>
    tpu.vector_store %arg6[%53, %c0_22, %c0_23], %56 {strides = array<i32>} : memref<8x8x128xf32, #tpu.memory_space<vmem>>, vector<1x8x128xf32>,
    %c7_i32 = arith.constant 7 : i32
    %57 = arith.subi %c7_i32, %c0_i32_4 : i32
    %58 = arith.addi %5, %57 : i32
    %c0_24 = arith.constant 0 : index
    %c0_25 = arith.constant 0 : index
    %59 = vector.load %arg10[%c0_24, %c0_25] : memref<8x128xf32, #tpu.memory_space<vmem>>, vector<8x128xf32>
    %c0_26 = arith.constant 0 : index
    %c0_27 = arith.constant 0 : index
    %60 = vector.load %arg11[%c0_26, %c0_27] : memref<8x128xf32, #tpu.memory_space<vmem>>, vector<8x128xf32>
    %c0_28 = arith.constant 0 : index
    %61 = arith.index_cast %57 : i32 to index
    %c0_29 = arith.constant 0 : index
    %c0_30 = arith.constant 0 : index
    %62 = vector.load %arg3[%c0_28, %61, %c0_29, %c0_30] : memref<1x8x8x512xbf16, #tpu.memory_space<vmem>>, vector<1x1x8x512xbf16>
    %63 = vector.shape_cast %62 : vector<1x1x8x512xbf16> to vector<8x512xbf16>
    %64 = arith.extf %63 : vector<8x512xbf16> to vector<8x512xf32>
    %65 = arith.truncf %59 : vector<8x128xf32> to vector<8x128xbf16>
    %c0_31 = arith.constant 0 : index
    %c0_32 = arith.constant 0 : index
    %66 = vector.load %arg5[%c0_31, %c0_32] : memref<128x512xbf16, #tpu.memory_space<vmem>>, vector<128x512xbf16>
    %cst_33 = arith.constant dense<0.000000e+00> : vector<8x512xf32>
    %67 = tpu.matmul %65, %66, %cst_33 {dimension_numbers = #tpu.dot_dimension_numbers<[1], [0], [0], [1], [0, 0, 1, 1], [], []>} : vector<8x128xbf16>, vector<128x512xbf16>, vector<8x512xf32> -> vector<8x512xf32>
    %68 = arith.addf %64, %67 : vector<8x512xf32>
    %69 = vector.extract_strided_slice %68 {offsets = [0, 0], sizes = [8, 128], strides = [1, 1]} : vector<8x512xf32> to vector<8x128xf32>
    %70 = arith.negf %69 : vector<8x128xf32>
    %71 = math.exp %70 : vector<8x128xf32>
    %cst_34 = arith.constant 1.000000e+00 : f32
    %72 = vector.broadcast %cst_34 : f32 to vector<8x128xf32>
    %73 = arith.addf %72, %71 : vector<8x128xf32>
    %74 = arith.divf %72, %73 : vector<8x128xf32>
    %75 = vector.extract_strided_slice %68 {offsets = [0, 128], sizes = [8, 128], strides = [1, 1]} : vector<8x512xf32> to vector<8x128xf32>
    %76 = arith.negf %75 : vector<8x128xf32>
    %77 = math.exp %76 : vector<8x128xf32>
    %cst_35 = arith.constant 1.000000e+00 : f32
    %78 = vector.broadcast %cst_35 : f32 to vector<8x128xf32>
    %79 = arith.addf %78, %77 : vector<8x128xf32>
    %80 = arith.divf %78, %79 : vector<8x128xf32>
    %81 = vector.extract_strided_slice %68 {offsets = [0, 256], sizes = [8, 128], strides = [1, 1]} : vector<8x512xf32> to vector<8x128xf32>
    %82 = math.tanh %81 : vector<8x128xf32>
    %83 = vector.extract_strided_slice %68 {offsets = [0, 384], sizes = [8, 128], strides = [1, 1]} : vector<8x512xf32> to vector<8x128xf32>
    %84 = arith.negf %83 : vector<8x128xf32>
    %85 = math.exp %84 : vector<8x128xf32>
    %cst_36 = arith.constant 1.000000e+00 : f32
    %86 = vector.broadcast %cst_36 : f32 to vector<8x128xf32>
    %87 = arith.addf %86, %85 : vector<8x128xf32>
    %88 = arith.divf %86, %87 : vector<8x128xf32>
    %89 = arith.mulf %80, %60 : vector<8x128xf32>
    %90 = arith.mulf %74, %82 : vector<8x128xf32>
    %91 = arith.addf %89, %90 : vector<8x128xf32>
    %92 = math.tanh %91 : vector<8x128xf32>
    %93 = arith.mulf %88, %92 : vector<8x128xf32>
    %94 = vector.broadcast %58 : i32 to vector<8x1xi32>
    %95 = arith.cmpi sgt, %6, %94 : vector<8x1xi32>
    %96 = vector.shape_cast %95 : vector<8x1xi1> to vector<8x1xi1>
    %97 = vector.broadcast %96 : vector<8x1xi1> to vector<8x128xi1>
    %98 = arith.select %97, %93, %59 : vector<8x128xi1>, vector<8x128xf32>
    %c0_37 = arith.constant 0 : index
    %c0_38 = arith.constant 0 : index
    %99 = vector.load %arg10[%c0_37, %c0_38] : memref<8x128xf32, #tpu.memory_space<vmem>>, vector<8x128xf32>
    tpu.vector_store %arg10[%c0_37, %c0_38], %98 {strides = array<i32>} : memref<8x128xf32, #tpu.memory_space<vmem>>, vector<8x128xf32>,
    %100 = arith.select %97, %91, %60 : vector<8x128xi1>, vector<8x128xf32>
    %c0_39 = arith.constant 0 : index
    %c0_40 = arith.constant 0 : index
    %101 = vector.load %arg11[%c0_39, %c0_40] : memref<8x128xf32, #tpu.memory_space<vmem>>, vector<8x128xf32>
    tpu.vector_store %arg11[%c0_39, %c0_40], %100 {strides = array<i32>} : memref<8x128xf32, #tpu.memory_space<vmem>>, vector<8x128xf32>,
    %cst_41 = arith.constant 0.000000e+00 : f32
    %102 = vector.broadcast %cst_41 : f32 to vector<8x128xf32>
    %103 = arith.select %97, %93, %102 : vector<8x128xi1>, vector<8x128xf32>
    %104 = arith.index_cast %57 : i32 to index
    %c0_42 = arith.constant 0 : index
    %c0_43 = arith.constant 0 : index
    %105 = vector.load %arg7[%104, %c0_42, %c0_43] : memref<8x8x128xf32, #tpu.memory_space<vmem>>, vector<1x8x128xf32>
    %106 = vector.shape_cast %105 : vector<1x8x128xf32> to vector<8x128xf32>
    %107 = vector.shape_cast %103 : vector<8x128xf32> to vector<1x8x128xf32>
    tpu.vector_store %arg7[%104, %c0_42, %c0_43], %107 {strides = array<i32>} : memref<8x8x128xf32, #tpu.memory_space<vmem>>, vector<1x8x128xf32>,
    %c1_i32 = arith.constant 1 : i32
    %108 = arith.addi %3, %c1_i32 : i32
    %c0_44 = arith.constant 0 : index
    %c0_45 = arith.constant 0 : index
    %109 = vector.load %arg8[%c0_44, %c0_45] : memref<8x128xf32, #tpu.memory_space<vmem>>, vector<8x128xf32>
    %c0_46 = arith.constant 0 : index
    %c0_47 = arith.constant 0 : index
    %110 = vector.load %arg9[%c0_46, %c0_47] : memref<8x128xf32, #tpu.memory_space<vmem>>, vector<8x128xf32>
    %c0_48 = arith.constant 0 : index
    %111 = arith.index_cast %c1_i32 : i32 to index
    %c0_49 = arith.constant 0 : index
    %c0_50 = arith.constant 0 : index
    %112 = vector.load %arg2[%c0_48, %111, %c0_49, %c0_50] : memref<1x8x8x512xbf16, #tpu.memory_space<vmem>>, vector<1x1x8x512xbf16>
    %113 = vector.shape_cast %112 : vector<1x1x8x512xbf16> to vector<8x512xbf16>
    %114 = arith.extf %113 : vector<8x512xbf16> to vector<8x512xf32>
    %115 = arith.truncf %109 : vector<8x128xf32> to vector<8x128xbf16>
    %c0_51 = arith.constant 0 : index
    %c0_52 = arith.constant 0 : index
    %116 = vector.load %arg4[%c0_51, %c0_52] : memref<128x512xbf16, #tpu.memory_space<vmem>>, vector<128x512xbf16>
    %cst_53 = arith.constant dense<0.000000e+00> : vector<8x512xf32>
    %117 = tpu.matmul %115, %116, %cst_53 {dimension_numbers = #tpu.dot_dimension_numbers<[1], [0], [0], [1], [0, 0, 1, 1], [], []>} : vector<8x128xbf16>, vector<128x512xbf16>, vector<8x512xf32> -> vector<8x512xf32>
    %118 = arith.addf %114, %117 : vector<8x512xf32>
    %119 = vector.extract_strided_slice %118 {offsets = [0, 0], sizes = [8, 128], strides = [1, 1]} : vector<8x512xf32> to vector<8x128xf32>
    %120 = arith.negf %119 : vector<8x128xf32>
    %121 = math.exp %120 : vector<8x128xf32>
    %cst_54 = arith.constant 1.000000e+00 : f32
    %122 = vector.broadcast %cst_54 : f32 to vector<8x128xf32>
    %123 = arith.addf %122, %121 : vector<8x128xf32>
    %124 = arith.divf %122, %123 : vector<8x128xf32>
    %125 = vector.extract_strided_slice %118 {offsets = [0, 128], sizes = [8, 128], strides = [1, 1]} : vector<8x512xf32> to vector<8x128xf32>
    %126 = arith.negf %125 : vector<8x128xf32>
    %127 = math.exp %126 : vector<8x128xf32>
    %cst_55 = arith.constant 1.000000e+00 : f32
    %128 = vector.broadcast %cst_55 : f32 to vector<8x128xf32>
    %129 = arith.addf %128, %127 : vector<8x128xf32>
    %130 = arith.divf %128, %129 : vector<8x128xf32>
    %131 = vector.extract_strided_slice %118 {offsets = [0, 256], sizes = [8, 128], strides = [1, 1]} : vector<8x512xf32> to vector<8x128xf32>
    %132 = math.tanh %131 : vector<8x128xf32>
    %133 = vector.extract_strided_slice %118 {offsets = [0, 384], sizes = [8, 128], strides = [1, 1]} : vector<8x512xf32> to vector<8x128xf32>
    %134 = arith.negf %133 : vector<8x128xf32>
    %135 = math.exp %134 : vector<8x128xf32>
    %cst_56 = arith.constant 1.000000e+00 : f32
    %136 = vector.broadcast %cst_56 : f32 to vector<8x128xf32>
    %137 = arith.addf %136, %135 : vector<8x128xf32>
    %138 = arith.divf %136, %137 : vector<8x128xf32>
    %139 = arith.mulf %130, %110 : vector<8x128xf32>
    %140 = arith.mulf %124, %132 : vector<8x128xf32>
    %141 = arith.addf %139, %140 : vector<8x128xf32>
    %142 = math.tanh %141 : vector<8x128xf32>
    %143 = arith.mulf %138, %142 : vector<8x128xf32>
    %144 = vector.broadcast %108 : i32 to vector<8x1xi32>
    %145 = arith.cmpi sgt, %6, %144 : vector<8x1xi32>
    %146 = vector.shape_cast %145 : vector<8x1xi1> to vector<8x1xi1>
    %147 = vector.broadcast %146 : vector<8x1xi1> to vector<8x128xi1>
    %148 = arith.select %147, %143, %109 : vector<8x128xi1>, vector<8x128xf32>
    %c0_57 = arith.constant 0 : index
    %c0_58 = arith.constant 0 : index
    %149 = vector.load %arg8[%c0_57, %c0_58] : memref<8x128xf32, #tpu.memory_space<vmem>>, vector<8x128xf32>
    tpu.vector_store %arg8[%c0_57, %c0_58], %148 {strides = array<i32>} : memref<8x128xf32, #tpu.memory_space<vmem>>, vector<8x128xf32>,
    %150 = arith.select %147, %141, %110 : vector<8x128xi1>, vector<8x128xf32>
    %c0_59 = arith.constant 0 : index
    %c0_60 = arith.constant 0 : index
    %151 = vector.load %arg9[%c0_59, %c0_60] : memref<8x128xf32, #tpu.memory_space<vmem>>, vector<8x128xf32>
    tpu.vector_store %arg9[%c0_59, %c0_60], %150 {strides = array<i32>} : memref<8x128xf32, #tpu.memory_space<vmem>>, vector<8x128xf32>,
    %cst_61 = arith.constant 0.000000e+00 : f32
    %152 = vector.broadcast %cst_61 : f32 to vector<8x128xf32>
    %153 = arith.select %147, %143, %152 : vector<8x128xi1>, vector<8x128xf32>
    %154 = arith.index_cast %c1_i32 : i32 to index
    %c0_62 = arith.constant 0 : index
    %c0_63 = arith.constant 0 : index
    %155 = vector.load %arg6[%154, %c0_62, %c0_63] : memref<8x8x128xf32, #tpu.memory_space<vmem>>, vector<1x8x128xf32>
    %156 = vector.shape_cast %155 : vector<1x8x128xf32> to vector<8x128xf32>
    %157 = vector.shape_cast %153 : vector<8x128xf32> to vector<1x8x128xf32>
    tpu.vector_store %arg6[%154, %c0_62, %c0_63], %157 {strides = array<i32>} : memref<8x8x128xf32, #tpu.memory_space<vmem>>, vector<1x8x128xf32>,
    %c7_i32_64 = arith.constant 7 : i32
    %158 = arith.subi %c7_i32_64, %c1_i32 : i32
    %159 = arith.addi %5, %158 : i32
    %c0_65 = arith.constant 0 : index
    %c0_66 = arith.constant 0 : index
    %160 = vector.load %arg10[%c0_65, %c0_66] : memref<8x128xf32, #tpu.memory_space<vmem>>, vector<8x128xf32>
    %c0_67 = arith.constant 0 : index
    %c0_68 = arith.constant 0 : index
    %161 = vector.load %arg11[%c0_67, %c0_68] : memref<8x128xf32, #tpu.memory_space<vmem>>, vector<8x128xf32>
    %c0_69 = arith.constant 0 : index
    %162 = arith.index_cast %158 : i32 to index
    %c0_70 = arith.constant 0 : index
    %c0_71 = arith.constant 0 : index
    %163 = vector.load %arg3[%c0_69, %162, %c0_70, %c0_71] : memref<1x8x8x512xbf16, #tpu.memory_space<vmem>>, vector<1x1x8x512xbf16>
    %164 = vector.shape_cast %163 : vector<1x1x8x512xbf16> to vector<8x512xbf16>
    %165 = arith.extf %164 : vector<8x512xbf16> to vector<8x512xf32>
    %166 = arith.truncf %160 : vector<8x128xf32> to vector<8x128xbf16>
    %c0_72 = arith.constant 0 : index
    %c0_73 = arith.constant 0 : index
    %167 = vector.load %arg5[%c0_72, %c0_73] : memref<128x512xbf16, #tpu.memory_space<vmem>>, vector<128x512xbf16>
    %cst_74 = arith.constant dense<0.000000e+00> : vector<8x512xf32>
    %168 = tpu.matmul %166, %167, %cst_74 {dimension_numbers = #tpu.dot_dimension_numbers<[1], [0], [0], [1], [0, 0, 1, 1], [], []>} : vector<8x128xbf16>, vector<128x512xbf16>, vector<8x512xf32> -> vector<8x512xf32>
    %169 = arith.addf %165, %168 : vector<8x512xf32>
    %170 = vector.extract_strided_slice %169 {offsets = [0, 0], sizes = [8, 128], strides = [1, 1]} : vector<8x512xf32> to vector<8x128xf32>
    %171 = arith.negf %170 : vector<8x128xf32>
    %172 = math.exp %171 : vector<8x128xf32>
    %cst_75 = arith.constant 1.000000e+00 : f32
    %173 = vector.broadcast %cst_75 : f32 to vector<8x128xf32>
    %174 = arith.addf %173, %172 : vector<8x128xf32>
    %175 = arith.divf %173, %174 : vector<8x128xf32>
    %176 = vector.extract_strided_slice %169 {offsets = [0, 128], sizes = [8, 128], strides = [1, 1]} : vector<8x512xf32> to vector<8x128xf32>
    %177 = arith.negf %176 : vector<8x128xf32>
    %178 = math.exp %177 : vector<8x128xf32>
    %cst_76 = arith.constant 1.000000e+00 : f32
    %179 = vector.broadcast %cst_76 : f32 to vector<8x128xf32>
    %180 = arith.addf %179, %178 : vector<8x128xf32>
    %181 = arith.divf %179, %180 : vector<8x128xf32>
    %182 = vector.extract_strided_slice %169 {offsets = [0, 256], sizes = [8, 128], strides = [1, 1]} : vector<8x512xf32> to vector<8x128xf32>
    %183 = math.tanh %182 : vector<8x128xf32>
    %184 = vector.extract_strided_slice %169 {offsets = [0, 384], sizes = [8, 128], strides = [1, 1]} : vector<8x512xf32> to vector<8x128xf32>
    %185 = arith.negf %184 : vector<8x128xf32>
    %186 = math.exp %185 : vector<8x128xf32>
    %cst_77 = arith.constant 1.000000e+00 : f32
    %187 = vector.broadcast %cst_77 : f32 to vector<8x128xf32>
    %188 = arith.addf %187, %186 : vector<8x128xf32>
    %189 = arith.divf %187, %188 : vector<8x128xf32>
    %190 = arith.mulf %181, %161 : vector<8x128xf32>
    %191 = arith.mulf %175, %183 : vector<8x128xf32>
    %192 = arith.addf %190, %191 : vector<8x128xf32>
    %193 = math.tanh %192 : vector<8x128xf32>
    %194 = arith.mulf %189, %193 : vector<8x128xf32>
    %195 = vector.broadcast %159 : i32 to vector<8x1xi32>
    %196 = arith.cmpi sgt, %6, %195 : vector<8x1xi32>
    %197 = vector.shape_cast %196 : vector<8x1xi1> to vector<8x1xi1>
    %198 = vector.broadcast %197 : vector<8x1xi1> to vector<8x128xi1>
    %199 = arith.select %198, %194, %160 : vector<8x128xi1>, vector<8x128xf32>
    %c0_78 = arith.constant 0 : index
    %c0_79 = arith.constant 0 : index
    %200 = vector.load %arg10[%c0_78, %c0_79] : memref<8x128xf32, #tpu.memory_space<vmem>>, vector<8x128xf32>
    tpu.vector_store %arg10[%c0_78, %c0_79], %199 {strides = array<i32>} : memref<8x128xf32, #tpu.memory_space<vmem>>, vector<8x128xf32>,
    %201 = arith.select %198, %192, %161 : vector<8x128xi1>, vector<8x128xf32>
    %c0_80 = arith.constant 0 : index
    %c0_81 = arith.constant 0 : index
    %202 = vector.load %arg11[%c0_80, %c0_81] : memref<8x128xf32, #tpu.memory_space<vmem>>, vector<8x128xf32>
    tpu.vector_store %arg11[%c0_80, %c0_81], %201 {strides = array<i32>} : memref<8x128xf32, #tpu.memory_space<vmem>>, vector<8x128xf32>,
    %cst_82 = arith.constant 0.000000e+00 : f32
    %203 = vector.broadcast %cst_82 : f32 to vector<8x128xf32>
    %204 = arith.select %198, %194, %203 : vector<8x128xi1>, vector<8x128xf32>
    %205 = arith.index_cast %158 : i32 to index
    %c0_83 = arith.constant 0 : index
    %c0_84 = arith.constant 0 : index
    %206 = vector.load %arg7[%205, %c0_83, %c0_84] : memref<8x8x128xf32, #tpu.memory_space<vmem>>, vector<1x8x128xf32>
    %207 = vector.shape_cast %206 : vector<1x8x128xf32> to vector<8x128xf32>
    %208 = vector.shape_cast %204 : vector<8x128xf32> to vector<1x8x128xf32>
    tpu.vector_store %arg7[%205, %c0_83, %c0_84], %208 {strides = array<i32>} : memref<8x8x128xf32, #tpu.memory_space<vmem>>, vector<1x8x128xf32>,
    %c2_i32 = arith.constant 2 : i32
    %209 = arith.addi %3, %c2_i32 : i32
    %c0_85 = arith.constant 0 : index
    %c0_86 = arith.constant 0 : index
    %210 = vector.load %arg8[%c0_85, %c0_86] : memref<8x128xf32, #tpu.memory_space<vmem>>, vector<8x128xf32>
    %c0_87 = arith.constant 0 : index
    %c0_88 = arith.constant 0 : index
    %211 = vector.load %arg9[%c0_87, %c0_88] : memref<8x128xf32, #tpu.memory_space<vmem>>, vector<8x128xf32>
    %c0_89 = arith.constant 0 : index
    %212 = arith.index_cast %c2_i32 : i32 to index
    %c0_90 = arith.constant 0 : index
    %c0_91 = arith.constant 0 : index
    %213 = vector.load %arg2[%c0_89, %212, %c0_90, %c0_91] : memref<1x8x8x512xbf16, #tpu.memory_space<vmem>>, vector<1x1x8x512xbf16>
    %214 = vector.shape_cast %213 : vector<1x1x8x512xbf16> to vector<8x512xbf16>
    %215 = arith.extf %214 : vector<8x512xbf16> to vector<8x512xf32>
    %216 = arith.truncf %210 : vector<8x128xf32> to vector<8x128xbf16>
    %c0_92 = arith.constant 0 : index
    %c0_93 = arith.constant 0 : index
    %217 = vector.load %arg4[%c0_92, %c0_93] : memref<128x512xbf16, #tpu.memory_space<vmem>>, vector<128x512xbf16>
    %cst_94 = arith.constant dense<0.000000e+00> : vector<8x512xf32>
    %218 = tpu.matmul %216, %217, %cst_94 {dimension_numbers = #tpu.dot_dimension_numbers<[1], [0], [0], [1], [0, 0, 1, 1], [], []>} : vector<8x128xbf16>, vector<128x512xbf16>, vector<8x512xf32> -> vector<8x512xf32>
    %219 = arith.addf %215, %218 : vector<8x512xf32>
    %220 = vector.extract_strided_slice %219 {offsets = [0, 0], sizes = [8, 128], strides = [1, 1]} : vector<8x512xf32> to vector<8x128xf32>
    %221 = arith.negf %220 : vector<8x128xf32>
    %222 = math.exp %221 : vector<8x128xf32>
    %cst_95 = arith.constant 1.000000e+00 : f32
    %223 = vector.broadcast %cst_95 : f32 to vector<8x128xf32>
    %224 = arith.addf %223, %222 : vector<8x128xf32>
    %225 = arith.divf %223, %224 : vector<8x128xf32>
    %226 = vector.extract_strided_slice %219 {offsets = [0, 128], sizes = [8, 128], strides = [1, 1]} : vector<8x512xf32> to vector<8x128xf32>
    %227 = arith.negf %226 : vector<8x128xf32>
    %228 = math.exp %227 : vector<8x128xf32>
    %cst_96 = arith.constant 1.000000e+00 : f32
    %229 = vector.broadcast %cst_96 : f32 to vector<8x128xf32>
    %230 = arith.addf %229, %228 : vector<8x128xf32>
    %231 = arith.divf %229, %230 : vector<8x128xf32>
    %232 = vector.extract_strided_slice %219 {offsets = [0, 256], sizes = [8, 128], strides = [1, 1]} : vector<8x512xf32> to vector<8x128xf32>
    %233 = math.tanh %232 : vector<8x128xf32>
    %234 = vector.extract_strided_slice %219 {offsets = [0, 384], sizes = [8, 128], strides = [1, 1]} : vector<8x512xf32> to vector<8x128xf32>
    %235 = arith.negf %234 : vector<8x128xf32>
    %236 = math.exp %235 : vector<8x128xf32>
    %cst_97 = arith.constant 1.000000e+00 : f32
    %237 = vector.broadcast %cst_97 : f32 to vector<8x128xf32>
    %238 = arith.addf %237, %236 : vector<8x128xf32>
    %239 = arith.divf %237, %238 : vector<8x128xf32>
    %240 = arith.mulf %231, %211 : vector<8x128xf32>
    %241 = arith.mulf %225, %233 : vector<8x128xf32>
    %242 = arith.addf %240, %241 : vector<8x128xf32>
    %243 = math.tanh %242 : vector<8x128xf32>
    %244 = arith.mulf %239, %243 : vector<8x128xf32>
    %245 = vector.broadcast %209 : i32 to vector<8x1xi32>
    %246 = arith.cmpi sgt, %6, %245 : vector<8x1xi32>
    %247 = vector.shape_cast %246 : vector<8x1xi1> to vector<8x1xi1>
    %248 = vector.broadcast %247 : vector<8x1xi1> to vector<8x128xi1>
    %249 = arith.select %248, %244, %210 : vector<8x128xi1>, vector<8x128xf32>
    %c0_98 = arith.constant 0 : index
    %c0_99 = arith.constant 0 : index
    %250 = vector.load %arg8[%c0_98, %c0_99] : memref<8x128xf32, #tpu.memory_space<vmem>>, vector<8x128xf32>
    tpu.vector_store %arg8[%c0_98, %c0_99], %249 {strides = array<i32>} : memref<8x128xf32, #tpu.memory_space<vmem>>, vector<8x128xf32>,
    %251 = arith.select %248, %242, %211 : vector<8x128xi1>, vector<8x128xf32>
    %c0_100 = arith.constant 0 : index
    %c0_101 = arith.constant 0 : index
    %252 = vector.load %arg9[%c0_100, %c0_101] : memref<8x128xf32, #tpu.memory_space<vmem>>, vector<8x128xf32>
    tpu.vector_store %arg9[%c0_100, %c0_101], %251 {strides = array<i32>} : memref<8x128xf32, #tpu.memory_space<vmem>>, vector<8x128xf32>,
    %cst_102 = arith.constant 0.000000e+00 : f32
    %253 = vector.broadcast %cst_102 : f32 to vector<8x128xf32>
    %254 = arith.select %248, %244, %253 : vector<8x128xi1>, vector<8x128xf32>
    %255 = arith.index_cast %c2_i32 : i32 to index
    %c0_103 = arith.constant 0 : index
    %c0_104 = arith.constant 0 : index
    %256 = vector.load %arg6[%255, %c0_103, %c0_104] : memref<8x8x128xf32, #tpu.memory_space<vmem>>, vector<1x8x128xf32>
    %257 = vector.shape_cast %256 : vector<1x8x128xf32> to vector<8x128xf32>
    %258 = vector.shape_cast %254 : vector<8x128xf32> to vector<1x8x128xf32>
    tpu.vector_store %arg6[%255, %c0_103, %c0_104], %258 {strides = array<i32>} : memref<8x8x128xf32, #tpu.memory_space<vmem>>, vector<1x8x128xf32>,
    %c7_i32_105 = arith.constant 7 : i32
    %259 = arith.subi %c7_i32_105, %c2_i32 : i32
    %260 = arith.addi %5, %259 : i32
    %c0_106 = arith.constant 0 : index
    %c0_107 = arith.constant 0 : index
    %261 = vector.load %arg10[%c0_106, %c0_107] : memref<8x128xf32, #tpu.memory_space<vmem>>, vector<8x128xf32>
    %c0_108 = arith.constant 0 : index
    %c0_109 = arith.constant 0 : index
    %262 = vector.load %arg11[%c0_108, %c0_109] : memref<8x128xf32, #tpu.memory_space<vmem>>, vector<8x128xf32>
    %c0_110 = arith.constant 0 : index
    %263 = arith.index_cast %259 : i32 to index
    %c0_111 = arith.constant 0 : index
    %c0_112 = arith.constant 0 : index
    %264 = vector.load %arg3[%c0_110, %263, %c0_111, %c0_112] : memref<1x8x8x512xbf16, #tpu.memory_space<vmem>>, vector<1x1x8x512xbf16>
    %265 = vector.shape_cast %264 : vector<1x1x8x512xbf16> to vector<8x512xbf16>
    %266 = arith.extf %265 : vector<8x512xbf16> to vector<8x512xf32>
    %267 = arith.truncf %261 : vector<8x128xf32> to vector<8x128xbf16>
    %c0_113 = arith.constant 0 : index
    %c0_114 = arith.constant 0 : index
    %268 = vector.load %arg5[%c0_113, %c0_114] : memref<128x512xbf16, #tpu.memory_space<vmem>>, vector<128x512xbf16>
    %cst_115 = arith.constant dense<0.000000e+00> : vector<8x512xf32>
    %269 = tpu.matmul %267, %268, %cst_115 {dimension_numbers = #tpu.dot_dimension_numbers<[1], [0], [0], [1], [0, 0, 1, 1], [], []>} : vector<8x128xbf16>, vector<128x512xbf16>, vector<8x512xf32> -> vector<8x512xf32>
    %270 = arith.addf %266, %269 : vector<8x512xf32>
    %271 = vector.extract_strided_slice %270 {offsets = [0, 0], sizes = [8, 128], strides = [1, 1]} : vector<8x512xf32> to vector<8x128xf32>
    %272 = arith.negf %271 : vector<8x128xf32>
    %273 = math.exp %272 : vector<8x128xf32>
    %cst_116 = arith.constant 1.000000e+00 : f32
    %274 = vector.broadcast %cst_116 : f32 to vector<8x128xf32>
    %275 = arith.addf %274, %273 : vector<8x128xf32>
    %276 = arith.divf %274, %275 : vector<8x128xf32>
    %277 = vector.extract_strided_slice %270 {offsets = [0, 128], sizes = [8, 128], strides = [1, 1]} : vector<8x512xf32> to vector<8x128xf32>
    %278 = arith.negf %277 : vector<8x128xf32>
    %279 = math.exp %278 : vector<8x128xf32>
    %cst_117 = arith.constant 1.000000e+00 : f32
    %280 = vector.broadcast %cst_117 : f32 to vector<8x128xf32>
    %281 = arith.addf %280, %279 : vector<8x128xf32>
    %282 = arith.divf %280, %281 : vector<8x128xf32>
    %283 = vector.extract_strided_slice %270 {offsets = [0, 256], sizes = [8, 128], strides = [1, 1]} : vector<8x512xf32> to vector<8x128xf32>
    %284 = math.tanh %283 : vector<8x128xf32>
    %285 = vector.extract_strided_slice %270 {offsets = [0, 384], sizes = [8, 128], strides = [1, 1]} : vector<8x512xf32> to vector<8x128xf32>
    %286 = arith.negf %285 : vector<8x128xf32>
    %287 = math.exp %286 : vector<8x128xf32>
    %cst_118 = arith.constant 1.000000e+00 : f32
    %288 = vector.broadcast %cst_118 : f32 to vector<8x128xf32>
    %289 = arith.addf %288, %287 : vector<8x128xf32>
    %290 = arith.divf %288, %289 : vector<8x128xf32>
    %291 = arith.mulf %282, %262 : vector<8x128xf32>
    %292 = arith.mulf %276, %284 : vector<8x128xf32>
    %293 = arith.addf %291, %292 : vector<8x128xf32>
    %294 = math.tanh %293 : vector<8x128xf32>
    %295 = arith.mulf %290, %294 : vector<8x128xf32>
    %296 = vector.broadcast %260 : i32 to vector<8x1xi32>
    %297 = arith.cmpi sgt, %6, %296 : vector<8x1xi32>
    %298 = vector.shape_cast %297 : vector<8x1xi1> to vector<8x1xi1>
    %299 = vector.broadcast %298 : vector<8x1xi1> to vector<8x128xi1>
    %300 = arith.select %299, %295, %261 : vector<8x128xi1>, vector<8x128xf32>
    %c0_119 = arith.constant 0 : index
    %c0_120 = arith.constant 0 : index
    %301 = vector.load %arg10[%c0_119, %c0_120] : memref<8x128xf32, #tpu.memory_space<vmem>>, vector<8x128xf32>
    tpu.vector_store %arg10[%c0_119, %c0_120], %300 {strides = array<i32>} : memref<8x128xf32, #tpu.memory_space<vmem>>, vector<8x128xf32>,
    %302 = arith.select %299, %293, %262 : vector<8x128xi1>, vector<8x128xf32>
    %c0_121 = arith.constant 0 : index
    %c0_122 = arith.constant 0 : index
    %303 = vector.load %arg11[%c0_121, %c0_122] : memref<8x128xf32, #tpu.memory_space<vmem>>, vector<8x128xf32>
    tpu.vector_store %arg11[%c0_121, %c0_122], %302 {strides = array<i32>} : memref<8x128xf32, #tpu.memory_space<vmem>>, vector<8x128xf32>,
    %cst_123 = arith.constant 0.000000e+00 : f32
    %304 = vector.broadcast %cst_123 : f32 to vector<8x128xf32>
    %305 = arith.select %299, %295, %304 : vector<8x128xi1>, vector<8x128xf32>
    %306 = arith.index_cast %259 : i32 to index
    %c0_124 = arith.constant 0 : index
    %c0_125 = arith.constant 0 : index
    %307 = vector.load %arg7[%306, %c0_124, %c0_125] : memref<8x8x128xf32, #tpu.memory_space<vmem>>, vector<1x8x128xf32>
    %308 = vector.shape_cast %307 : vector<1x8x128xf32> to vector<8x128xf32>
    %309 = vector.shape_cast %305 : vector<8x128xf32> to vector<1x8x128xf32>
    tpu.vector_store %arg7[%306, %c0_124, %c0_125], %309 {strides = array<i32>} : memref<8x8x128xf32, #tpu.memory_space<vmem>>, vector<1x8x128xf32>,
    %c3_i32 = arith.constant 3 : i32
    %310 = arith.addi %3, %c3_i32 : i32
    %c0_126 = arith.constant 0 : index
    %c0_127 = arith.constant 0 : index
    %311 = vector.load %arg8[%c0_126, %c0_127] : memref<8x128xf32, #tpu.memory_space<vmem>>, vector<8x128xf32>
    %c0_128 = arith.constant 0 : index
    %c0_129 = arith.constant 0 : index
    %312 = vector.load %arg9[%c0_128, %c0_129] : memref<8x128xf32, #tpu.memory_space<vmem>>, vector<8x128xf32>
    %c0_130 = arith.constant 0 : index
    %313 = arith.index_cast %c3_i32 : i32 to index
    %c0_131 = arith.constant 0 : index
    %c0_132 = arith.constant 0 : index
    %314 = vector.load %arg2[%c0_130, %313, %c0_131, %c0_132] : memref<1x8x8x512xbf16, #tpu.memory_space<vmem>>, vector<1x1x8x512xbf16>
    %315 = vector.shape_cast %314 : vector<1x1x8x512xbf16> to vector<8x512xbf16>
    %316 = arith.extf %315 : vector<8x512xbf16> to vector<8x512xf32>
    %317 = arith.truncf %311 : vector<8x128xf32> to vector<8x128xbf16>
    %c0_133 = arith.constant 0 : index
    %c0_134 = arith.constant 0 : index
    %318 = vector.load %arg4[%c0_133, %c0_134] : memref<128x512xbf16, #tpu.memory_space<vmem>>, vector<128x512xbf16>
    %cst_135 = arith.constant dense<0.000000e+00> : vector<8x512xf32>
    %319 = tpu.matmul %317, %318, %cst_135 {dimension_numbers = #tpu.dot_dimension_numbers<[1], [0], [0], [1], [0, 0, 1, 1], [], []>} : vector<8x128xbf16>, vector<128x512xbf16>, vector<8x512xf32> -> vector<8x512xf32>
    %320 = arith.addf %316, %319 : vector<8x512xf32>
    %321 = vector.extract_strided_slice %320 {offsets = [0, 0], sizes = [8, 128], strides = [1, 1]} : vector<8x512xf32> to vector<8x128xf32>
    %322 = arith.negf %321 : vector<8x128xf32>
    %323 = math.exp %322 : vector<8x128xf32>
    %cst_136 = arith.constant 1.000000e+00 : f32
    %324 = vector.broadcast %cst_136 : f32 to vector<8x128xf32>
    %325 = arith.addf %324, %323 : vector<8x128xf32>
    %326 = arith.divf %324, %325 : vector<8x128xf32>
    %327 = vector.extract_strided_slice %320 {offsets = [0, 128], sizes = [8, 128], strides = [1, 1]} : vector<8x512xf32> to vector<8x128xf32>
    %328 = arith.negf %327 : vector<8x128xf32>
    %329 = math.exp %328 : vector<8x128xf32>
    %cst_137 = arith.constant 1.000000e+00 : f32
    %330 = vector.broadcast %cst_137 : f32 to vector<8x128xf32>
    %331 = arith.addf %330, %329 : vector<8x128xf32>
    %332 = arith.divf %330, %331 : vector<8x128xf32>
    %333 = vector.extract_strided_slice %320 {offsets = [0, 256], sizes = [8, 128], strides = [1, 1]} : vector<8x512xf32> to vector<8x128xf32>
    %334 = math.tanh %333 : vector<8x128xf32>
    %335 = vector.extract_strided_slice %320 {offsets = [0, 384], sizes = [8, 128], strides = [1, 1]} : vector<8x512xf32> to vector<8x128xf32>
    %336 = arith.negf %335 : vector<8x128xf32>
    %337 = math.exp %336 : vector<8x128xf32>
    %cst_138 = arith.constant 1.000000e+00 : f32
    %338 = vector.broadcast %cst_138 : f32 to vector<8x128xf32>
    %339 = arith.addf %338, %337 : vector<8x128xf32>
    %340 = arith.divf %338, %339 : vector<8x128xf32>
    %341 = arith.mulf %332, %312 : vector<8x128xf32>
    %342 = arith.mulf %326, %334 : vector<8x128xf32>
    %343 = arith.addf %341, %342 : vector<8x128xf32>
    %344 = math.tanh %343 : vector<8x128xf32>
    %345 = arith.mulf %340, %344 : vector<8x128xf32>
    %346 = vector.broadcast %310 : i32 to vector<8x1xi32>
    %347 = arith.cmpi sgt, %6, %346 : vector<8x1xi32>
    %348 = vector.shape_cast %347 : vector<8x1xi1> to vector<8x1xi1>
    %349 = vector.broadcast %348 : vector<8x1xi1> to vector<8x128xi1>
    %350 = arith.select %349, %345, %311 : vector<8x128xi1>, vector<8x128xf32>
    %c0_139 = arith.constant 0 : index
    %c0_140 = arith.constant 0 : index
    %351 = vector.load %arg8[%c0_139, %c0_140] : memref<8x128xf32, #tpu.memory_space<vmem>>, vector<8x128xf32>
    tpu.vector_store %arg8[%c0_139, %c0_140], %350 {strides = array<i32>} : memref<8x128xf32, #tpu.memory_space<vmem>>, vector<8x128xf32>,
    %352 = arith.select %349, %343, %312 : vector<8x128xi1>, vector<8x128xf32>
    %c0_141 = arith.constant 0 : index
    %c0_142 = arith.constant 0 : index
    %353 = vector.load %arg9[%c0_141, %c0_142] : memref<8x128xf32, #tpu.memory_space<vmem>>, vector<8x128xf32>
    tpu.vector_store %arg9[%c0_141, %c0_142], %352 {strides = array<i32>} : memref<8x128xf32, #tpu.memory_space<vmem>>, vector<8x128xf32>,
    %cst_143 = arith.constant 0.000000e+00 : f32
    %354 = vector.broadcast %cst_143 : f32 to vector<8x128xf32>
    %355 = arith.select %349, %345, %354 : vector<8x128xi1>, vector<8x128xf32>
    %356 = arith.index_cast %c3_i32 : i32 to index
    %c0_144 = arith.constant 0 : index
    %c0_145 = arith.constant 0 : index
    %357 = vector.load %arg6[%356, %c0_144, %c0_145] : memref<8x8x128xf32, #tpu.memory_space<vmem>>, vector<1x8x128xf32>
    %358 = vector.shape_cast %357 : vector<1x8x128xf32> to vector<8x128xf32>
    %359 = vector.shape_cast %355 : vector<8x128xf32> to vector<1x8x128xf32>
    tpu.vector_store %arg6[%356, %c0_144, %c0_145], %359 {strides = array<i32>} : memref<8x8x128xf32, #tpu.memory_space<vmem>>, vector<1x8x128xf32>,
    %c7_i32_146 = arith.constant 7 : i32
    %360 = arith.subi %c7_i32_146, %c3_i32 : i32
    %361 = arith.addi %5, %360 : i32
    %c0_147 = arith.constant 0 : index
    %c0_148 = arith.constant 0 : index
    %362 = vector.load %arg10[%c0_147, %c0_148] : memref<8x128xf32, #tpu.memory_space<vmem>>, vector<8x128xf32>
    %c0_149 = arith.constant 0 : index
    %c0_150 = arith.constant 0 : index
    %363 = vector.load %arg11[%c0_149, %c0_150] : memref<8x128xf32, #tpu.memory_space<vmem>>, vector<8x128xf32>
    %c0_151 = arith.constant 0 : index
    %364 = arith.index_cast %360 : i32 to index
    %c0_152 = arith.constant 0 : index
    %c0_153 = arith.constant 0 : index
    %365 = vector.load %arg3[%c0_151, %364, %c0_152, %c0_153] : memref<1x8x8x512xbf16, #tpu.memory_space<vmem>>, vector<1x1x8x512xbf16>
    %366 = vector.shape_cast %365 : vector<1x1x8x512xbf16> to vector<8x512xbf16>
    %367 = arith.extf %366 : vector<8x512xbf16> to vector<8x512xf32>
    %368 = arith.truncf %362 : vector<8x128xf32> to vector<8x128xbf16>
    %c0_154 = arith.constant 0 : index
    %c0_155 = arith.constant 0 : index
    %369 = vector.load %arg5[%c0_154, %c0_155] : memref<128x512xbf16, #tpu.memory_space<vmem>>, vector<128x512xbf16>
    %cst_156 = arith.constant dense<0.000000e+00> : vector<8x512xf32>
    %370 = tpu.matmul %368, %369, %cst_156 {dimension_numbers = #tpu.dot_dimension_numbers<[1], [0], [0], [1], [0, 0, 1, 1], [], []>} : vector<8x128xbf16>, vector<128x512xbf16>, vector<8x512xf32> -> vector<8x512xf32>
    %371 = arith.addf %367, %370 : vector<8x512xf32>
    %372 = vector.extract_strided_slice %371 {offsets = [0, 0], sizes = [8, 128], strides = [1, 1]} : vector<8x512xf32> to vector<8x128xf32>
    %373 = arith.negf %372 : vector<8x128xf32>
    %374 = math.exp %373 : vector<8x128xf32>
    %cst_157 = arith.constant 1.000000e+00 : f32
    %375 = vector.broadcast %cst_157 : f32 to vector<8x128xf32>
    %376 = arith.addf %375, %374 : vector<8x128xf32>
    %377 = arith.divf %375, %376 : vector<8x128xf32>
    %378 = vector.extract_strided_slice %371 {offsets = [0, 128], sizes = [8, 128], strides = [1, 1]} : vector<8x512xf32> to vector<8x128xf32>
    %379 = arith.negf %378 : vector<8x128xf32>
    %380 = math.exp %379 : vector<8x128xf32>
    %cst_158 = arith.constant 1.000000e+00 : f32
    %381 = vector.broadcast %cst_158 : f32 to vector<8x128xf32>
    %382 = arith.addf %381, %380 : vector<8x128xf32>
    %383 = arith.divf %381, %382 : vector<8x128xf32>
    %384 = vector.extract_strided_slice %371 {offsets = [0, 256], sizes = [8, 128], strides = [1, 1]} : vector<8x512xf32> to vector<8x128xf32>
    %385 = math.tanh %384 : vector<8x128xf32>
    %386 = vector.extract_strided_slice %371 {offsets = [0, 384], sizes = [8, 128], strides = [1, 1]} : vector<8x512xf32> to vector<8x128xf32>
    %387 = arith.negf %386 : vector<8x128xf32>
    %388 = math.exp %387 : vector<8x128xf32>
    %cst_159 = arith.constant 1.000000e+00 : f32
    %389 = vector.broadcast %cst_159 : f32 to vector<8x128xf32>
    %390 = arith.addf %389, %388 : vector<8x128xf32>
    %391 = arith.divf %389, %390 : vector<8x128xf32>
    %392 = arith.mulf %383, %363 : vector<8x128xf32>
    %393 = arith.mulf %377, %385 : vector<8x128xf32>
    %394 = arith.addf %392, %393 : vector<8x128xf32>
    %395 = math.tanh %394 : vector<8x128xf32>
    %396 = arith.mulf %391, %395 : vector<8x128xf32>
    %397 = vector.broadcast %361 : i32 to vector<8x1xi32>
    %398 = arith.cmpi sgt, %6, %397 : vector<8x1xi32>
    %399 = vector.shape_cast %398 : vector<8x1xi1> to vector<8x1xi1>
    %400 = vector.broadcast %399 : vector<8x1xi1> to vector<8x128xi1>
    %401 = arith.select %400, %396, %362 : vector<8x128xi1>, vector<8x128xf32>
    %c0_160 = arith.constant 0 : index
    %c0_161 = arith.constant 0 : index
    %402 = vector.load %arg10[%c0_160, %c0_161] : memref<8x128xf32, #tpu.memory_space<vmem>>, vector<8x128xf32>
    tpu.vector_store %arg10[%c0_160, %c0_161], %401 {strides = array<i32>} : memref<8x128xf32, #tpu.memory_space<vmem>>, vector<8x128xf32>,
    %403 = arith.select %400, %394, %363 : vector<8x128xi1>, vector<8x128xf32>
    %c0_162 = arith.constant 0 : index
    %c0_163 = arith.constant 0 : index
    %404 = vector.load %arg11[%c0_162, %c0_163] : memref<8x128xf32, #tpu.memory_space<vmem>>, vector<8x128xf32>
    tpu.vector_store %arg11[%c0_162, %c0_163], %403 {strides = array<i32>} : memref<8x128xf32, #tpu.memory_space<vmem>>, vector<8x128xf32>,
    %cst_164 = arith.constant 0.000000e+00 : f32
    %405 = vector.broadcast %cst_164 : f32 to vector<8x128xf32>
    %406 = arith.select %400, %396, %405 : vector<8x128xi1>, vector<8x128xf32>
    %407 = arith.index_cast %360 : i32 to index
    %c0_165 = arith.constant 0 : index
    %c0_166 = arith.constant 0 : index
    %408 = vector.load %arg7[%407, %c0_165, %c0_166] : memref<8x8x128xf32, #tpu.memory_space<vmem>>, vector<1x8x128xf32>
    %409 = vector.shape_cast %408 : vector<1x8x128xf32> to vector<8x128xf32>
    %410 = vector.shape_cast %406 : vector<8x128xf32> to vector<1x8x128xf32>
    tpu.vector_store %arg7[%407, %c0_165, %c0_166], %410 {strides = array<i32>} : memref<8x8x128xf32, #tpu.memory_space<vmem>>, vector<1x8x128xf32>,
    %c4_i32 = arith.constant 4 : i32
    %411 = arith.addi %3, %c4_i32 : i32
    %c0_167 = arith.constant 0 : index
    %c0_168 = arith.constant 0 : index
    %412 = vector.load %arg8[%c0_167, %c0_168] : memref<8x128xf32, #tpu.memory_space<vmem>>, vector<8x128xf32>
    %c0_169 = arith.constant 0 : index
    %c0_170 = arith.constant 0 : index
    %413 = vector.load %arg9[%c0_169, %c0_170] : memref<8x128xf32, #tpu.memory_space<vmem>>, vector<8x128xf32>
    %c0_171 = arith.constant 0 : index
    %414 = arith.index_cast %c4_i32 : i32 to index
    %c0_172 = arith.constant 0 : index
    %c0_173 = arith.constant 0 : index
    %415 = vector.load %arg2[%c0_171, %414, %c0_172, %c0_173] : memref<1x8x8x512xbf16, #tpu.memory_space<vmem>>, vector<1x1x8x512xbf16>
    %416 = vector.shape_cast %415 : vector<1x1x8x512xbf16> to vector<8x512xbf16>
    %417 = arith.extf %416 : vector<8x512xbf16> to vector<8x512xf32>
    %418 = arith.truncf %412 : vector<8x128xf32> to vector<8x128xbf16>
    %c0_174 = arith.constant 0 : index
    %c0_175 = arith.constant 0 : index
    %419 = vector.load %arg4[%c0_174, %c0_175] : memref<128x512xbf16, #tpu.memory_space<vmem>>, vector<128x512xbf16>
    %cst_176 = arith.constant dense<0.000000e+00> : vector<8x512xf32>
    %420 = tpu.matmul %418, %419, %cst_176 {dimension_numbers = #tpu.dot_dimension_numbers<[1], [0], [0], [1], [0, 0, 1, 1], [], []>} : vector<8x128xbf16>, vector<128x512xbf16>, vector<8x512xf32> -> vector<8x512xf32>
    %421 = arith.addf %417, %420 : vector<8x512xf32>
    %422 = vector.extract_strided_slice %421 {offsets = [0, 0], sizes = [8, 128], strides = [1, 1]} : vector<8x512xf32> to vector<8x128xf32>
    %423 = arith.negf %422 : vector<8x128xf32>
    %424 = math.exp %423 : vector<8x128xf32>
    %cst_177 = arith.constant 1.000000e+00 : f32
    %425 = vector.broadcast %cst_177 : f32 to vector<8x128xf32>
    %426 = arith.addf %425, %424 : vector<8x128xf32>
    %427 = arith.divf %425, %426 : vector<8x128xf32>
    %428 = vector.extract_strided_slice %421 {offsets = [0, 128], sizes = [8, 128], strides = [1, 1]} : vector<8x512xf32> to vector<8x128xf32>
    %429 = arith.negf %428 : vector<8x128xf32>
    %430 = math.exp %429 : vector<8x128xf32>
    %cst_178 = arith.constant 1.000000e+00 : f32
    %431 = vector.broadcast %cst_178 : f32 to vector<8x128xf32>
    %432 = arith.addf %431, %430 : vector<8x128xf32>
    %433 = arith.divf %431, %432 : vector<8x128xf32>
    %434 = vector.extract_strided_slice %421 {offsets = [0, 256], sizes = [8, 128], strides = [1, 1]} : vector<8x512xf32> to vector<8x128xf32>
    %435 = math.tanh %434 : vector<8x128xf32>
    %436 = vector.extract_strided_slice %421 {offsets = [0, 384], sizes = [8, 128], strides = [1, 1]} : vector<8x512xf32> to vector<8x128xf32>
    %437 = arith.negf %436 : vector<8x128xf32>
    %438 = math.exp %437 : vector<8x128xf32>
    %cst_179 = arith.constant 1.000000e+00 : f32
    %439 = vector.broadcast %cst_179 : f32 to vector<8x128xf32>
    %440 = arith.addf %439, %438 : vector<8x128xf32>
    %441 = arith.divf %439, %440 : vector<8x128xf32>
    %442 = arith.mulf %433, %413 : vector<8x128xf32>
    %443 = arith.mulf %427, %435 : vector<8x128xf32>
    %444 = arith.addf %442, %443 : vector<8x128xf32>
    %445 = math.tanh %444 : vector<8x128xf32>
    %446 = arith.mulf %441, %445 : vector<8x128xf32>
    %447 = vector.broadcast %411 : i32 to vector<8x1xi32>
    %448 = arith.cmpi sgt, %6, %447 : vector<8x1xi32>
    %449 = vector.shape_cast %448 : vector<8x1xi1> to vector<8x1xi1>
    %450 = vector.broadcast %449 : vector<8x1xi1> to vector<8x128xi1>
    %451 = arith.select %450, %446, %412 : vector<8x128xi1>, vector<8x128xf32>
    %c0_180 = arith.constant 0 : index
    %c0_181 = arith.constant 0 : index
    %452 = vector.load %arg8[%c0_180, %c0_181] : memref<8x128xf32, #tpu.memory_space<vmem>>, vector<8x128xf32>
    tpu.vector_store %arg8[%c0_180, %c0_181], %451 {strides = array<i32>} : memref<8x128xf32, #tpu.memory_space<vmem>>, vector<8x128xf32>,
    %453 = arith.select %450, %444, %413 : vector<8x128xi1>, vector<8x128xf32>
    %c0_182 = arith.constant 0 : index
    %c0_183 = arith.constant 0 : index
    %454 = vector.load %arg9[%c0_182, %c0_183] : memref<8x128xf32, #tpu.memory_space<vmem>>, vector<8x128xf32>
    tpu.vector_store %arg9[%c0_182, %c0_183], %453 {strides = array<i32>} : memref<8x128xf32, #tpu.memory_space<vmem>>, vector<8x128xf32>,
    %cst_184 = arith.constant 0.000000e+00 : f32
    %455 = vector.broadcast %cst_184 : f32 to vector<8x128xf32>
    %456 = arith.select %450, %446, %455 : vector<8x128xi1>, vector<8x128xf32>
    %457 = arith.index_cast %c4_i32 : i32 to index
    %c0_185 = arith.constant 0 : index
    %c0_186 = arith.constant 0 : index
    %458 = vector.load %arg6[%457, %c0_185, %c0_186] : memref<8x8x128xf32, #tpu.memory_space<vmem>>, vector<1x8x128xf32>
    %459 = vector.shape_cast %458 : vector<1x8x128xf32> to vector<8x128xf32>
    %460 = vector.shape_cast %456 : vector<8x128xf32> to vector<1x8x128xf32>
    tpu.vector_store %arg6[%457, %c0_185, %c0_186], %460 {strides = array<i32>} : memref<8x8x128xf32, #tpu.memory_space<vmem>>, vector<1x8x128xf32>,
    %c7_i32_187 = arith.constant 7 : i32
    %461 = arith.subi %c7_i32_187, %c4_i32 : i32
    %462 = arith.addi %5, %461 : i32
    %c0_188 = arith.constant 0 : index
    %c0_189 = arith.constant 0 : index
    %463 = vector.load %arg10[%c0_188, %c0_189] : memref<8x128xf32, #tpu.memory_space<vmem>>, vector<8x128xf32>
    %c0_190 = arith.constant 0 : index
    %c0_191 = arith.constant 0 : index
    %464 = vector.load %arg11[%c0_190, %c0_191] : memref<8x128xf32, #tpu.memory_space<vmem>>, vector<8x128xf32>
    %c0_192 = arith.constant 0 : index
    %465 = arith.index_cast %461 : i32 to index
    %c0_193 = arith.constant 0 : index
    %c0_194 = arith.constant 0 : index
    %466 = vector.load %arg3[%c0_192, %465, %c0_193, %c0_194] : memref<1x8x8x512xbf16, #tpu.memory_space<vmem>>, vector<1x1x8x512xbf16>
    %467 = vector.shape_cast %466 : vector<1x1x8x512xbf16> to vector<8x512xbf16>
    %468 = arith.extf %467 : vector<8x512xbf16> to vector<8x512xf32>
    %469 = arith.truncf %463 : vector<8x128xf32> to vector<8x128xbf16>
    %c0_195 = arith.constant 0 : index
    %c0_196 = arith.constant 0 : index
    %470 = vector.load %arg5[%c0_195, %c0_196] : memref<128x512xbf16, #tpu.memory_space<vmem>>, vector<128x512xbf16>
    %cst_197 = arith.constant dense<0.000000e+00> : vector<8x512xf32>
    %471 = tpu.matmul %469, %470, %cst_197 {dimension_numbers = #tpu.dot_dimension_numbers<[1], [0], [0], [1], [0, 0, 1, 1], [], []>} : vector<8x128xbf16>, vector<128x512xbf16>, vector<8x512xf32> -> vector<8x512xf32>
    %472 = arith.addf %468, %471 : vector<8x512xf32>
    %473 = vector.extract_strided_slice %472 {offsets = [0, 0], sizes = [8, 128], strides = [1, 1]} : vector<8x512xf32> to vector<8x128xf32>
    %474 = arith.negf %473 : vector<8x128xf32>
    %475 = math.exp %474 : vector<8x128xf32>
    %cst_198 = arith.constant 1.000000e+00 : f32
    %476 = vector.broadcast %cst_198 : f32 to vector<8x128xf32>
    %477 = arith.addf %476, %475 : vector<8x128xf32>
    %478 = arith.divf %476, %477 : vector<8x128xf32>
    %479 = vector.extract_strided_slice %472 {offsets = [0, 128], sizes = [8, 128], strides = [1, 1]} : vector<8x512xf32> to vector<8x128xf32>
    %480 = arith.negf %479 : vector<8x128xf32>
    %481 = math.exp %480 : vector<8x128xf32>
    %cst_199 = arith.constant 1.000000e+00 : f32
    %482 = vector.broadcast %cst_199 : f32 to vector<8x128xf32>
    %483 = arith.addf %482, %481 : vector<8x128xf32>
    %484 = arith.divf %482, %483 : vector<8x128xf32>
    %485 = vector.extract_strided_slice %472 {offsets = [0, 256], sizes = [8, 128], strides = [1, 1]} : vector<8x512xf32> to vector<8x128xf32>
    %486 = math.tanh %485 : vector<8x128xf32>
    %487 = vector.extract_strided_slice %472 {offsets = [0, 384], sizes = [8, 128], strides = [1, 1]} : vector<8x512xf32> to vector<8x128xf32>
    %488 = arith.negf %487 : vector<8x128xf32>
    %489 = math.exp %488 : vector<8x128xf32>
    %cst_200 = arith.constant 1.000000e+00 : f32
    %490 = vector.broadcast %cst_200 : f32 to vector<8x128xf32>
    %491 = arith.addf %490, %489 : vector<8x128xf32>
    %492 = arith.divf %490, %491 : vector<8x128xf32>
    %493 = arith.mulf %484, %464 : vector<8x128xf32>
    %494 = arith.mulf %478, %486 : vector<8x128xf32>
    %495 = arith.addf %493, %494 : vector<8x128xf32>
    %496 = math.tanh %495 : vector<8x128xf32>
    %497 = arith.mulf %492, %496 : vector<8x128xf32>
    %498 = vector.broadcast %462 : i32 to vector<8x1xi32>
    %499 = arith.cmpi sgt, %6, %498 : vector<8x1xi32>
    %500 = vector.shape_cast %499 : vector<8x1xi1> to vector<8x1xi1>
    %501 = vector.broadcast %500 : vector<8x1xi1> to vector<8x128xi1>
    %502 = arith.select %501, %497, %463 : vector<8x128xi1>, vector<8x128xf32>
    %c0_201 = arith.constant 0 : index
    %c0_202 = arith.constant 0 : index
    %503 = vector.load %arg10[%c0_201, %c0_202] : memref<8x128xf32, #tpu.memory_space<vmem>>, vector<8x128xf32>
    tpu.vector_store %arg10[%c0_201, %c0_202], %502 {strides = array<i32>} : memref<8x128xf32, #tpu.memory_space<vmem>>, vector<8x128xf32>,
    %504 = arith.select %501, %495, %464 : vector<8x128xi1>, vector<8x128xf32>
    %c0_203 = arith.constant 0 : index
    %c0_204 = arith.constant 0 : index
    %505 = vector.load %arg11[%c0_203, %c0_204] : memref<8x128xf32, #tpu.memory_space<vmem>>, vector<8x128xf32>
    tpu.vector_store %arg11[%c0_203, %c0_204], %504 {strides = array<i32>} : memref<8x128xf32, #tpu.memory_space<vmem>>, vector<8x128xf32>,
    %cst_205 = arith.constant 0.000000e+00 : f32
    %506 = vector.broadcast %cst_205 : f32 to vector<8x128xf32>
    %507 = arith.select %501, %497, %506 : vector<8x128xi1>, vector<8x128xf32>
    %508 = arith.index_cast %461 : i32 to index
    %c0_206 = arith.constant 0 : index
    %c0_207 = arith.constant 0 : index
    %509 = vector.load %arg7[%508, %c0_206, %c0_207] : memref<8x8x128xf32, #tpu.memory_space<vmem>>, vector<1x8x128xf32>
    %510 = vector.shape_cast %509 : vector<1x8x128xf32> to vector<8x128xf32>
    %511 = vector.shape_cast %507 : vector<8x128xf32> to vector<1x8x128xf32>
    tpu.vector_store %arg7[%508, %c0_206, %c0_207], %511 {strides = array<i32>} : memref<8x8x128xf32, #tpu.memory_space<vmem>>, vector<1x8x128xf32>,
    %c5_i32 = arith.constant 5 : i32
    %512 = arith.addi %3, %c5_i32 : i32
    %c0_208 = arith.constant 0 : index
    %c0_209 = arith.constant 0 : index
    %513 = vector.load %arg8[%c0_208, %c0_209] : memref<8x128xf32, #tpu.memory_space<vmem>>, vector<8x128xf32>
    %c0_210 = arith.constant 0 : index
    %c0_211 = arith.constant 0 : index
    %514 = vector.load %arg9[%c0_210, %c0_211] : memref<8x128xf32, #tpu.memory_space<vmem>>, vector<8x128xf32>
    %c0_212 = arith.constant 0 : index
    %515 = arith.index_cast %c5_i32 : i32 to index
    %c0_213 = arith.constant 0 : index
    %c0_214 = arith.constant 0 : index
    %516 = vector.load %arg2[%c0_212, %515, %c0_213, %c0_214] : memref<1x8x8x512xbf16, #tpu.memory_space<vmem>>, vector<1x1x8x512xbf16>
    %517 = vector.shape_cast %516 : vector<1x1x8x512xbf16> to vector<8x512xbf16>
    %518 = arith.extf %517 : vector<8x512xbf16> to vector<8x512xf32>
    %519 = arith.truncf %513 : vector<8x128xf32> to vector<8x128xbf16>
    %c0_215 = arith.constant 0 : index
    %c0_216 = arith.constant 0 : index
    %520 = vector.load %arg4[%c0_215, %c0_216] : memref<128x512xbf16, #tpu.memory_space<vmem>>, vector<128x512xbf16>
    %cst_217 = arith.constant dense<0.000000e+00> : vector<8x512xf32>
    %521 = tpu.matmul %519, %520, %cst_217 {dimension_numbers = #tpu.dot_dimension_numbers<[1], [0], [0], [1], [0, 0, 1, 1], [], []>} : vector<8x128xbf16>, vector<128x512xbf16>, vector<8x512xf32> -> vector<8x512xf32>
    %522 = arith.addf %518, %521 : vector<8x512xf32>
    %523 = vector.extract_strided_slice %522 {offsets = [0, 0], sizes = [8, 128], strides = [1, 1]} : vector<8x512xf32> to vector<8x128xf32>
    %524 = arith.negf %523 : vector<8x128xf32>
    %525 = math.exp %524 : vector<8x128xf32>
    %cst_218 = arith.constant 1.000000e+00 : f32
    %526 = vector.broadcast %cst_218 : f32 to vector<8x128xf32>
    %527 = arith.addf %526, %525 : vector<8x128xf32>
    %528 = arith.divf %526, %527 : vector<8x128xf32>
    %529 = vector.extract_strided_slice %522 {offsets = [0, 128], sizes = [8, 128], strides = [1, 1]} : vector<8x512xf32> to vector<8x128xf32>
    %530 = arith.negf %529 : vector<8x128xf32>
    %531 = math.exp %530 : vector<8x128xf32>
    %cst_219 = arith.constant 1.000000e+00 : f32
    %532 = vector.broadcast %cst_219 : f32 to vector<8x128xf32>
    %533 = arith.addf %532, %531 : vector<8x128xf32>
    %534 = arith.divf %532, %533 : vector<8x128xf32>
    %535 = vector.extract_strided_slice %522 {offsets = [0, 256], sizes = [8, 128], strides = [1, 1]} : vector<8x512xf32> to vector<8x128xf32>
    %536 = math.tanh %535 : vector<8x128xf32>
    %537 = vector.extract_strided_slice %522 {offsets = [0, 384], sizes = [8, 128], strides = [1, 1]} : vector<8x512xf32> to vector<8x128xf32>
    %538 = arith.negf %537 : vector<8x128xf32>
    %539 = math.exp %538 : vector<8x128xf32>
    %cst_220 = arith.constant 1.000000e+00 : f32
    %540 = vector.broadcast %cst_220 : f32 to vector<8x128xf32>
    %541 = arith.addf %540, %539 : vector<8x128xf32>
    %542 = arith.divf %540, %541 : vector<8x128xf32>
    %543 = arith.mulf %534, %514 : vector<8x128xf32>
    %544 = arith.mulf %528, %536 : vector<8x128xf32>
    %545 = arith.addf %543, %544 : vector<8x128xf32>
    %546 = math.tanh %545 : vector<8x128xf32>
    %547 = arith.mulf %542, %546 : vector<8x128xf32>
    %548 = vector.broadcast %512 : i32 to vector<8x1xi32>
    %549 = arith.cmpi sgt, %6, %548 : vector<8x1xi32>
    %550 = vector.shape_cast %549 : vector<8x1xi1> to vector<8x1xi1>
    %551 = vector.broadcast %550 : vector<8x1xi1> to vector<8x128xi1>
    %552 = arith.select %551, %547, %513 : vector<8x128xi1>, vector<8x128xf32>
    %c0_221 = arith.constant 0 : index
    %c0_222 = arith.constant 0 : index
    %553 = vector.load %arg8[%c0_221, %c0_222] : memref<8x128xf32, #tpu.memory_space<vmem>>, vector<8x128xf32>
    tpu.vector_store %arg8[%c0_221, %c0_222], %552 {strides = array<i32>} : memref<8x128xf32, #tpu.memory_space<vmem>>, vector<8x128xf32>,
    %554 = arith.select %551, %545, %514 : vector<8x128xi1>, vector<8x128xf32>
    %c0_223 = arith.constant 0 : index
    %c0_224 = arith.constant 0 : index
    %555 = vector.load %arg9[%c0_223, %c0_224] : memref<8x128xf32, #tpu.memory_space<vmem>>, vector<8x128xf32>
    tpu.vector_store %arg9[%c0_223, %c0_224], %554 {strides = array<i32>} : memref<8x128xf32, #tpu.memory_space<vmem>>, vector<8x128xf32>,
    %cst_225 = arith.constant 0.000000e+00 : f32
    %556 = vector.broadcast %cst_225 : f32 to vector<8x128xf32>
    %557 = arith.select %551, %547, %556 : vector<8x128xi1>, vector<8x128xf32>
    %558 = arith.index_cast %c5_i32 : i32 to index
    %c0_226 = arith.constant 0 : index
    %c0_227 = arith.constant 0 : index
    %559 = vector.load %arg6[%558, %c0_226, %c0_227] : memref<8x8x128xf32, #tpu.memory_space<vmem>>, vector<1x8x128xf32>
    %560 = vector.shape_cast %559 : vector<1x8x128xf32> to vector<8x128xf32>
    %561 = vector.shape_cast %557 : vector<8x128xf32> to vector<1x8x128xf32>
    tpu.vector_store %arg6[%558, %c0_226, %c0_227], %561 {strides = array<i32>} : memref<8x8x128xf32, #tpu.memory_space<vmem>>, vector<1x8x128xf32>,
    %c7_i32_228 = arith.constant 7 : i32
    %562 = arith.subi %c7_i32_228, %c5_i32 : i32
    %563 = arith.addi %5, %562 : i32
    %c0_229 = arith.constant 0 : index
    %c0_230 = arith.constant 0 : index
    %564 = vector.load %arg10[%c0_229, %c0_230] : memref<8x128xf32, #tpu.memory_space<vmem>>, vector<8x128xf32>
    %c0_231 = arith.constant 0 : index
    %c0_232 = arith.constant 0 : index
    %565 = vector.load %arg11[%c0_231, %c0_232] : memref<8x128xf32, #tpu.memory_space<vmem>>, vector<8x128xf32>
    %c0_233 = arith.constant 0 : index
    %566 = arith.index_cast %562 : i32 to index
    %c0_234 = arith.constant 0 : index
    %c0_235 = arith.constant 0 : index
    %567 = vector.load %arg3[%c0_233, %566, %c0_234, %c0_235] : memref<1x8x8x512xbf16, #tpu.memory_space<vmem>>, vector<1x1x8x512xbf16>
    %568 = vector.shape_cast %567 : vector<1x1x8x512xbf16> to vector<8x512xbf16>
    %569 = arith.extf %568 : vector<8x512xbf16> to vector<8x512xf32>
    %570 = arith.truncf %564 : vector<8x128xf32> to vector<8x128xbf16>
    %c0_236 = arith.constant 0 : index
    %c0_237 = arith.constant 0 : index
    %571 = vector.load %arg5[%c0_236, %c0_237] : memref<128x512xbf16, #tpu.memory_space<vmem>>, vector<128x512xbf16>
    %cst_238 = arith.constant dense<0.000000e+00> : vector<8x512xf32>
    %572 = tpu.matmul %570, %571, %cst_238 {dimension_numbers = #tpu.dot_dimension_numbers<[1], [0], [0], [1], [0, 0, 1, 1], [], []>} : vector<8x128xbf16>, vector<128x512xbf16>, vector<8x512xf32> -> vector<8x512xf32>
    %573 = arith.addf %569, %572 : vector<8x512xf32>
    %574 = vector.extract_strided_slice %573 {offsets = [0, 0], sizes = [8, 128], strides = [1, 1]} : vector<8x512xf32> to vector<8x128xf32>
    %575 = arith.negf %574 : vector<8x128xf32>
    %576 = math.exp %575 : vector<8x128xf32>
    %cst_239 = arith.constant 1.000000e+00 : f32
    %577 = vector.broadcast %cst_239 : f32 to vector<8x128xf32>
    %578 = arith.addf %577, %576 : vector<8x128xf32>
    %579 = arith.divf %577, %578 : vector<8x128xf32>
    %580 = vector.extract_strided_slice %573 {offsets = [0, 128], sizes = [8, 128], strides = [1, 1]} : vector<8x512xf32> to vector<8x128xf32>
    %581 = arith.negf %580 : vector<8x128xf32>
    %582 = math.exp %581 : vector<8x128xf32>
    %cst_240 = arith.constant 1.000000e+00 : f32
    %583 = vector.broadcast %cst_240 : f32 to vector<8x128xf32>
    %584 = arith.addf %583, %582 : vector<8x128xf32>
    %585 = arith.divf %583, %584 : vector<8x128xf32>
    %586 = vector.extract_strided_slice %573 {offsets = [0, 256], sizes = [8, 128], strides = [1, 1]} : vector<8x512xf32> to vector<8x128xf32>
    %587 = math.tanh %586 : vector<8x128xf32>
    %588 = vector.extract_strided_slice %573 {offsets = [0, 384], sizes = [8, 128], strides = [1, 1]} : vector<8x512xf32> to vector<8x128xf32>
    %589 = arith.negf %588 : vector<8x128xf32>
    %590 = math.exp %589 : vector<8x128xf32>
    %cst_241 = arith.constant 1.000000e+00 : f32
    %591 = vector.broadcast %cst_241 : f32 to vector<8x128xf32>
    %592 = arith.addf %591, %590 : vector<8x128xf32>
    %593 = arith.divf %591, %592 : vector<8x128xf32>
    %594 = arith.mulf %585, %565 : vector<8x128xf32>
    %595 = arith.mulf %579, %587 : vector<8x128xf32>
    %596 = arith.addf %594, %595 : vector<8x128xf32>
    %597 = math.tanh %596 : vector<8x128xf32>
    %598 = arith.mulf %593, %597 : vector<8x128xf32>
    %599 = vector.broadcast %563 : i32 to vector<8x1xi32>
    %600 = arith.cmpi sgt, %6, %599 : vector<8x1xi32>
    %601 = vector.shape_cast %600 : vector<8x1xi1> to vector<8x1xi1>
    %602 = vector.broadcast %601 : vector<8x1xi1> to vector<8x128xi1>
    %603 = arith.select %602, %598, %564 : vector<8x128xi1>, vector<8x128xf32>
    %c0_242 = arith.constant 0 : index
    %c0_243 = arith.constant 0 : index
    %604 = vector.load %arg10[%c0_242, %c0_243] : memref<8x128xf32, #tpu.memory_space<vmem>>, vector<8x128xf32>
    tpu.vector_store %arg10[%c0_242, %c0_243], %603 {strides = array<i32>} : memref<8x128xf32, #tpu.memory_space<vmem>>, vector<8x128xf32>,
    %605 = arith.select %602, %596, %565 : vector<8x128xi1>, vector<8x128xf32>
    %c0_244 = arith.constant 0 : index
    %c0_245 = arith.constant 0 : index
    %606 = vector.load %arg11[%c0_244, %c0_245] : memref<8x128xf32, #tpu.memory_space<vmem>>, vector<8x128xf32>
    tpu.vector_store %arg11[%c0_244, %c0_245], %605 {strides = array<i32>} : memref<8x128xf32, #tpu.memory_space<vmem>>, vector<8x128xf32>,
    %cst_246 = arith.constant 0.000000e+00 : f32
    %607 = vector.broadcast %cst_246 : f32 to vector<8x128xf32>
    %608 = arith.select %602, %598, %607 : vector<8x128xi1>, vector<8x128xf32>
    %609 = arith.index_cast %562 : i32 to index
    %c0_247 = arith.constant 0 : index
    %c0_248 = arith.constant 0 : index
    %610 = vector.load %arg7[%609, %c0_247, %c0_248] : memref<8x8x128xf32, #tpu.memory_space<vmem>>, vector<1x8x128xf32>
    %611 = vector.shape_cast %610 : vector<1x8x128xf32> to vector<8x128xf32>
    %612 = vector.shape_cast %608 : vector<8x128xf32> to vector<1x8x128xf32>
    tpu.vector_store %arg7[%609, %c0_247, %c0_248], %612 {strides = array<i32>} : memref<8x8x128xf32, #tpu.memory_space<vmem>>, vector<1x8x128xf32>,
    %c6_i32 = arith.constant 6 : i32
    %613 = arith.addi %3, %c6_i32 : i32
    %c0_249 = arith.constant 0 : index
    %c0_250 = arith.constant 0 : index
    %614 = vector.load %arg8[%c0_249, %c0_250] : memref<8x128xf32, #tpu.memory_space<vmem>>, vector<8x128xf32>
    %c0_251 = arith.constant 0 : index
    %c0_252 = arith.constant 0 : index
    %615 = vector.load %arg9[%c0_251, %c0_252] : memref<8x128xf32, #tpu.memory_space<vmem>>, vector<8x128xf32>
    %c0_253 = arith.constant 0 : index
    %616 = arith.index_cast %c6_i32 : i32 to index
    %c0_254 = arith.constant 0 : index
    %c0_255 = arith.constant 0 : index
    %617 = vector.load %arg2[%c0_253, %616, %c0_254, %c0_255] : memref<1x8x8x512xbf16, #tpu.memory_space<vmem>>, vector<1x1x8x512xbf16>
    %618 = vector.shape_cast %617 : vector<1x1x8x512xbf16> to vector<8x512xbf16>
    %619 = arith.extf %618 : vector<8x512xbf16> to vector<8x512xf32>
    %620 = arith.truncf %614 : vector<8x128xf32> to vector<8x128xbf16>
    %c0_256 = arith.constant 0 : index
    %c0_257 = arith.constant 0 : index
    %621 = vector.load %arg4[%c0_256, %c0_257] : memref<128x512xbf16, #tpu.memory_space<vmem>>, vector<128x512xbf16>
    %cst_258 = arith.constant dense<0.000000e+00> : vector<8x512xf32>
    %622 = tpu.matmul %620, %621, %cst_258 {dimension_numbers = #tpu.dot_dimension_numbers<[1], [0], [0], [1], [0, 0, 1, 1], [], []>} : vector<8x128xbf16>, vector<128x512xbf16>, vector<8x512xf32> -> vector<8x512xf32>
    %623 = arith.addf %619, %622 : vector<8x512xf32>
    %624 = vector.extract_strided_slice %623 {offsets = [0, 0], sizes = [8, 128], strides = [1, 1]} : vector<8x512xf32> to vector<8x128xf32>
    %625 = arith.negf %624 : vector<8x128xf32>
    %626 = math.exp %625 : vector<8x128xf32>
    %cst_259 = arith.constant 1.000000e+00 : f32
    %627 = vector.broadcast %cst_259 : f32 to vector<8x128xf32>
    %628 = arith.addf %627, %626 : vector<8x128xf32>
    %629 = arith.divf %627, %628 : vector<8x128xf32>
    %630 = vector.extract_strided_slice %623 {offsets = [0, 128], sizes = [8, 128], strides = [1, 1]} : vector<8x512xf32> to vector<8x128xf32>
    %631 = arith.negf %630 : vector<8x128xf32>
    %632 = math.exp %631 : vector<8x128xf32>
    %cst_260 = arith.constant 1.000000e+00 : f32
    %633 = vector.broadcast %cst_260 : f32 to vector<8x128xf32>
    %634 = arith.addf %633, %632 : vector<8x128xf32>
    %635 = arith.divf %633, %634 : vector<8x128xf32>
    %636 = vector.extract_strided_slice %623 {offsets = [0, 256], sizes = [8, 128], strides = [1, 1]} : vector<8x512xf32> to vector<8x128xf32>
    %637 = math.tanh %636 : vector<8x128xf32>
    %638 = vector.extract_strided_slice %623 {offsets = [0, 384], sizes = [8, 128], strides = [1, 1]} : vector<8x512xf32> to vector<8x128xf32>
    %639 = arith.negf %638 : vector<8x128xf32>
    %640 = math.exp %639 : vector<8x128xf32>
    %cst_261 = arith.constant 1.000000e+00 : f32
    %641 = vector.broadcast %cst_261 : f32 to vector<8x128xf32>
    %642 = arith.addf %641, %640 : vector<8x128xf32>
    %643 = arith.divf %641, %642 : vector<8x128xf32>
    %644 = arith.mulf %635, %615 : vector<8x128xf32>
    %645 = arith.mulf %629, %637 : vector<8x128xf32>
    %646 = arith.addf %644, %645 : vector<8x128xf32>
    %647 = math.tanh %646 : vector<8x128xf32>
    %648 = arith.mulf %643, %647 : vector<8x128xf32>
    %649 = vector.broadcast %613 : i32 to vector<8x1xi32>
    %650 = arith.cmpi sgt, %6, %649 : vector<8x1xi32>
    %651 = vector.shape_cast %650 : vector<8x1xi1> to vector<8x1xi1>
    %652 = vector.broadcast %651 : vector<8x1xi1> to vector<8x128xi1>
    %653 = arith.select %652, %648, %614 : vector<8x128xi1>, vector<8x128xf32>
    %c0_262 = arith.constant 0 : index
    %c0_263 = arith.constant 0 : index
    %654 = vector.load %arg8[%c0_262, %c0_263] : memref<8x128xf32, #tpu.memory_space<vmem>>, vector<8x128xf32>
    tpu.vector_store %arg8[%c0_262, %c0_263], %653 {strides = array<i32>} : memref<8x128xf32, #tpu.memory_space<vmem>>, vector<8x128xf32>,
    %655 = arith.select %652, %646, %615 : vector<8x128xi1>, vector<8x128xf32>
    %c0_264 = arith.constant 0 : index
    %c0_265 = arith.constant 0 : index
    %656 = vector.load %arg9[%c0_264, %c0_265] : memref<8x128xf32, #tpu.memory_space<vmem>>, vector<8x128xf32>
    tpu.vector_store %arg9[%c0_264, %c0_265], %655 {strides = array<i32>} : memref<8x128xf32, #tpu.memory_space<vmem>>, vector<8x128xf32>,
    %cst_266 = arith.constant 0.000000e+00 : f32
    %657 = vector.broadcast %cst_266 : f32 to vector<8x128xf32>
    %658 = arith.select %652, %648, %657 : vector<8x128xi1>, vector<8x128xf32>
    %659 = arith.index_cast %c6_i32 : i32 to index
    %c0_267 = arith.constant 0 : index
    %c0_268 = arith.constant 0 : index
    %660 = vector.load %arg6[%659, %c0_267, %c0_268] : memref<8x8x128xf32, #tpu.memory_space<vmem>>, vector<1x8x128xf32>
    %661 = vector.shape_cast %660 : vector<1x8x128xf32> to vector<8x128xf32>
    %662 = vector.shape_cast %658 : vector<8x128xf32> to vector<1x8x128xf32>
    tpu.vector_store %arg6[%659, %c0_267, %c0_268], %662 {strides = array<i32>} : memref<8x8x128xf32, #tpu.memory_space<vmem>>, vector<1x8x128xf32>,
    %c7_i32_269 = arith.constant 7 : i32
    %663 = arith.subi %c7_i32_269, %c6_i32 : i32
    %664 = arith.addi %5, %663 : i32
    %c0_270 = arith.constant 0 : index
    %c0_271 = arith.constant 0 : index
    %665 = vector.load %arg10[%c0_270, %c0_271] : memref<8x128xf32, #tpu.memory_space<vmem>>, vector<8x128xf32>
    %c0_272 = arith.constant 0 : index
    %c0_273 = arith.constant 0 : index
    %666 = vector.load %arg11[%c0_272, %c0_273] : memref<8x128xf32, #tpu.memory_space<vmem>>, vector<8x128xf32>
    %c0_274 = arith.constant 0 : index
    %667 = arith.index_cast %663 : i32 to index
    %c0_275 = arith.constant 0 : index
    %c0_276 = arith.constant 0 : index
    %668 = vector.load %arg3[%c0_274, %667, %c0_275, %c0_276] : memref<1x8x8x512xbf16, #tpu.memory_space<vmem>>, vector<1x1x8x512xbf16>
    %669 = vector.shape_cast %668 : vector<1x1x8x512xbf16> to vector<8x512xbf16>
    %670 = arith.extf %669 : vector<8x512xbf16> to vector<8x512xf32>
    %671 = arith.truncf %665 : vector<8x128xf32> to vector<8x128xbf16>
    %c0_277 = arith.constant 0 : index
    %c0_278 = arith.constant 0 : index
    %672 = vector.load %arg5[%c0_277, %c0_278] : memref<128x512xbf16, #tpu.memory_space<vmem>>, vector<128x512xbf16>
    %cst_279 = arith.constant dense<0.000000e+00> : vector<8x512xf32>
    %673 = tpu.matmul %671, %672, %cst_279 {dimension_numbers = #tpu.dot_dimension_numbers<[1], [0], [0], [1], [0, 0, 1, 1], [], []>} : vector<8x128xbf16>, vector<128x512xbf16>, vector<8x512xf32> -> vector<8x512xf32>
    %674 = arith.addf %670, %673 : vector<8x512xf32>
    %675 = vector.extract_strided_slice %674 {offsets = [0, 0], sizes = [8, 128], strides = [1, 1]} : vector<8x512xf32> to vector<8x128xf32>
    %676 = arith.negf %675 : vector<8x128xf32>
    %677 = math.exp %676 : vector<8x128xf32>
    %cst_280 = arith.constant 1.000000e+00 : f32
    %678 = vector.broadcast %cst_280 : f32 to vector<8x128xf32>
    %679 = arith.addf %678, %677 : vector<8x128xf32>
    %680 = arith.divf %678, %679 : vector<8x128xf32>
    %681 = vector.extract_strided_slice %674 {offsets = [0, 128], sizes = [8, 128], strides = [1, 1]} : vector<8x512xf32> to vector<8x128xf32>
    %682 = arith.negf %681 : vector<8x128xf32>
    %683 = math.exp %682 : vector<8x128xf32>
    %cst_281 = arith.constant 1.000000e+00 : f32
    %684 = vector.broadcast %cst_281 : f32 to vector<8x128xf32>
    %685 = arith.addf %684, %683 : vector<8x128xf32>
    %686 = arith.divf %684, %685 : vector<8x128xf32>
    %687 = vector.extract_strided_slice %674 {offsets = [0, 256], sizes = [8, 128], strides = [1, 1]} : vector<8x512xf32> to vector<8x128xf32>
    %688 = math.tanh %687 : vector<8x128xf32>
    %689 = vector.extract_strided_slice %674 {offsets = [0, 384], sizes = [8, 128], strides = [1, 1]} : vector<8x512xf32> to vector<8x128xf32>
    %690 = arith.negf %689 : vector<8x128xf32>
    %691 = math.exp %690 : vector<8x128xf32>
    %cst_282 = arith.constant 1.000000e+00 : f32
    %692 = vector.broadcast %cst_282 : f32 to vector<8x128xf32>
    %693 = arith.addf %692, %691 : vector<8x128xf32>
    %694 = arith.divf %692, %693 : vector<8x128xf32>
    %695 = arith.mulf %686, %666 : vector<8x128xf32>
    %696 = arith.mulf %680, %688 : vector<8x128xf32>
    %697 = arith.addf %695, %696 : vector<8x128xf32>
    %698 = math.tanh %697 : vector<8x128xf32>
    %699 = arith.mulf %694, %698 : vector<8x128xf32>
    %700 = vector.broadcast %664 : i32 to vector<8x1xi32>
    %701 = arith.cmpi sgt, %6, %700 : vector<8x1xi32>
    %702 = vector.shape_cast %701 : vector<8x1xi1> to vector<8x1xi1>
    %703 = vector.broadcast %702 : vector<8x1xi1> to vector<8x128xi1>
    %704 = arith.select %703, %699, %665 : vector<8x128xi1>, vector<8x128xf32>
    %c0_283 = arith.constant 0 : index
    %c0_284 = arith.constant 0 : index
    %705 = vector.load %arg10[%c0_283, %c0_284] : memref<8x128xf32, #tpu.memory_space<vmem>>, vector<8x128xf32>
    tpu.vector_store %arg10[%c0_283, %c0_284], %704 {strides = array<i32>} : memref<8x128xf32, #tpu.memory_space<vmem>>, vector<8x128xf32>,
    %706 = arith.select %703, %697, %666 : vector<8x128xi1>, vector<8x128xf32>
    %c0_285 = arith.constant 0 : index
    %c0_286 = arith.constant 0 : index
    %707 = vector.load %arg11[%c0_285, %c0_286] : memref<8x128xf32, #tpu.memory_space<vmem>>, vector<8x128xf32>
    tpu.vector_store %arg11[%c0_285, %c0_286], %706 {strides = array<i32>} : memref<8x128xf32, #tpu.memory_space<vmem>>, vector<8x128xf32>,
    %cst_287 = arith.constant 0.000000e+00 : f32
    %708 = vector.broadcast %cst_287 : f32 to vector<8x128xf32>
    %709 = arith.select %703, %699, %708 : vector<8x128xi1>, vector<8x128xf32>
    %710 = arith.index_cast %663 : i32 to index
    %c0_288 = arith.constant 0 : index
    %c0_289 = arith.constant 0 : index
    %711 = vector.load %arg7[%710, %c0_288, %c0_289] : memref<8x8x128xf32, #tpu.memory_space<vmem>>, vector<1x8x128xf32>
    %712 = vector.shape_cast %711 : vector<1x8x128xf32> to vector<8x128xf32>
    %713 = vector.shape_cast %709 : vector<8x128xf32> to vector<1x8x128xf32>
    tpu.vector_store %arg7[%710, %c0_288, %c0_289], %713 {strides = array<i32>} : memref<8x8x128xf32, #tpu.memory_space<vmem>>, vector<1x8x128xf32>,
    %c7_i32_290 = arith.constant 7 : i32
    %714 = arith.addi %3, %c7_i32_290 : i32
    %c0_291 = arith.constant 0 : index
    %c0_292 = arith.constant 0 : index
    %715 = vector.load %arg8[%c0_291, %c0_292] : memref<8x128xf32, #tpu.memory_space<vmem>>, vector<8x128xf32>
    %c0_293 = arith.constant 0 : index
    %c0_294 = arith.constant 0 : index
    %716 = vector.load %arg9[%c0_293, %c0_294] : memref<8x128xf32, #tpu.memory_space<vmem>>, vector<8x128xf32>
    %c0_295 = arith.constant 0 : index
    %717 = arith.index_cast %c7_i32_290 : i32 to index
    %c0_296 = arith.constant 0 : index
    %c0_297 = arith.constant 0 : index
    %718 = vector.load %arg2[%c0_295, %717, %c0_296, %c0_297] : memref<1x8x8x512xbf16, #tpu.memory_space<vmem>>, vector<1x1x8x512xbf16>
    %719 = vector.shape_cast %718 : vector<1x1x8x512xbf16> to vector<8x512xbf16>
    %720 = arith.extf %719 : vector<8x512xbf16> to vector<8x512xf32>
    %721 = arith.truncf %715 : vector<8x128xf32> to vector<8x128xbf16>
    %c0_298 = arith.constant 0 : index
    %c0_299 = arith.constant 0 : index
    %722 = vector.load %arg4[%c0_298, %c0_299] : memref<128x512xbf16, #tpu.memory_space<vmem>>, vector<128x512xbf16>
    %cst_300 = arith.constant dense<0.000000e+00> : vector<8x512xf32>
    %723 = tpu.matmul %721, %722, %cst_300 {dimension_numbers = #tpu.dot_dimension_numbers<[1], [0], [0], [1], [0, 0, 1, 1], [], []>} : vector<8x128xbf16>, vector<128x512xbf16>, vector<8x512xf32> -> vector<8x512xf32>
    %724 = arith.addf %720, %723 : vector<8x512xf32>
    %725 = vector.extract_strided_slice %724 {offsets = [0, 0], sizes = [8, 128], strides = [1, 1]} : vector<8x512xf32> to vector<8x128xf32>
    %726 = arith.negf %725 : vector<8x128xf32>
    %727 = math.exp %726 : vector<8x128xf32>
    %cst_301 = arith.constant 1.000000e+00 : f32
    %728 = vector.broadcast %cst_301 : f32 to vector<8x128xf32>
    %729 = arith.addf %728, %727 : vector<8x128xf32>
    %730 = arith.divf %728, %729 : vector<8x128xf32>
    %731 = vector.extract_strided_slice %724 {offsets = [0, 128], sizes = [8, 128], strides = [1, 1]} : vector<8x512xf32> to vector<8x128xf32>
    %732 = arith.negf %731 : vector<8x128xf32>
    %733 = math.exp %732 : vector<8x128xf32>
    %cst_302 = arith.constant 1.000000e+00 : f32
    %734 = vector.broadcast %cst_302 : f32 to vector<8x128xf32>
    %735 = arith.addf %734, %733 : vector<8x128xf32>
    %736 = arith.divf %734, %735 : vector<8x128xf32>
    %737 = vector.extract_strided_slice %724 {offsets = [0, 256], sizes = [8, 128], strides = [1, 1]} : vector<8x512xf32> to vector<8x128xf32>
    %738 = math.tanh %737 : vector<8x128xf32>
    %739 = vector.extract_strided_slice %724 {offsets = [0, 384], sizes = [8, 128], strides = [1, 1]} : vector<8x512xf32> to vector<8x128xf32>
    %740 = arith.negf %739 : vector<8x128xf32>
    %741 = math.exp %740 : vector<8x128xf32>
    %cst_303 = arith.constant 1.000000e+00 : f32
    %742 = vector.broadcast %cst_303 : f32 to vector<8x128xf32>
    %743 = arith.addf %742, %741 : vector<8x128xf32>
    %744 = arith.divf %742, %743 : vector<8x128xf32>
    %745 = arith.mulf %736, %716 : vector<8x128xf32>
    %746 = arith.mulf %730, %738 : vector<8x128xf32>
    %747 = arith.addf %745, %746 : vector<8x128xf32>
    %748 = math.tanh %747 : vector<8x128xf32>
    %749 = arith.mulf %744, %748 : vector<8x128xf32>
    %750 = vector.broadcast %714 : i32 to vector<8x1xi32>
    %751 = arith.cmpi sgt, %6, %750 : vector<8x1xi32>
    %752 = vector.shape_cast %751 : vector<8x1xi1> to vector<8x1xi1>
    %753 = vector.broadcast %752 : vector<8x1xi1> to vector<8x128xi1>
    %754 = arith.select %753, %749, %715 : vector<8x128xi1>, vector<8x128xf32>
    %c0_304 = arith.constant 0 : index
    %c0_305 = arith.constant 0 : index
    %755 = vector.load %arg8[%c0_304, %c0_305] : memref<8x128xf32, #tpu.memory_space<vmem>>, vector<8x128xf32>
    tpu.vector_store %arg8[%c0_304, %c0_305], %754 {strides = array<i32>} : memref<8x128xf32, #tpu.memory_space<vmem>>, vector<8x128xf32>,
    %756 = arith.select %753, %747, %716 : vector<8x128xi1>, vector<8x128xf32>
    %c0_306 = arith.constant 0 : index
    %c0_307 = arith.constant 0 : index
    %757 = vector.load %arg9[%c0_306, %c0_307] : memref<8x128xf32, #tpu.memory_space<vmem>>, vector<8x128xf32>
    tpu.vector_store %arg9[%c0_306, %c0_307], %756 {strides = array<i32>} : memref<8x128xf32, #tpu.memory_space<vmem>>, vector<8x128xf32>,
    %cst_308 = arith.constant 0.000000e+00 : f32
    %758 = vector.broadcast %cst_308 : f32 to vector<8x128xf32>
    %759 = arith.select %753, %749, %758 : vector<8x128xi1>, vector<8x128xf32>
    %760 = arith.index_cast %c7_i32_290 : i32 to index
    %c0_309 = arith.constant 0 : index
    %c0_310 = arith.constant 0 : index
    %761 = vector.load %arg6[%760, %c0_309, %c0_310] : memref<8x8x128xf32, #tpu.memory_space<vmem>>, vector<1x8x128xf32>
    %762 = vector.shape_cast %761 : vector<1x8x128xf32> to vector<8x128xf32>
    %763 = vector.shape_cast %759 : vector<8x128xf32> to vector<1x8x128xf32>
    tpu.vector_store %arg6[%760, %c0_309, %c0_310], %763 {strides = array<i32>} : memref<8x8x128xf32, #tpu.memory_space<vmem>>, vector<1x8x128xf32>,
    %c7_i32_311 = arith.constant 7 : i32
    %764 = arith.subi %c7_i32_311, %c7_i32_290 : i32
    %765 = arith.addi %5, %764 : i32
    %c0_312 = arith.constant 0 : index
    %c0_313 = arith.constant 0 : index
    %766 = vector.load %arg10[%c0_312, %c0_313] : memref<8x128xf32, #tpu.memory_space<vmem>>, vector<8x128xf32>
    %c0_314 = arith.constant 0 : index
    %c0_315 = arith.constant 0 : index
    %767 = vector.load %arg11[%c0_314, %c0_315] : memref<8x128xf32, #tpu.memory_space<vmem>>, vector<8x128xf32>
    %c0_316 = arith.constant 0 : index
    %768 = arith.index_cast %764 : i32 to index
    %c0_317 = arith.constant 0 : index
    %c0_318 = arith.constant 0 : index
    %769 = vector.load %arg3[%c0_316, %768, %c0_317, %c0_318] : memref<1x8x8x512xbf16, #tpu.memory_space<vmem>>, vector<1x1x8x512xbf16>
    %770 = vector.shape_cast %769 : vector<1x1x8x512xbf16> to vector<8x512xbf16>
    %771 = arith.extf %770 : vector<8x512xbf16> to vector<8x512xf32>
    %772 = arith.truncf %766 : vector<8x128xf32> to vector<8x128xbf16>
    %c0_319 = arith.constant 0 : index
    %c0_320 = arith.constant 0 : index
    %773 = vector.load %arg5[%c0_319, %c0_320] : memref<128x512xbf16, #tpu.memory_space<vmem>>, vector<128x512xbf16>
    %cst_321 = arith.constant dense<0.000000e+00> : vector<8x512xf32>
    %774 = tpu.matmul %772, %773, %cst_321 {dimension_numbers = #tpu.dot_dimension_numbers<[1], [0], [0], [1], [0, 0, 1, 1], [], []>} : vector<8x128xbf16>, vector<128x512xbf16>, vector<8x512xf32> -> vector<8x512xf32>
    %775 = arith.addf %771, %774 : vector<8x512xf32>
    %776 = vector.extract_strided_slice %775 {offsets = [0, 0], sizes = [8, 128], strides = [1, 1]} : vector<8x512xf32> to vector<8x128xf32>
    %777 = arith.negf %776 : vector<8x128xf32>
    %778 = math.exp %777 : vector<8x128xf32>
    %cst_322 = arith.constant 1.000000e+00 : f32
    %779 = vector.broadcast %cst_322 : f32 to vector<8x128xf32>
    %780 = arith.addf %779, %778 : vector<8x128xf32>
    %781 = arith.divf %779, %780 : vector<8x128xf32>
    %782 = vector.extract_strided_slice %775 {offsets = [0, 128], sizes = [8, 128], strides = [1, 1]} : vector<8x512xf32> to vector<8x128xf32>
    %783 = arith.negf %782 : vector<8x128xf32>
    %784 = math.exp %783 : vector<8x128xf32>
    %cst_323 = arith.constant 1.000000e+00 : f32
    %785 = vector.broadcast %cst_323 : f32 to vector<8x128xf32>
    %786 = arith.addf %785, %784 : vector<8x128xf32>
    %787 = arith.divf %785, %786 : vector<8x128xf32>
    %788 = vector.extract_strided_slice %775 {offsets = [0, 256], sizes = [8, 128], strides = [1, 1]} : vector<8x512xf32> to vector<8x128xf32>
    %789 = math.tanh %788 : vector<8x128xf32>
    %790 = vector.extract_strided_slice %775 {offsets = [0, 384], sizes = [8, 128], strides = [1, 1]} : vector<8x512xf32> to vector<8x128xf32>
    %791 = arith.negf %790 : vector<8x128xf32>
    %792 = math.exp %791 : vector<8x128xf32>
    %cst_324 = arith.constant 1.000000e+00 : f32
    %793 = vector.broadcast %cst_324 : f32 to vector<8x128xf32>
    %794 = arith.addf %793, %792 : vector<8x128xf32>
    %795 = arith.divf %793, %794 : vector<8x128xf32>
    %796 = arith.mulf %787, %767 : vector<8x128xf32>
    %797 = arith.mulf %781, %789 : vector<8x128xf32>
    %798 = arith.addf %796, %797 : vector<8x128xf32>
    %799 = math.tanh %798 : vector<8x128xf32>
    %800 = arith.mulf %795, %799 : vector<8x128xf32>
    %801 = vector.broadcast %765 : i32 to vector<8x1xi32>
    %802 = arith.cmpi sgt, %6, %801 : vector<8x1xi32>
    %803 = vector.shape_cast %802 : vector<8x1xi1> to vector<8x1xi1>
    %804 = vector.broadcast %803 : vector<8x1xi1> to vector<8x128xi1>
    %805 = arith.select %804, %800, %766 : vector<8x128xi1>, vector<8x128xf32>
    %c0_325 = arith.constant 0 : index
    %c0_326 = arith.constant 0 : index
    %806 = vector.load %arg10[%c0_325, %c0_326] : memref<8x128xf32, #tpu.memory_space<vmem>>, vector<8x128xf32>
    tpu.vector_store %arg10[%c0_325, %c0_326], %805 {strides = array<i32>} : memref<8x128xf32, #tpu.memory_space<vmem>>, vector<8x128xf32>,
    %807 = arith.select %804, %798, %767 : vector<8x128xi1>, vector<8x128xf32>
    %c0_327 = arith.constant 0 : index
    %c0_328 = arith.constant 0 : index
    %808 = vector.load %arg11[%c0_327, %c0_328] : memref<8x128xf32, #tpu.memory_space<vmem>>, vector<8x128xf32>
    tpu.vector_store %arg11[%c0_327, %c0_328], %807 {strides = array<i32>} : memref<8x128xf32, #tpu.memory_space<vmem>>, vector<8x128xf32>,
    %cst_329 = arith.constant 0.000000e+00 : f32
    %809 = vector.broadcast %cst_329 : f32 to vector<8x128xf32>
    %810 = arith.select %804, %800, %809 : vector<8x128xi1>, vector<8x128xf32>
    %811 = arith.index_cast %764 : i32 to index
    %c0_330 = arith.constant 0 : index
    %c0_331 = arith.constant 0 : index
    %812 = vector.load %arg7[%811, %c0_330, %c0_331] : memref<8x8x128xf32, #tpu.memory_space<vmem>>, vector<1x8x128xf32>
    %813 = vector.shape_cast %812 : vector<1x8x128xf32> to vector<8x128xf32>
    %814 = vector.shape_cast %810 : vector<8x128xf32> to vector<1x8x128xf32>
    tpu.vector_store %arg7[%811, %c0_330, %c0_331], %814 {strides = array<i32>} : memref<8x8x128xf32, #tpu.memory_space<vmem>>, vector<1x8x128xf32>,
    %c8_i32_332 = arith.constant 8 : i32
    return
  }
  func.func @transform_0(%arg0: i32) -> (i32, i32) {
    %c0_i32 = arith.constant 0 : i32
    %c0_i32_0 = arith.constant 0 : i32
    %c0_i32_1 = arith.constant 0 : i32
    return %c0_i32, %c0_i32_0 : i32, i32
  }
  func.func @transform_1(%arg0: i32) -> (i32, i32, i32, i32) {
    %c0_i32 = arith.constant 0 : i32
    %c0_i32_0 = arith.constant 0 : i32
    %c0_i32_1 = arith.constant 0 : i32
    %c0_i32_2 = arith.constant 0 : i32
    return %c0_i32, %arg0, %c0_i32_0, %c0_i32_1 : i32, i32, i32, i32
  }
  func.func @transform_2(%arg0: i32) -> (i32, i32, i32, i32) {
    %c0_i32 = arith.constant 0 : i32
    %0 = arith.subi %c0_i32, %arg0 : i32
    %c1_i32 = arith.constant 1 : i32
    %c0_i32_0 = arith.constant 0 : i32
    %c0_i32_1 = arith.constant 0 : i32
    %c0_i32_2 = arith.constant 0 : i32
    return %c1_i32, %0, %c0_i32_0, %c0_i32_1 : i32, i32, i32, i32
  }
  func.func @transform_3(%arg0: i32) -> (i32, i32) {
    %c0_i32 = arith.constant 0 : i32
    %c0_i32_0 = arith.constant 0 : i32
    %c0_i32_1 = arith.constant 0 : i32
    return %c0_i32, %c0_i32_0 : i32, i32
  }
  func.func @transform_4(%arg0: i32) -> (i32, i32) {
    %c0_i32 = arith.constant 0 : i32
    %c0_i32_0 = arith.constant 0 : i32
    %c0_i32_1 = arith.constant 0 : i32
    return %c0_i32, %c0_i32_0 : i32, i32
  }
  func.func @transform_5(%arg0: i32) -> (i32, i32, i32) {
    %c0_i32 = arith.constant 0 : i32
    %c0_i32_0 = arith.constant 0 : i32
    %c0_i32_1 = arith.constant 0 : i32
    return %arg0, %c0_i32, %c0_i32_0 : i32, i32, i32
  }
  func.func @transform_6(%arg0: i32) -> (i32, i32, i32) {
    %c0_i32 = arith.constant 0 : i32
    %0 = arith.subi %c0_i32, %arg0 : i32
    %c0_i32_0 = arith.constant 0 : i32
    %c0_i32_1 = arith.constant 0 : i32
    %c0_i32_2 = arith.constant 0 : i32
    return %0, %c0_i32_0, %c0_i32_1 : i32, i32, i32
  }
}

</mosaic_0001>

<bundles_post_ra>
// kernel: bilstm_forward.1
= control target key start
LH: loop header
LB: loop body
LE: loop exit
PB: predicated region body
PF: predicated region fallthrough
CT: control target
= control target key end

     0   :  { %v8836_v1 = vmov 0   ;;  %v8831_v37 = vmov 0.0|0.0   ;;  %s8824_s3 = inlined_call_operand.vmem [shape: bf16[128,512], index: 3, kind: input, shape index: {}]   ;;  %s8825_s4 = inlined_call_operand.vmem [shape: bf16[128,512], index: 4, kind: input, shape index: {}]   ;;  %s8826_s0 = inlined_call_operand.vmem [shape: s32[8,1], index: 0, kind: input, shape index: {}]   ;;  %s8827_s1 = inlined_call_operand.vmem [shape: bf16[2,8,8,512], index: 1, kind: input, shape index: {}, may-alias: {1,2}]   ;;  %s8828_s2 = inlined_call_operand.vmem [shape: bf16[2,8,8,512], index: 2, kind: input, shape index: {}, may-alias: {1,2}]   ;;  %s8829_s5 = inlined_call_operand.vmem [shape: f32[8,8,128], index: 5, kind: output, shape index: {0}]   ;;  %s8830_s6 = inlined_call_operand.vmem [shape: f32[8,8,128], index: 6, kind: output, shape index: {1}]  }
   0x1   :  { %v6652_v0 = vld [vmem:[%s8824_s3 + $0xe4] ss:$16 sps:$4 sm:$0xff]   ;;  %310 = vmatprep.mubr.bf16.mxu0 %v8836_v1  ;;  %351 = vmatprep.mubr.bf16.mxu1 %v8836_v1  ;;  %v6659_v2 = vld [vmem:[%s8824_s3 + $0xe0] ss:$16 sps:$4 sm:$0xff]   ;;  %v6684_v6 = vld [vmem:[%s8824_s3 + $0xec] ss:$16 sps:$4 sm:$0xff]  }
   0x2   :  { %5970 = vset.pattern.permute.xlu0 %v8836_v1  ;;  %5971 = vset.pattern.permute.xlu1 %v8836_v1  ;;  %v6667_v3 = vld [vmem:[%s8824_s3 + $0xc4] ss:$16 sps:$4 sm:$0xff]   ;;  %v6673_v4 = vld [vmem:[%s8824_s3 + $0xc0] ss:$16 sps:$4 sm:$0xff]   ;;  %v6689_v7 = vld [vmem:[%s8824_s3 + $0xe8] ss:$16 sps:$4 sm:$0xff]  }
   0x3   :  { %278 = vmatprep.subr.bf16.mxu0 %v6652_v0  ;;  %v6679_v5 = vld [vmem:[%s8824_s3 + $0xa4] ss:$16 sps:$4 sm:$0xff]   ;;  %v6695_v8 = vld [vmem:[%s8824_s3 + $0xa0] ss:$16 sps:$4 sm:$0xff]   ;;  %319 = vmatprep.subr.bf16.mxu1 %v6684_v6  ;;  %v6708_v10 = vld [vmem:[%s8824_s3 + $0xcc] ss:$16 sps:$4 sm:$0xff]  }
   0x4   :  { %279 = vmatpush1.bf16.msra.mxu0 %v6659_v2  ;;  %v6702_v9 = vld [vmem:[%s8824_s3 + $0x84] ss:$16 sps:$4 sm:$0xff]   ;;  %320 = vmatpush1.bf16.msra.mxu1 %v6689_v7  ;;  %v6713_v11 = vld [vmem:[%s8824_s3 + $0xc8] ss:$16 sps:$4 sm:$0xff]   ;;  %v6720_v12 = vld [vmem:[%s8824_s3 + $0x80] ss:$16 sps:$4 sm:$0xff]  }
   0x5   :  { %280 = vmatprep.subr.bf16.mxu0 %v6667_v3  ;;  %321 = vmatprep.subr.bf16.mxu1 %v6708_v10  ;;  %v6725_v13 = vld [vmem:[%s8824_s3 + $0x64] ss:$16 sps:$4 sm:$0xff]   ;;  %v6730_v14 = vld [vmem:[%s8824_s3 + $0xac] ss:$16 sps:$4 sm:$0xff]   ;;  %v6737_v15 = vld [vmem:[%s8824_s3 + $0xa8] ss:$16 sps:$4 sm:$0xff]  }
   0x6   :  { %v6743_v16 = vld [vmem:[%s8824_s3 + $0x8c] ss:$16 sps:$4 sm:$0xff]   ;;  %v6749_v17 = vld [vmem:[%s8824_s3 + $0x60] ss:$16 sps:$4 sm:$0xff]   ;;  %v6755_v18 = vld [vmem:[%s8824_s3 + $0x44] ss:$16 sps:$4 sm:$0xff]  }
   0x7   :  { %v6761_v19 = vld [vmem:[%s8824_s3 + $0x88] ss:$16 sps:$4 sm:$0xff]   ;;  %v6767_v20 = vld [vmem:[%s8824_s3 + $0x6c] ss:$16 sps:$4 sm:$0xff]   ;;  %v6773_v21 = vld [vmem:[%s8824_s3 + $0x40] ss:$16 sps:$4 sm:$0xff]  }
   0x8   :  { %281 = vmatpush1.bf16.msra.mxu0 %v6673_v4  ;;  %322 = vmatpush1.bf16.msra.mxu1 %v6713_v11  ;;  %v6778_v22 = vld [vmem:[%s8824_s3 + $0x24] ss:$16 sps:$4 sm:$0xff]   ;;  %v6785_v23 = vld [vmem:[%s8824_s3 + $0x68] ss:$16 sps:$4 sm:$0xff]   ;;  %v6791_v24 = vld [vmem:[%s8824_s3 + $0x4c] ss:$16 sps:$4 sm:$0xff]  }
   0x9   :  { %282 = vmatprep.subr.bf16.mxu0 %v6679_v5  ;;  %323 = vmatprep.subr.bf16.mxu1 %v6730_v14  ;;  %v6797_v25 = vld [vmem:[%s8824_s3 + $0x20] ss:$16 sps:$4 sm:$0xff]   ;;  %v6803_v26 = vld [vmem:[%s8824_s3 + $0x4] ss:$16 sps:$4 sm:$0xff]   ;;  %v6809_v27 = vld [vmem:[%s8824_s3 + $0x48] ss:$16 sps:$4 sm:$0xff]  }
   0xa   :  { %v6815_v28 = vld [vmem:[%s8824_s3 + $0x2c] ss:$16 sps:$4 sm:$0xff]   ;;  %v6821_v29 = vld [vmem:[%s8824_s3] ss:$16 sps:$4 sm:$0xff]   ;;  %v6826_v30 = vld [vmem:[%s8825_s4 + $0xe4] ss:$16 sps:$4 sm:$0xff]  }
   0xb   :  { %v6833_v31 = vld [vmem:[%s8824_s3 + $0x28] ss:$16 sps:$4 sm:$0xff]   ;;  %v6839_v32 = vld [vmem:[%s8824_s3 + $0xc] ss:$16 sps:$4 sm:$0xff]   ;;  %v6845_v33 = vld [vmem:[%s8825_s4 + $0xe0] ss:$16 sps:$4 sm:$0xff]  }
   0xc   :  { %283 = vmatpush1.bf16.msra.mxu0 %v6695_v8  ;;  %324 = vmatpush1.bf16.msra.mxu1 %v6737_v15  ;;  %v6850_v34 = vld [vmem:[%s8825_s4 + $0xc4] ss:$16 sps:$4 sm:$0xff]   ;;  %v6857_v35 = vld [vmem:[%s8824_s3 + $0x8] ss:$16 sps:$4 sm:$0xff]   ;;  %v6863_v36 = vld [vmem:[%s8825_s4 + $0xec] ss:$16 sps:$4 sm:$0xff]  }
   0xd   :  { %284 = vmatprep.subr.bf16.mxu0 %v6702_v9  ;;  %325 = vmatprep.subr.bf16.mxu1 %v6743_v16  ;;  %v6870_v38 = vld [vmem:[%s8825_s4 + $0xc0] ss:$16 sps:$4 sm:$0xff]   ;;  %v6875_v39 = vld [vmem:[%s8825_s4 + $0xa4] ss:$16 sps:$4 sm:$0xff]   ;;  %v6883_v40 = vld [vmem:[%s8825_s4 + $0xe8] ss:$16 sps:$4 sm:$0xff]  }
   0xe   :  { %v6889_v41 = vld [vmem:[%s8825_s4 + $0xcc] ss:$16 sps:$4 sm:$0xff]   ;;  %v6895_v42 = vld [vmem:[%s8825_s4 + $0xa0] ss:$16 sps:$4 sm:$0xff]   ;;  %v6900_v43 = vld [vmem:[%s8825_s4 + $0x84] ss:$16 sps:$4 sm:$0xff]  }
   0xf   :  { %v6908_v44 = vld [vmem:[%s8825_s4 + $0xc8] ss:$16 sps:$4 sm:$0xff]   ;;  %v6914_v45 = vld [vmem:[%s8825_s4 + $0xac] ss:$16 sps:$4 sm:$0xff]   ;;  %v6920_v46 = vld [vmem:[%s8825_s4 + $0x80] ss:$16 sps:$4 sm:$0xff]  }
  0x10   :  { %285 = vmatpush1.bf16.msra.mxu0 %v6720_v12  ;;  %326 = vmatpush1.bf16.msra.mxu1 %v6761_v19  ;;  %v6925_v47 = vld [vmem:[%s8825_s4 + $0x64] ss:$16 sps:$4 sm:$0xff]   ;;  %v6936_v49 = vld [vmem:[%s8825_s4 + $0xa8] ss:$16 sps:$4 sm:$0xff]   ;;  %v6945_v50 = vld [vmem:[%s8825_s4 + $0x8c] ss:$16 sps:$4 sm:$0xff]  }
  0x11   :  { %286 = vmatprep.subr.bf16.mxu0 %v6725_v13  ;;  %327 = vmatprep.subr.bf16.mxu1 %v6767_v20  ;;  %8881 = vst [vmem:[#allocation6_spill] sm:$0xff] %v6925_v47  ;;  %v6930_v48 = vld [vmem:[%s8826_s0] sm:$0xff]  ;;  %v6965_v54 = vld [vmem:[%s8825_s4 + $0x88] ss:$16 sps:$4 sm:$0xff]   ;;  %v6972_v56 = vld [vmem:[%s8825_s4 + $0x6c] ss:$16 sps:$4 sm:$0xff]  }
  0x12   :  { %vm389_vm0 = vcmp.gt.s32.totalorder %v6930_v48, 0  ;;  %vm715_vm1 = vcmp.gt.s32.totalorder %v6930_v48, 7  ;;  %v6953_v52 = vld [vmem:[%s8825_s4 + $0x60] ss:$16 sps:$4 sm:$0xff]   ;;  %v6960_v53 = vld [vmem:[%s8825_s4 + $0x44] ss:$16 sps:$4 sm:$0xff]  }
  0x13   :  { %v6948_v51 = vsel %vm389_vm0, 1, %v8836_v1  ;;  %8882 = vst [vmem:[#allocation7_spill] sm:$0xff] %v6953_v52  ;;  %8883 = vst [vmem:[#allocation8_spill] sm:$0xff] %v6960_v53  ;;  %v716_v55 = vsel %vm715_vm1, 1, %v8836_v1  ;;  %vm1696_vm2 = vcmp.gt.s32.totalorder %v6930_v48, 2  ;;  %vm2350_vm3 = vcmp.gt.s32.totalorder %v6930_v48, 3 }
  0x14   :  { %287 = vmatpush1.bf16.msra.mxu0 %v6749_v17  ;;  %328 = vmatpush1.bf16.msra.mxu1 %v6785_v23  ;;  %8884 = vst [vmem:[#allocation9_spill] sm:$0xff] %v6972_v56  ;;  %v6980_v57 = vld [vmem:[%s8825_s4 + $0x40] ss:$16 sps:$4 sm:$0xff]   ;;  %v6986_v58 = vld [vmem:[%s8825_s4 + $0x24] ss:$16 sps:$4 sm:$0xff]   ;;  %v6994_v60 = vsel %vm1696_vm2, 1, %v8836_v1 }
  0x15   :  { %288 = vmatprep.subr.bf16.mxu0 %v6755_v18  ;;  %329 = vmatprep.subr.bf16.mxu1 %v6791_v24  ;;  %8885 = vst [vmem:[#allocation10_spill] sm:$0xff] %v6980_v57  ;;  %8886 = vst [vmem:[#allocation11_spill] sm:$0xff] %v6986_v58  ;;  %v6991_v59 = vld [vmem:[%s8825_s4 + $0x68] ss:$16 sps:$4 sm:$0xff]   ;;  %v7000_v61 = vld [vmem:[%s8825_s4 + $0x4c] ss:$16 sps:$4 sm:$0xff]  }
  0x16   :  { %392 = vperm.xlu0 %5970, %v6948_v51   ;;  %8887 = vst [vmem:[#allocation12_spill] sm:$0xff] %v7000_v61  ;;  %v7008_v62 = vld [vmem:[%s8825_s4 + $0x20] ss:$16 sps:$4 sm:$0xff]   ;;  %v7015_v63 = vld [vmem:[%s8825_s4 + $0x4] ss:$16 sps:$4 sm:$0xff]   ;;  %vm2677_vm4 = vcmp.gt.s32.totalorder %v6930_v48, 4 }
  0x17   :  { %8888 = vst [vmem:[#allocation13_spill] sm:$0xff] %v7008_v62  ;;  %8889 = vst [vmem:[#allocation14_spill] sm:$0xff] %v7015_v63  ;;  %vm2023_vm5 = vcmp.gt.s32.totalorder %v6930_v48, 5  ;;  %vm1369_vm6 = vcmp.gt.s32.totalorder %v6930_v48, 6  ;;  %vm1042_vm7 = vcmp.gt.s32.totalorder %v6930_v48, 1 }
  0x18   :  { %289 = vmatpush1.bf16.msra.mxu0 %v6773_v21  ;;  %330 = vmatpush1.bf16.msra.mxu1 %v6809_v27 }
  0x19   :  { %290 = vmatprep.subr.bf16.mxu0 %v6778_v22  ;;  %331 = vmatprep.subr.bf16.mxu1 %v6815_v28 }
  0x1a   :  { %718 = vperm.xlu0 %5970, %v716_v55  }
  0x1c   :  { %291 = vmatpush1.bf16.msra.mxu0 %v6797_v25  ;;  %332 = vmatpush1.bf16.msra.mxu1 %v6833_v31 }
  0x1d   :  { %292 = vmatprep.subr.bf16.mxu0 %v6803_v26  ;;  %333 = vmatprep.subr.bf16.mxu1 %v6839_v32 }
  0x1e   :  { %1699 = vperm.xlu0 %5970, %v6994_v60  }
  0x20   :  { %293 = vmatpush1.bf16.msra.mxu0 %v6821_v29  ;;  %334 = vmatpush1.bf16.msra.mxu1 %v6857_v35 }
  0x21   :  { %604 = vmatprep.subr.bf16.mxu0 %v6826_v30  ;;  %645 = vmatprep.subr.bf16.mxu1 %v6863_v36 }
  0x23   :  { %311 = vmatmul.mubr.bf16.vlgmr.msra.gmra.mxu0 %v8831_v37  ;;  %352 = vmatmul.mubr.bf16.vlgmr.msra.gmra.mxu1 %v8831_v37  ;;  %v7020_v37 = vld [vmem:[%s8825_s4 + $0x48] ss:$16 sps:$4 sm:$0xff]  }
  0x24   :  { %605 = vmatpush1.bf16.msra.mxu0 %v6845_v33  ;;  %636 = vmatprep.mubr.bf16.mxu0 %v8836_v1 }
  0x25   :  { %606 = vmatprep.subr.bf16.mxu0 %v6850_v34  ;;  %646 = vmatpush1.bf16.msra.mxu1 %v6883_v40 }
  0x26   :  { %647 = vmatprep.subr.bf16.mxu1 %v6889_v41  ;;  %677 = vmatprep.mubr.bf16.mxu1 %v8836_v1 }
  0x28   :  { %607 = vmatpush1.bf16.msra.mxu0 %v6870_v38 }
  0x29   :  { %608 = vmatprep.subr.bf16.mxu0 %v6875_v39  ;;  %648 = vmatpush1.bf16.msra.mxu1 %v6908_v44 }
  0x2a   :  { %649 = vmatprep.subr.bf16.mxu1 %v6914_v45 }
  0x2c   :  { %609 = vmatpush1.bf16.msra.mxu0 %v6895_v42 }
  0x2d   :  { %610 = vmatprep.subr.bf16.mxu0 %v6900_v43  ;;  %650 = vmatpush1.bf16.msra.mxu1 %v6936_v49 }
  0x2e   :  { %651 = vmatprep.subr.bf16.mxu1 %v6945_v50 }
  0x30   :  { %611 = vmatpush1.bf16.msra.mxu0 %v6920_v46 }
  0x31   :  { %612 = vmatprep.subr.bf16.mxu0 %v6925_v47  ;;  %652 = vmatpush1.bf16.msra.mxu1 %v6965_v54 }
  0x32   :  { %653 = vmatprep.subr.bf16.mxu1 %v6972_v56  ;;  %v7037_v56 = vld [vmem:[%s8825_s4] ss:$16 sps:$4 sm:$0xff]  }
  0x34   :  { %613 = vmatpush1.bf16.msra.mxu0 %v6953_v52  ;;  %v7029_v52 = vld [vmem:[%s8825_s4 + $0x2c] ss:$16 sps:$4 sm:$0xff]  }
  0x35   :  { %614 = vmatprep.subr.bf16.mxu0 %v6960_v53  ;;  %v7023_v53 = vsel %vm2350_vm3, 1, %v8836_v1  ;;  %8890 = vst [vmem:[#allocation15_spill] sm:$0xff] %v7029_v52  ;;  %654 = vmatpush1.bf16.msra.mxu1 %v6991_v59  ;;  %v7044_v1 = vld [vmem:[%s8825_s4 + $0x28] ss:$16 sps:$4 sm:$0xff]  }
  0x36   :  { %655 = vmatprep.subr.bf16.mxu1 %v7000_v61  ;;  %2353 = vperm.xlu0 %5970, %v7023_v53   ;;  %v7060_v61 = vld [vmem:[%s8825_s4 + $0x8] ss:$16 sps:$4 sm:$0xff]  }
  0x38   :  { %615 = vmatpush1.bf16.msra.mxu0 %v6980_v57  ;;  %v8891_v57 = vmov 0  }
  0x39   :  { %616 = vmatprep.subr.bf16.mxu0 %v6986_v58  ;;  %v2678_v47 = vsel %vm2677_vm4, 1, %v8891_v57  ;;  %v7051_v58 = vld [vmem:[%s8825_s4 + $0xc] ss:$16 sps:$4 sm:$0xff]   ;;  %656 = vmatpush1.bf16.msra.mxu1 %v7020_v37 }
  0x3a   :  { %657 = vmatprep.subr.bf16.mxu1 %v7029_v52  ;;  %3007 = vperm.xlu0 %5970, %v2678_v47   ;;  %v1370_v52 = vsel %vm1369_vm6, 1, %v8891_v57 }
  0x3c   :  { %617 = vmatpush1.bf16.msra.mxu0 %v7008_v62  ;;  %v2024_v62 = vsel %vm2023_vm5, 1, %v8891_v57 }
  0x3d   :  { %618 = vmatprep.subr.bf16.mxu0 %v7015_v63  ;;  %658 = vmatpush1.bf16.msra.mxu1 %v7044_v1  ;;  %v8892_v63 = vmov 0.0|0.0  }
  0x3e   :  { %659 = vmatprep.subr.bf16.mxu1 %v7051_v58  ;;  %3661 = vperm.xlu0 %5970, %v2024_v62  }
  0x40   :  { %619 = vmatpush1.bf16.msra.mxu0 %v7037_v56 }
  0x41   :  { %931 = vmatprep.subr.bf16.mxu0 %v6652_v0  ;;  %660 = vmatpush1.bf16.msra.mxu1 %v7060_v61  ;;  %v1043_v0 = vsel %vm1042_vm7, 1, %v8891_v57 }
  0x42   :  { %4315 = vperm.xlu0 %5970, %v1370_v52   ;;  %972 = vmatprep.subr.bf16.mxu1 %v6684_v6 }
  0x43   :  { %637 = vmatmul.mubr.bf16.vlgmr.msra.gmra.mxu0 %v8892_v63  ;;  %1045 = vperm.xlu1 %5971, %v1043_v0  }
  0x44   :  { %932 = vmatpush1.bf16.msra.mxu0 %v6659_v2  ;;  %963 = vmatprep.mubr.bf16.mxu0 %v8891_v57  ;;  %v79_v2 = vld [vmem:[%s8827_s1] sm:$0xff] }
  0x45   :  { %933 = vmatprep.subr.bf16.mxu0 %v6667_v3  ;;  %678 = vmatmul.mubr.bf16.vlgmr.msra.gmra.mxu1 %v8892_v63  ;;  %v81_v3 = vunpack.c.l.bf16 %v79_v2 }
  0x46   :  { %973 = vmatpush1.bf16.msra.mxu1 %v6689_v7  ;;  %4969 = vperm.xlu0 %5970, %v716_v55  }
  0x47   :  { %974 = vmatprep.subr.bf16.mxu1 %v6708_v10  ;;  %1004 = vmatprep.mubr.bf16.mxu1 %v8891_v57  ;;  %v80_v10 = vld [vmem:[%s8827_s1 + $0x8] sm:$0xff] }
  0x48   :  { %934 = vmatpush1.bf16.msra.mxu0 %v6673_v4  ;;  %1372 = vperm.xlu1 %5971, %v1370_v52   ;;  %v82_v4 = vunpack.c.h.bf16 %v79_v2 }
  0x49   :  { %935 = vmatprep.subr.bf16.mxu0 %v6679_v5 }
  0x4a   :  { %975 = vmatpush1.bf16.msra.mxu1 %v6713_v11 }
  0x4b   :  { %976 = vmatprep.subr.bf16.mxu1 %v6730_v14 }
  0x4c   :  { %936 = vmatpush1.bf16.msra.mxu0 %v6695_v8  ;;  %2026 = vperm.xlu1 %5971, %v2024_v62  }
  0x4d   :  { %937 = vmatprep.subr.bf16.mxu0 %v6702_v9 }
  0x4e   :  { %977 = vmatpush1.bf16.msra.mxu1 %v6737_v15  ;;  %v84_v15 = vunpack.c.h.bf16 %v80_v10 }
  0x4f   :  { %978 = vmatprep.subr.bf16.mxu1 %v6743_v16 }
  0x50   :  { %938 = vmatpush1.bf16.msra.mxu0 %v6720_v12  ;;  %2680 = vperm.xlu1 %5971, %v2678_v47  }
  0x51   :  { %939 = vmatprep.subr.bf16.mxu0 %v6725_v13 }
  0x52   :  { %979 = vmatpush1.bf16.msra.mxu1 %v6761_v19  ;;  %v83_v19 = vunpack.c.l.bf16 %v80_v10 }
  0x53   :  { %980 = vmatprep.subr.bf16.mxu1 %v6767_v20 }
  0x54   :  { %940 = vmatpush1.bf16.msra.mxu0 %v6749_v17  ;;  %3334 = vperm.xlu1 %5971, %v7023_v53  }
  0x55   :  { %941 = vmatprep.subr.bf16.mxu0 %v6755_v18 }
  0x56   :  { %981 = vmatpush1.bf16.msra.mxu1 %v6785_v23 }
  0x57   :  { %982 = vmatprep.subr.bf16.mxu1 %v6791_v24 }
  0x58   :  { %942 = vmatpush1.bf16.msra.mxu0 %v6773_v21  ;;  %3988 = vperm.xlu1 %5971, %v6994_v60  }
  0x59   :  { %943 = vmatprep.subr.bf16.mxu0 %v6778_v22 }
  0x5a   :  { %983 = vmatpush1.bf16.msra.mxu1 %v6809_v27  ;;  %v5387_v27 = vld [vmem:[%s8828_s2 + $0xf0] sm:$0xff] }
  0x5b   :  { %984 = vmatprep.subr.bf16.mxu1 %v6815_v28  ;;  %v407_v28 = vunpack.c.l.bf16 %v5387_v27 }
  0x5c   :  { %944 = vmatpush1.bf16.msra.mxu0 %v6797_v25  ;;  %4642 = vperm.xlu1 %5971, %v1043_v0   ;;  %v5388_v0 = vld [vmem:[%s8828_s2 + $0xf8] sm:$0xff] }
  0x5d   :  { %945 = vmatprep.subr.bf16.mxu0 %v6803_v26 }
  0x5e   :  { %985 = vmatpush1.bf16.msra.mxu1 %v6833_v31 }
  0x5f   :  { %986 = vmatprep.subr.bf16.mxu1 %v6839_v32 }
  0x60   :  { %946 = vmatpush1.bf16.msra.mxu0 %v6821_v29  ;;  %5294 = vperm.xlu1 %5971, %v6948_v51  }
  0x61   :  { %1258 = vmatprep.subr.bf16.mxu0 %v6826_v30  ;;  %v408_v30 = vunpack.c.h.bf16 %v5387_v27  ;;  %v8902_v27 = vld [vmem:[#allocation14_spill] sm:$0xff] }
  0x62   :  { %987 = vmatpush1.bf16.msra.mxu1 %v6857_v35 }
  0x63   :  { %1299 = vmatprep.subr.bf16.mxu1 %v6863_v36 }
  0xe3   :  { %v312_v5 = vpop.f32.mrf.mxu0  ;;  %v353_v13 = vpop.f32.mrf.mxu1 }
  0xe4   :  { %v360_v6 = vadd.f32 %v312_v5, %v81_v3  ;;  %v362_v22 = vadd.f32 %v353_v13, %v83_v19  ;;  %v7127_v19 = vpop.permute.xlu0 %392 }
  0xe5   :  { %v314_v7 = vpop.f32.mrf.mxu0  ;;  %v355_v16 = vpop.f32.mrf.mxu1  ;;  %vm394_vm8 = vcmp.eq.s32.totalorder %v7127_v19, 1 }
  0xe6   :  { %v5384_v8 = vmul.f32 -1.442695, %v360_v6  ;;  %v361_v9 = vadd.f32 %v314_v7, %v82_v4  ;;  %v363_v18 = vadd.f32 %v355_v16, %v84_v15  ;;  %v410_v6 = vunpack.c.h.bf16 %v5388_v0  ;;  %vm5956_vm9 = vmpackc.low %vm394_vm8, %vm394_vm8 }
  0xe7   :  { %v316_v11 = vpop.f32.mrf.mxu0  ;;  %v357_v17 = vpop.f32.mrf.mxu1 }
  0xe8   :  { %6356 = vpow2.f32 %v5384_v8  ;;  %v5385_v12 = vmul.f32 -1.442695, %v361_v9  ;;  %v5386_v21 = vmul.f32 -1.442695, %v363_v18  ;;  %v409_v8 = vunpack.c.l.bf16 %v5388_v0  ;;  %v7296_v0 = vld [vmem:[%s8824_s3 + $0x6c] ss:$16 sps:$4 sm:$0xff]  }
  0xe9   :  { %v317_v14 = vpop.f32.mrf.mxu0  ;;  %v358_v20 = vpop.f32.mrf.mxu1 }
  0xea   :  { %6358 = vpow2.f32 %v5385_v12 }
  0xeb   :  { %6360 = vpow2.f32 %v5386_v21 }
  0xec   :  { %6362 = vtanh.f32 %v362_v22 }
  0xf5   :  { %v6357_v23 = vpop.eup %6356 }
  0xf6   :  { %v367_v24 = vadd.f32 1.0, %v6357_v23 }
  0xf7   :  { %v6359_v25 = vpop.eup %6358 }
  0xf8   :  { %6364 = vrcp.f32 %v367_v24  ;;  %v373_v26 = vadd.f32 1.0, %v6359_v25  ;;  %v6361_v29 = vpop.eup %6360 }
  0xf9   :  { %v6363_v31 = vpop.eup %6362  ;;  %v380_v47 = vadd.f32 1.0, %v6361_v29 }
  0xfa   :  { %6366 = vrcp.f32 %v373_v26 }
 0x103   :  { %v638_v32 = vpop.f32.mrf.mxu0 }
 0x104   :  { %v686_v35 = vadd.f32 %v638_v32, %v407_v28  ;;  %v7174_v28 = vpop.permute.xlu0 %718  ;;  %v7224_v32 = vld [vmem:[%s8824_s3 + $0xc0] ss:$16 sps:$4 sm:$0xff]  }
 0x105   :  { %v6365_v36 = vpop.eup %6364  ;;  %v640_v48 = vpop.f32.mrf.mxu0  ;;  %vm720_vm10 = vcmp.eq.s32.totalorder %v7174_v28, 1  ;;  %v7519_v28 = vld [vmem:[%s8825_s4 + $0x6c] ss:$16 sps:$4 sm:$0xff]  }
 0x106   :  { %v384_v51 = vmul.f32 %v6365_v36, %v6363_v31  ;;  %v5421_v52 = vmul.f32 -1.442695, %v686_v35  ;;  %v687_v53 = vadd.f32 %v640_v48, %v408_v30  ;;  %v679_v2 = vpop.f32.mrf.mxu1  ;;  %vm5962_vm11 = vmpackc.low %vm720_vm10, %vm720_vm10  ;;  %v7219_v31 = vld [vmem:[%s8824_s3 + $0xc4] ss:$16 sps:$4 sm:$0xff]   ;;  %v7229_v35 = vld [vmem:[%s8824_s3 + $0xc8] ss:$16 sps:$4 sm:$0xff]  }
 0x107   :  { %v6367_v55 = vpop.eup %6366  ;;  %v642_v60 = vpop.f32.mrf.mxu0  ;;  %v688_v11 = vadd.f32 %v679_v2, %v409_v8  ;;  %v7234_v36 = vld [vmem:[%s8824_s3 + $0xcc] ss:$16 sps:$4 sm:$0xff]   ;;  %v7301_v2 = vld [vmem:[%s8824_s3 + $0x60] ss:$16 sps:$4 sm:$0xff]   ;;  %v7330_v8 = vld [vmem:[%s8824_s3 + $0x48] ss:$16 sps:$4 sm:$0xff]  }
 0x108   :  { %v383_v62 = vmul.f32 0.0, %v6367_v55  ;;  %6368 = vpow2.f32 %v5421_v52  ;;  %v5422_v63 = vmul.f32 -1.442695, %v687_v53  ;;  %v681_v5 = vpop.f32.mrf.mxu1  ;;  %v7248_v48 = vld [vmem:[%s8824_s3 + $0xac] ss:$16 sps:$4 sm:$0xff]  }
 0x109   :  { %6370 = vrcp.f32 %v380_v47  ;;  %v643_v3 = vpop.f32.mrf.mxu0  ;;  %v689_v10 = vadd.f32 %v681_v5, %v410_v6  ;;  %v7243_v47 = vld [vmem:[%s8824_s3 + $0xa4] ss:$16 sps:$4 sm:$0xff]   ;;  %v7258_v52 = vld [vmem:[%s8824_s3 + $0xa8] ss:$16 sps:$4 sm:$0xff]   ;;  %v7272_v55 = vld [vmem:[%s8824_s3 + $0x8c] ss:$16 sps:$4 sm:$0xff]  }
 0x10a   :  { %v7124_v4 = vadd.f32 %v384_v51, %v383_v62  ;;  %6372 = vpow2.f32 %v5422_v63  ;;  %v683_v7 = vpop.f32.mrf.mxu1  ;;  %v7253_v51 = vld [vmem:[%s8824_s3 + $0xa0] ss:$16 sps:$4 sm:$0xff]   ;;  %v7267_v53 = vld [vmem:[%s8824_s3 + $0x84] ss:$16 sps:$4 sm:$0xff]   ;;  %v7282_v62 = vld [vmem:[%s8824_s3 + $0x88] ss:$16 sps:$4 sm:$0xff]  }
 0x10b   :  { %v5423_v12 = vmul.f32 -1.442695, %v689_v10  ;;  %v7277_v60 = vld [vmem:[%s8824_s3 + $0x80] ss:$16 sps:$4 sm:$0xff]   ;;  %v7291_v63 = vld [vmem:[%s8824_s3 + $0x64] ss:$16 sps:$4 sm:$0xff]  }
 0x10c   :  { %6374 = vtanh.f32 %v7124_v4  ;;  %v684_v9 = vpop.f32.mrf.mxu1  ;;  %v7306_v3 = vld [vmem:[%s8824_s3 + $0x68] ss:$16 sps:$4 sm:$0xff]   ;;  %v7315_v5 = vld [vmem:[%s8824_s3 + $0x44] ss:$16 sps:$4 sm:$0xff]   ;;  %v7320_v6 = vld [vmem:[%s8824_s3 + $0x4c] ss:$16 sps:$4 sm:$0xff]  }
 0x10d   :  { %6376 = vtanh.f32 %v688_v11  ;;  %v7325_v7 = vld [vmem:[%s8824_s3 + $0x40] ss:$16 sps:$4 sm:$0xff]   ;;  %v7339_v9 = vld [vmem:[%s8824_s3 + $0x24] ss:$16 sps:$4 sm:$0xff]   ;;  %v7344_v10 = vld [vmem:[%s8824_s3 + $0x2c] ss:$16 sps:$4 sm:$0xff]  }
 0x10e   :  { %6378 = vpow2.f32 %v5423_v12  ;;  %v7349_v11 = vld [vmem:[%s8824_s3 + $0x20] ss:$16 sps:$4 sm:$0xff]   ;;  %v7354_v12 = vld [vmem:[%s8824_s3 + $0x28] ss:$16 sps:$4 sm:$0xff]  }
 0x115   :  { %v6369_v13 = vpop.eup %6368 }
 0x116   :  { %v6371_v14 = vpop.eup %6370  ;;  %v693_v15 = vadd.f32 1.0, %v6369_v13  ;;  %v7363_v13 = vld [vmem:[%s8824_s3 + $0x4] ss:$16 sps:$4 sm:$0xff]  }
 0x117   :  { %v6373_v16 = vpop.eup %6372 }
 0x118   :  { %6380 = vrcp.f32 %v693_v15  ;;  %v699_v17 = vadd.f32 1.0, %v6373_v16  ;;  %v7373_v15 = vld [vmem:[%s8824_s3] ss:$16 sps:$4 sm:$0xff]   ;;  %v7378_v16 = vld [vmem:[%s8824_s3 + $0x8] ss:$16 sps:$4 sm:$0xff]  }
 0x119   :  { %v6375_v18 = vpop.eup %6374 }
 0x11a   :  { %v387_v20 = vmul.f32 %v6375_v18, %v6371_v14  ;;  %6382 = vrcp.f32 %v699_v17  ;;  %v6377_v23 = vpop.eup %6376  ;;  %v7368_v14 = vld [vmem:[%s8824_s3 + $0xc] ss:$16 sps:$4 sm:$0xff]   ;;  %v7387_v17 = vld [vmem:[%s8825_s4 + $0xe4] ss:$16 sps:$4 sm:$0xff]  }
 0x11b   :  { %v6379_v24 = vpop.eup %6378  ;;  %v7392_v18 = vld [vmem:[%s8825_s4 + $0xec] ss:$16 sps:$4 sm:$0xff]  }
 0x11c   :  { %v5957_v21 = vpack.c.bf16 %v387_v20, %v387_v20  ;;  %v7135_v22 = vsel %vm394_vm8, %v387_v20, 0.0  ;;  %v706_v25 = vadd.f32 1.0, %v6379_v24  ;;  %v5425_v20 = vld [vmem:[%s8827_s1 + $0x10] sm:$0xff] }
 0x11d   :  { %400 = vst [vmem:[%s8829_s5] sm:$0xff] %v7135_v22 }
 0x11e   :  { %5958 = vmatmul.mubr.msk.bf16.vlgmr.msra.gmra.mxu0 %vm5956_vm9, %v5957_v21  ;;  %5961 = vmatmul.mubr.msk.bf16.vlgmr.msra.gmra.mxu1 %vm5956_vm9, %v5957_v21  ;;  %6384 = vrcp.f32 %v706_v25  ;;  %v734_v21 = vunpack.c.l.bf16 %v5425_v20 }
 0x11f   :  { %1259 = vmatpush1.bf16.msra.mxu0 %v6845_v33  ;;  %1300 = vmatpush1.bf16.msra.mxu1 %v6883_v40 }
 0x120   :  { %1260 = vmatprep.subr.bf16.mxu0 %v6850_v34  ;;  %1301 = vmatprep.subr.bf16.mxu1 %v6889_v41 }
 0x121   :  { %1290 = vmatprep.mubr.bf16.mxu0 %v8891_v57  ;;  %1331 = vmatprep.mubr.bf16.mxu1 %v8891_v57 }
 0x123   :  { %1261 = vmatpush1.bf16.msra.mxu0 %v6870_v38  ;;  %1302 = vmatpush1.bf16.msra.mxu1 %v6908_v44  ;;  %v8895_v44 = vld [vmem:[#allocation7_spill] sm:$0xff] }
 0x124   :  { %1262 = vmatprep.subr.bf16.mxu0 %v6875_v39  ;;  %1303 = vmatprep.subr.bf16.mxu1 %v6914_v45  ;;  %v8893_v39 = vld [vmem:[#allocation6_spill] sm:$0xff]  ;;  %v8897_v45 = vld [vmem:[#allocation12_spill] sm:$0xff] }
 0x125   :  { %v6381_v33 = vpop.eup %6380  ;;  %8903 = vst [vmem:[#allocation6_spill] sm:$0xff] %v7519_v28 }
 0x126   :  { %v710_v41 = vmul.f32 %v6381_v33, %v6377_v23  ;;  %v735_v23 = vunpack.c.h.bf16 %v5425_v20 }
 0x127   :  { %v6383_v40 = vpop.eup %6382  ;;  %1263 = vmatpush1.bf16.msra.mxu0 %v6895_v42  ;;  %1304 = vmatpush1.bf16.msra.mxu1 %v6936_v49  ;;  %v8894_v42 = vld [vmem:[#allocation9_spill] sm:$0xff]  ;;  %v8898_v49 = vld [vmem:[#allocation10_spill] sm:$0xff] }
 0x128   :  { %v709_v34 = vmul.f32 0.0, %v6383_v40  ;;  %1264 = vmatprep.subr.bf16.mxu0 %v6900_v43  ;;  %1305 = vmatprep.subr.bf16.mxu1 %v6945_v50  ;;  %v8896_v43 = vld [vmem:[#allocation8_spill] sm:$0xff]  ;;  %v8900_v50 = vld [vmem:[#allocation15_spill] sm:$0xff] }
 0x12a   :  { %v7155_v38 = vadd.f32 %v710_v41, %v709_v34 }
 0x12b   :  { %1265 = vmatpush1.bf16.msra.mxu0 %v6920_v46  ;;  %1306 = vmatpush1.bf16.msra.mxu1 %v6965_v54  ;;  %v8899_v46 = vld [vmem:[#allocation11_spill] sm:$0xff]  ;;  %v8901_v54 = vld [vmem:[#allocation13_spill] sm:$0xff]  ;;  %v6385_v26 = vpop.eup %6384 }
 0x12c   :  { %6386 = vtanh.f32 %v7155_v38  ;;  %1266 = vmatprep.subr.bf16.mxu0 %v8893_v39  ;;  %1307 = vmatprep.subr.bf16.mxu1 %v8894_v42 }
 0x12f   :  { %1267 = vmatpush1.bf16.msra.mxu0 %v8895_v44  ;;  %1308 = vmatpush1.bf16.msra.mxu1 %v6991_v59 }
 0x130   :  { %1268 = vmatprep.subr.bf16.mxu0 %v8896_v43  ;;  %1309 = vmatprep.subr.bf16.mxu1 %v8897_v45 }
 0x133   :  { %1269 = vmatpush1.bf16.msra.mxu0 %v8898_v49  ;;  %1310 = vmatpush1.bf16.msra.mxu1 %v7020_v37 }
 0x134   :  { %1270 = vmatprep.subr.bf16.mxu0 %v8899_v46  ;;  %1311 = vmatprep.subr.bf16.mxu1 %v8900_v50  ;;  %v5426_v46 = vld [vmem:[%s8827_s1 + $0x18] sm:$0xff] }
 0x135   :  { %v737_v50 = vunpack.c.h.bf16 %v5426_v46 }
 0x137   :  { %1271 = vmatpush1.bf16.msra.mxu0 %v8901_v54  ;;  %1312 = vmatpush1.bf16.msra.mxu1 %v7044_v1  ;;  %v7195_v1 = vld [vmem:[%s8824_s3 + $0xe4] ss:$16 sps:$4 sm:$0xff]  }
 0x138   :  { %1272 = vmatprep.subr.bf16.mxu0 %v8902_v27  ;;  %1313 = vmatprep.subr.bf16.mxu1 %v7051_v58  ;;  %v7205_v58 = vld [vmem:[%s8824_s3 + $0xe0] ss:$16 sps:$4 sm:$0xff]  }
 0x139   :  { %v6387_v59 = vpop.eup %6386 }
 0x13a   :  { %v713_v29 = vmul.f32 %v6387_v59, %v6385_v26  ;;  %v736_v26 = vunpack.c.l.bf16 %v5426_v46 }
 0x13b   :  { %1273 = vmatpush1.bf16.msra.mxu0 %v7037_v56  ;;  %1314 = vmatpush1.bf16.msra.mxu1 %v7060_v61  ;;  %v7200_v56 = vld [vmem:[%s8824_s3 + $0xec] ss:$16 sps:$4 sm:$0xff]   ;;  %v7210_v61 = vld [vmem:[%s8824_s3 + $0xe8] ss:$16 sps:$4 sm:$0xff]  }
 0x13c   :  { %v5963_v37 = vpack.c.bf16 %v713_v29, %v713_v29  ;;  %v7181_v30 = vsel %vm720_vm10, %v713_v29, 0.0  ;;  %1585 = vmatprep.subr.bf16.mxu0 %v7195_v1  ;;  %1626 = vmatprep.subr.bf16.mxu1 %v7200_v56 }
 0x13d   :  { %5424 = vst [vmem:[%s8830_s6 + $0x38] sm:$0xff] %v7181_v30 }
 0x13e   :  { %5964 = vmatmul.mubr.msk.bf16.vlgmr.msra.gmra.mxu0 %vm5962_vm11, %v5963_v37  ;;  %5967 = vmatmul.mubr.msk.bf16.vlgmr.msra.gmra.mxu1 %vm5962_vm11, %v5963_v37 }
 0x13f   :  { %1617 = vmatprep.mubr.bf16.mxu0 %v8891_v57  ;;  %1658 = vmatprep.mubr.bf16.mxu1 %v8891_v57 }
 0x140   :  { %1586 = vmatpush1.bf16.msra.mxu0 %v7205_v58  ;;  %1627 = vmatpush1.bf16.msra.mxu1 %v7210_v61 }
 0x141   :  { %1587 = vmatprep.subr.bf16.mxu0 %v7219_v31  ;;  %1628 = vmatprep.subr.bf16.mxu1 %v7234_v36 }
 0x144   :  { %1588 = vmatpush1.bf16.msra.mxu0 %v7224_v32  ;;  %1629 = vmatpush1.bf16.msra.mxu1 %v7229_v35 }
 0x145   :  { %1589 = vmatprep.subr.bf16.mxu0 %v7243_v47  ;;  %1630 = vmatprep.subr.bf16.mxu1 %v7248_v48 }
 0x148   :  { %1590 = vmatpush1.bf16.msra.mxu0 %v7253_v51  ;;  %1631 = vmatpush1.bf16.msra.mxu1 %v7258_v52 }
 0x149   :  { %1591 = vmatprep.subr.bf16.mxu0 %v7267_v53  ;;  %1632 = vmatprep.subr.bf16.mxu1 %v7272_v55 }
 0x14c   :  { %1592 = vmatpush1.bf16.msra.mxu0 %v7277_v60  ;;  %1633 = vmatpush1.bf16.msra.mxu1 %v7282_v62 }
 0x14d   :  { %1593 = vmatprep.subr.bf16.mxu0 %v7291_v63  ;;  %1634 = vmatprep.subr.bf16.mxu1 %v7296_v0 }
 0x150   :  { %1594 = vmatpush1.bf16.msra.mxu0 %v7301_v2  ;;  %1635 = vmatpush1.bf16.msra.mxu1 %v7306_v3 }
 0x151   :  { %1595 = vmatprep.subr.bf16.mxu0 %v7315_v5  ;;  %1636 = vmatprep.subr.bf16.mxu1 %v7320_v6 }
 0x154   :  { %1596 = vmatpush1.bf16.msra.mxu0 %v7325_v7  ;;  %1637 = vmatpush1.bf16.msra.mxu1 %v7330_v8 }
 0x155   :  { %1597 = vmatprep.subr.bf16.mxu0 %v7339_v9  ;;  %1638 = vmatprep.subr.bf16.mxu1 %v7344_v10 }
 0x158   :  { %1598 = vmatpush1.bf16.msra.mxu0 %v7349_v11  ;;  %1639 = vmatpush1.bf16.msra.mxu1 %v7354_v12 }
 0x159   :  { %1599 = vmatprep.subr.bf16.mxu0 %v7363_v13  ;;  %1640 = vmatprep.subr.bf16.mxu1 %v7368_v14 }
 0x15c   :  { %1600 = vmatpush1.bf16.msra.mxu0 %v7373_v15  ;;  %1641 = vmatpush1.bf16.msra.mxu1 %v7378_v16 }
 0x15d   :  { %1912 = vmatprep.subr.bf16.mxu0 %v7387_v17  ;;  %1953 = vmatprep.subr.bf16.mxu1 %v7392_v18 }
 0x1de   :  { %v965_v24 = vpop.f32.mrf.mxu0  ;;  %v1006_v33 = vpop.f32.mrf.mxu1 }
 0x1df   :  { %v1013_v40 = vadd.f32 %v965_v24, %v734_v21  ;;  %v1015_v29 = vadd.f32 %v1006_v33, %v736_v26 }
 0x1e0   :  { %v967_v25 = vpop.f32.mrf.mxu0  ;;  %v1008_v34 = vpop.f32.mrf.mxu1 }
 0x1e1   :  { %v5459_v41 = vmul.f32 -1.442695, %v1013_v40  ;;  %v1014_v39 = vadd.f32 %v967_v25, %v735_v23  ;;  %v1016_v54 = vadd.f32 %v1008_v34, %v737_v50  ;;  %v5463_v23 = vld [vmem:[%s8828_s2 + $0xe0] sm:$0xff]  ;;  %v397_v50 = vsel %vm394_vm8, %v7124_v4, 0.0 }
 0x1e2   :  { %v969_v42 = vpop.f32.mrf.mxu0  ;;  %v1010_v44 = vpop.f32.mrf.mxu1  ;;  %v1061_v24 = vunpack.c.l.bf16 %v5463_v23  ;;  %v1062_v40 = vunpack.c.h.bf16 %v5463_v23 }
 0x1e3   :  { %6388 = vpow2.f32 %v5459_v41  ;;  %v5460_v43 = vmul.f32 -1.442695, %v1014_v39  ;;  %v5461_v27 = vmul.f32 -1.442695, %v1016_v54 }
 0x1e4   :  { %v970_v45 = vpop.f32.mrf.mxu0  ;;  %v1011_v49 = vpop.f32.mrf.mxu1 }
 0x1e5   :  { %6390 = vpow2.f32 %v5460_v43 }
 0x1e6   :  { %6392 = vpow2.f32 %v5461_v27 }
 0x1f0   :  { %v6389_v59 = vpop.eup %6388 }
 0x1f1   :  { %v1020_v37 = vadd.f32 1.0, %v6389_v59  ;;  %v1046_v59 = vpop.permute.xlu1 %1045 }
 0x1f2   :  { %v6391_v20 = vpop.eup %6390  ;;  %vm1047_vm12 = vcmp.eq.s32.totalorder %v1046_v59, 1  ;;  %v7437_v59 = vld [vmem:[%s8825_s4 + $0xc4] ss:$16 sps:$4 sm:$0xff]  }
 0x1f3   :  { %6394 = vrcp.f32 %v1020_v37  ;;  %v1026_v21 = vadd.f32 1.0, %v6391_v20  ;;  %v6393_v34 = vpop.eup %6392 }
 0x1f4   :  { %6396 = vtanh.f32 %v1015_v29  ;;  %v1033_v54 = vadd.f32 1.0, %v6393_v34 }
 0x1f5   :  { %6398 = vrcp.f32 %v1026_v21 }
 0x1fe   :  { %v1292_v25 = vpop.f32.mrf.mxu0  ;;  %v1333_v41 = vpop.f32.mrf.mxu1 }
 0x1ff   :  { %v1340_v39 = vadd.f32 %v1292_v25, %v1061_v24 }
 0x200   :  { %v6395_v42 = vpop.eup %6394  ;;  %v1294_v44 = vpop.f32.mrf.mxu0 }
 0x201   :  { %v1335_v33 = vpop.f32.mrf.mxu1  ;;  %v6397_v43 = vpop.eup %6396  ;;  %v5497_v45 = vmul.f32 -1.442695, %v1340_v39  ;;  %v1341_v49 = vadd.f32 %v1294_v44, %v1062_v40  ;;  %v5464_v40 = vld [vmem:[%s8828_s2 + $0xe8] sm:$0xff] }
 0x202   :  { %v6399_v46 = vpop.eup %6398  ;;  %v1296_v26 = vpop.f32.mrf.mxu0  ;;  %v1037_v37 = vmul.f32 %v6397_v43, %v6395_v42  ;;  %v1064_v19 = vunpack.c.h.bf16 %v5464_v40  ;;  %v1063_v34 = vunpack.c.l.bf16 %v5464_v40  ;;  %v7475_v40 = vld [vmem:[%s8825_s4 + $0xa0] ss:$16 sps:$4 sm:$0xff]  }
 0x203   :  { %v1337_v27 = vpop.f32.mrf.mxu1  ;;  %v1036_v29 = vmul.f32 %v6399_v46, %v397_v50  ;;  %6400 = vpow2.f32 %v5497_v45  ;;  %v5498_v20 = vmul.f32 -1.442695, %v1341_v49 }
 0x204   :  { %v1297_v21 = vpop.f32.mrf.mxu0  ;;  %v1343_v25 = vadd.f32 %v1335_v33, %v1064_v19  ;;  %v1342_v44 = vadd.f32 %v1333_v41, %v1063_v34  ;;  %v7422_v41 = vld [vmem:[%s8825_s4 + $0xe0] ss:$16 sps:$4 sm:$0xff]   ;;  %v7480_v19 = vld [vmem:[%s8825_s4 + $0xa8] ss:$16 sps:$4 sm:$0xff]   ;;  %v7487_v34 = vld [vmem:[%s8825_s4 + $0x84] ss:$16 sps:$4 sm:$0xff]  }
 0x205   :  { %v1338_v23 = vpop.f32.mrf.mxu1  ;;  %v1038_v24 = vadd.f32 %v1037_v37, %v1036_v29  ;;  %6402 = vpow2.f32 %v5498_v20  ;;  %v7442_v29 = vld [vmem:[%s8825_s4 + $0xcc] ss:$16 sps:$4 sm:$0xff]   ;;  %v7449_v37 = vld [vmem:[%s8825_s4 + $0xc0] ss:$16 sps:$4 sm:$0xff]   ;;  %v7454_v20 = vld [vmem:[%s8825_s4 + $0xc8] ss:$16 sps:$4 sm:$0xff]  }
 0x206   :  { %6404 = vrcp.f32 %v1033_v54  ;;  %v5499_v39 = vmul.f32 -1.442695, %v1343_v25  ;;  %v7461_v21 = vld [vmem:[%s8825_s4 + $0xa4] ss:$16 sps:$4 sm:$0xff]   ;;  %v7466_v23 = vld [vmem:[%s8825_s4 + $0xac] ss:$16 sps:$4 sm:$0xff]  }
 0x207   :  { %6406 = vtanh.f32 %v1038_v24  ;;  %v7412_v4 = vsel %vm1047_vm12, %v1038_v24, %v397_v50  ;;  %v7427_v50 = vld [vmem:[%s8825_s4 + $0xe8] ss:$16 sps:$4 sm:$0xff]  }
 0x208   :  { %6408 = vpow2.f32 %v5499_v39  ;;  %v7492_v39 = vld [vmem:[%s8825_s4 + $0x8c] ss:$16 sps:$4 sm:$0xff]  }
 0x210   :  { %v6401_v42 = vpop.eup %6400 }
 0x211   :  { %v1347_v43 = vadd.f32 1.0, %v6401_v42 }
 0x212   :  { %v6403_v45 = vpop.eup %6402 }
 0x213   :  { %v6405_v49 = vpop.eup %6404  ;;  %6410 = vrcp.f32 %v1347_v43  ;;  %v1353_v46 = vadd.f32 1.0, %v6403_v45  ;;  %v723_v43 = vsel %vm720_vm10, %v7155_v38, 0.0  ;;  %v7514_v38 = vld [vmem:[%s8825_s4 + $0x64] ss:$16 sps:$4 sm:$0xff]  }
 0x214   :  { %v6407_v26 = vpop.eup %6406  ;;  %6412 = vtanh.f32 %v1342_v44 }
 0x215   :  { %v1040_v27 = vmul.f32 %v6407_v26, %v6405_v49  ;;  %6414 = vrcp.f32 %v1353_v46  ;;  %v6409_v24 = vpop.eup %6408  ;;  %v7502_v26 = vld [vmem:[%s8825_s4 + $0x80] ss:$16 sps:$4 sm:$0xff]  }
 0x216   :  { %v1360_v45 = vadd.f32 1.0, %v6409_v24  ;;  %v7526_v24 = vld [vmem:[%s8825_s4 + $0x60] ss:$16 sps:$4 sm:$0xff]  }
 0x217   :  { %v7416_v54 = vsel %vm1047_vm12, %v1040_v27, %v7135_v22  ;;  %v1052_v33 = vsel %vm1047_vm12, %v1040_v27, 0.0  ;;  %v7507_v27 = vld [vmem:[%s8825_s4 + $0x88] ss:$16 sps:$4 sm:$0xff]   ;;  %8904 = vst [vmem:[#allocation9_spill] sm:$0xff] %v7526_v24 }
 0x218   :  { %5462 = vst [vmem:[%s8829_s5 + $0x8] sm:$0xff] %v1052_v33  ;;  %v1392_v22 = vpack.c.bf16 %v7416_v54, %v7416_v54  ;;  %v1373_v33 = vpop.permute.xlu1 %1372  ;;  %6416 = vrcp.f32 %v1360_v45  ;;  %v7546_v45 = vld [vmem:[%s8825_s4 + $0x4c] ss:$16 sps:$4 sm:$0xff]  }
 0x219   :  { %vm1374_vm13 = vcmp.eq.s32.totalorder %v1373_v33, 1  ;;  %8907 = vst [vmem:[#allocation12_spill] sm:$0xff] %v7546_v45 }
 0x21a   :  { %1618 = vmatmul.mubr.bf16.vlgmr.msra.gmra.mxu0 %v1392_v22  ;;  %1659 = vmatmul.mubr.bf16.vlgmr.msra.gmra.mxu1 %v1392_v22 }
 0x21b   :  { %1913 = vmatpush1.bf16.msra.mxu0 %v7422_v41  ;;  %1954 = vmatpush1.bf16.msra.mxu1 %v7427_v50 }
 0x21c   :  { %1914 = vmatprep.subr.bf16.mxu0 %v7437_v59  ;;  %1955 = vmatprep.subr.bf16.mxu1 %v7442_v29 }
 0x21d   :  { %1944 = vmatprep.mubr.bf16.mxu0 %v8891_v57  ;;  %1985 = vmatprep.mubr.bf16.mxu1 %v8891_v57 }
 0x21f   :  { %1915 = vmatpush1.bf16.msra.mxu0 %v7449_v37  ;;  %1956 = vmatpush1.bf16.msra.mxu1 %v7454_v20 }
 0x220   :  { %v6411_v25 = vpop.eup %6410  ;;  %1916 = vmatprep.subr.bf16.mxu0 %v7461_v21  ;;  %1957 = vmatprep.subr.bf16.mxu1 %v7466_v23 }
 0x221   :  { %v6413_v42 = vpop.eup %6412 }
 0x222   :  { %v6415_v44 = vpop.eup %6414  ;;  %v1364_v49 = vmul.f32 %v6413_v42, %v6411_v25  ;;  %v7531_v25 = vld [vmem:[%s8825_s4 + $0x68] ss:$16 sps:$4 sm:$0xff]  }
 0x223   :  { %v1363_v46 = vmul.f32 %v6415_v44, %v723_v43  ;;  %1917 = vmatpush1.bf16.msra.mxu0 %v7475_v40  ;;  %1958 = vmatpush1.bf16.msra.mxu1 %v7480_v19  ;;  %8905 = vst [vmem:[#allocation7_spill] sm:$0xff] %v7531_v25  ;;  %v7541_v44 = vld [vmem:[%s8825_s4 + $0x44] ss:$16 sps:$4 sm:$0xff]  }
 0x224   :  { %1918 = vmatprep.subr.bf16.mxu0 %v7487_v34  ;;  %1959 = vmatprep.subr.bf16.mxu1 %v7492_v39  ;;  %8906 = vst [vmem:[#allocation8_spill] sm:$0xff] %v7541_v44 }
 0x225   :  { %v1365_v22 = vadd.f32 %v1364_v49, %v1363_v46  ;;  %v7558_v49 = vld [vmem:[%s8825_s4 + $0x48] ss:$16 sps:$4 sm:$0xff]   ;;  %v7565_v46 = vld [vmem:[%s8825_s4 + $0x24] ss:$16 sps:$4 sm:$0xff]  }
 0x226   :  { %8909 = vst [vmem:[#allocation11_spill] sm:$0xff] %v7558_v49  ;;  %8910 = vst [vmem:[#allocation15_spill] sm:$0xff] %v7565_v46 }
 0x227   :  { %6418 = vtanh.f32 %v1365_v22  ;;  %1919 = vmatpush1.bf16.msra.mxu0 %v7502_v26  ;;  %1960 = vmatpush1.bf16.msra.mxu1 %v7507_v27  ;;  %v7534_v42 = vsel %vm1374_vm13, %v1365_v22, %v723_v43  ;;  %v7553_v43 = vld [vmem:[%s8825_s4 + $0x40] ss:$16 sps:$4 sm:$0xff]   ;;  %v7570_v22 = vld [vmem:[%s8825_s4 + $0x2c] ss:$16 sps:$4 sm:$0xff]  }
 0x228   :  { %1920 = vmatprep.subr.bf16.mxu0 %v7514_v38  ;;  %1961 = vmatprep.subr.bf16.mxu1 %v7519_v28  ;;  %8908 = vst [vmem:[#allocation10_spill] sm:$0xff] %v7553_v43  ;;  %8911 = vst [vmem:[#allocation13_spill] sm:$0xff] %v7570_v22 }
 0x22b   :  { %1921 = vmatpush1.bf16.msra.mxu0 %v7526_v24  ;;  %1962 = vmatpush1.bf16.msra.mxu1 %v7531_v25  ;;  %v6417_v25 = vpop.eup %6416 }
 0x22c   :  { %1922 = vmatprep.subr.bf16.mxu0 %v7541_v44  ;;  %1963 = vmatprep.subr.bf16.mxu1 %v7546_v45  ;;  %v7577_v44 = vld [vmem:[%s8825_s4 + $0x20] ss:$16 sps:$4 sm:$0xff]   ;;  %v7582_v45 = vld [vmem:[%s8825_s4 + $0x28] ss:$16 sps:$4 sm:$0xff]  }
 0x22d   :  { %8912 = vst [vmem:[#allocation14_spill] sm:$0xff] %v7577_v44  ;;  %8913 = vst [vmem:[#allocation16_spill] sm:$0xff] %v7582_v45 }
 0x22f   :  { %1923 = vmatpush1.bf16.msra.mxu0 %v7553_v43  ;;  %1964 = vmatpush1.bf16.msra.mxu1 %v7558_v49  ;;  %v7589_v43 = vld [vmem:[%s8825_s4 + $0x4] ss:$16 sps:$4 sm:$0xff]   ;;  %v7594_v49 = vld [vmem:[%s8825_s4 + $0xc] ss:$16 sps:$4 sm:$0xff]  }
 0x230   :  { %1924 = vmatprep.subr.bf16.mxu0 %v7565_v46  ;;  %1965 = vmatprep.subr.bf16.mxu1 %v7570_v22  ;;  %8914 = vst [vmem:[#allocation17_spill] sm:$0xff] %v7589_v43  ;;  %v7601_v46 = vld [vmem:[%s8825_s4] ss:$16 sps:$4 sm:$0xff]   ;;  %v7606_v22 = vld [vmem:[%s8825_s4 + $0x8] ss:$16 sps:$4 sm:$0xff]  }
 0x233   :  { %1925 = vmatpush1.bf16.msra.mxu0 %v7577_v44  ;;  %1966 = vmatpush1.bf16.msra.mxu1 %v7582_v45 }
 0x234   :  { %v6419_v24 = vpop.eup %6418  ;;  %1926 = vmatprep.subr.bf16.mxu0 %v7589_v43  ;;  %1967 = vmatprep.subr.bf16.mxu1 %v7594_v49 }
 0x235   :  { %v1367_v28 = vmul.f32 %v6419_v24, %v6417_v25 }
 0x237   :  { %1927 = vmatpush1.bf16.msra.mxu0 %v7601_v46  ;;  %1968 = vmatpush1.bf16.msra.mxu1 %v7606_v22  ;;  %v7614_v45 = vsel %vm1374_vm13, %v1367_v28, %v7181_v30  ;;  %v1379_v44 = vsel %vm1374_vm13, %v1367_v28, 0.0  ;;  %v5501_v30 = vld [vmem:[%s8827_s1 + $0x20] sm:$0xff] }
 0x238   :  { %5500 = vst [vmem:[%s8830_s6 + $0x30] sm:$0xff] %v1379_v44  ;;  %v1719_v43 = vpack.c.bf16 %v7614_v45, %v7614_v45  ;;  %2239 = vmatprep.subr.bf16.mxu0 %v7195_v1  ;;  %2280 = vmatprep.subr.bf16.mxu1 %v7200_v56  ;;  %v1388_v1 = vunpack.c.l.bf16 %v5501_v30  ;;  %v1389_v56 = vunpack.c.h.bf16 %v5501_v30 }
 0x23a   :  { %1945 = vmatmul.mubr.bf16.vlgmr.msra.gmra.mxu0 %v1719_v43  ;;  %1986 = vmatmul.mubr.bf16.vlgmr.msra.gmra.mxu1 %v1719_v43 }
 0x23b   :  { %2240 = vmatpush1.bf16.msra.mxu0 %v7205_v58  ;;  %2281 = vmatpush1.bf16.msra.mxu1 %v7210_v61 }
 0x23c   :  { %2241 = vmatprep.subr.bf16.mxu0 %v7219_v31  ;;  %2282 = vmatprep.subr.bf16.mxu1 %v7234_v36 }
 0x23d   :  { %2271 = vmatprep.mubr.bf16.mxu0 %v8891_v57  ;;  %2312 = vmatprep.mubr.bf16.mxu1 %v8891_v57 }
 0x23f   :  { %2242 = vmatpush1.bf16.msra.mxu0 %v7224_v32  ;;  %2283 = vmatpush1.bf16.msra.mxu1 %v7229_v35 }
 0x240   :  { %2243 = vmatprep.subr.bf16.mxu0 %v7243_v47  ;;  %2284 = vmatprep.subr.bf16.mxu1 %v7248_v48 }
 0x243   :  { %2244 = vmatpush1.bf16.msra.mxu0 %v7253_v51  ;;  %2285 = vmatpush1.bf16.msra.mxu1 %v7258_v52 }
 0x244   :  { %2245 = vmatprep.subr.bf16.mxu0 %v7267_v53  ;;  %2286 = vmatprep.subr.bf16.mxu1 %v7272_v55 }
 0x247   :  { %2246 = vmatpush1.bf16.msra.mxu0 %v7277_v60  ;;  %2287 = vmatpush1.bf16.msra.mxu1 %v7282_v62  ;;  %v5502_v60 = vld [vmem:[%s8827_s1 + $0x28] sm:$0xff] }
 0x248   :  { %2247 = vmatprep.subr.bf16.mxu0 %v7291_v63  ;;  %2288 = vmatprep.subr.bf16.mxu1 %v7296_v0  ;;  %v1391_v62 = vunpack.c.h.bf16 %v5502_v60  ;;  %v1390_v0 = vunpack.c.l.bf16 %v5502_v60 }
 0x24b   :  { %2248 = vmatpush1.bf16.msra.mxu0 %v7301_v2  ;;  %2289 = vmatpush1.bf16.msra.mxu1 %v7306_v3 }
 0x24c   :  { %2249 = vmatprep.subr.bf16.mxu0 %v7315_v5  ;;  %2290 = vmatprep.subr.bf16.mxu1 %v7320_v6 }
 0x24f   :  { %2250 = vmatpush1.bf16.msra.mxu0 %v7325_v7  ;;  %2291 = vmatpush1.bf16.msra.mxu1 %v7330_v8 }
 0x250   :  { %2251 = vmatprep.subr.bf16.mxu0 %v7339_v9  ;;  %2292 = vmatprep.subr.bf16.mxu1 %v7344_v10  ;;  %v5539_v9 = vld [vmem:[%s8828_s2 + $0xd0] sm:$0xff] }
 0x251   :  { %v1715_v10 = vunpack.c.l.bf16 %v5539_v9 }
 0x253   :  { %2252 = vmatpush1.bf16.msra.mxu0 %v7349_v11  ;;  %2293 = vmatpush1.bf16.msra.mxu1 %v7354_v12  ;;  %v1716_v11 = vunpack.c.h.bf16 %v5539_v9 }
 0x254   :  { %2253 = vmatprep.subr.bf16.mxu0 %v7363_v13  ;;  %2294 = vmatprep.subr.bf16.mxu1 %v7368_v14 }
 0x257   :  { %2254 = vmatpush1.bf16.msra.mxu0 %v7373_v15  ;;  %2295 = vmatpush1.bf16.msra.mxu1 %v7378_v16 }
 0x258   :  { %2566 = vmatprep.subr.bf16.mxu0 %v7387_v17  ;;  %2607 = vmatprep.subr.bf16.mxu1 %v7392_v18 }
 0x2da   :  { %v1619_v58 = vpop.f32.mrf.mxu0  ;;  %v1660_v61 = vpop.f32.mrf.mxu1 }
 0x2db   :  { %v1667_v31 = vadd.f32 %v1619_v58, %v1388_v1  ;;  %v1669_v5 = vadd.f32 %v1660_v61, %v1390_v0 }
 0x2dc   :  { %v1621_v32 = vpop.f32.mrf.mxu0  ;;  %v1662_v35 = vpop.f32.mrf.mxu1 }
 0x2dd   :  { %v5535_v36 = vmul.f32 -1.442695, %v1667_v31  ;;  %v1668_v47 = vadd.f32 %v1621_v32, %v1389_v56  ;;  %v1670_v63 = vadd.f32 %v1662_v35, %v1391_v62  ;;  %v1700_v32 = vpop.permute.xlu0 %1699 }
 0x2de   :  { %v1623_v48 = vpop.f32.mrf.mxu0  ;;  %v1664_v51 = vpop.f32.mrf.mxu1  ;;  %vm1701_vm14 = vcmp.eq.s32.totalorder %v1700_v32, 1  ;;  %v7833_v32 = vld [vmem:[%s8824_s3 + $0x64] ss:$16 sps:$4 sm:$0xff]  }
 0x2df   :  { %6420 = vpow2.f32 %v5535_v36  ;;  %v5536_v52 = vmul.f32 -1.442695, %v1668_v47  ;;  %v5537_v2 = vmul.f32 -1.442695, %v1670_v63  ;;  %v5540_v36 = vld [vmem:[%s8828_s2 + $0xd8] sm:$0xff] }
 0x2e0   :  { %v1624_v53 = vpop.f32.mrf.mxu0  ;;  %v1665_v55 = vpop.f32.mrf.mxu1  ;;  %v1718_v47 = vunpack.c.h.bf16 %v5540_v36 }
 0x2e1   :  { %6422 = vpow2.f32 %v5536_v52  ;;  %v1717_v52 = vunpack.c.l.bf16 %v5540_v36  ;;  %v7843_v36 = vld [vmem:[%s8824_s3 + $0x60] ss:$16 sps:$4 sm:$0xff]  }
 0x2e2   :  { %6424 = vpow2.f32 %v5537_v2 }
 0x2ec   :  { %v6421_v3 = vpop.eup %6420 }
 0x2ed   :  { %v1674_v6 = vadd.f32 1.0, %v6421_v3 }
 0x2ee   :  { %v6423_v7 = vpop.eup %6422 }
 0x2ef   :  { %6426 = vrcp.f32 %v1674_v6  ;;  %v1680_v8 = vadd.f32 1.0, %v6423_v7  ;;  %v6425_v14 = vpop.eup %6424 }
 0x2f0   :  { %6428 = vtanh.f32 %v1669_v5  ;;  %v1687_v44 = vadd.f32 1.0, %v6425_v14  ;;  %v8926_v14 = vld [vmem:[#allocation17_spill] sm:$0xff] }
 0x2f1   :  { %6430 = vrcp.f32 %v1680_v8 }
 0x2fa   :  { %v1946_v12 = vpop.f32.mrf.mxu0  ;;  %v1987_v13 = vpop.f32.mrf.mxu1 }
 0x2fb   :  { %v1994_v15 = vadd.f32 %v1946_v12, %v1715_v10  ;;  %v1996_v60 = vadd.f32 %v1987_v13, %v1717_v52  ;;  %v8920_v10 = vld [vmem:[#allocation10_spill] sm:$0xff]  ;;  %v8925_v12 = vld [vmem:[#allocation16_spill] sm:$0xff]  ;;  %v7862_v52 = vld [vmem:[%s8824_s3 + $0x4c] ss:$16 sps:$4 sm:$0xff]  }
 0x2fc   :  { %v6427_v16 = vpop.eup %6426  ;;  %v1948_v17 = vpop.f32.mrf.mxu0 }
 0x2fd   :  { %v1989_v18 = vpop.f32.mrf.mxu1  ;;  %v6429_v28 = vpop.eup %6428  ;;  %v5573_v33 = vmul.f32 -1.442695, %v1994_v15  ;;  %v1995_v24 = vadd.f32 %v1948_v17, %v1716_v11 }
 0x2fe   :  { %v6431_v25 = vpop.eup %6430  ;;  %v1950_v43 = vpop.f32.mrf.mxu0  ;;  %v1691_v1 = vmul.f32 %v6429_v28, %v6427_v16  ;;  %v1997_v51 = vadd.f32 %v1989_v18, %v1718_v47  ;;  %v7761_v28 = vld [vmem:[%s8824_s3 + $0xc4] ss:$16 sps:$4 sm:$0xff]   ;;  %v7848_v47 = vld [vmem:[%s8824_s3 + $0x68] ss:$16 sps:$4 sm:$0xff]  }
 0x2ff   :  { %v1991_v30 = vpop.f32.mrf.mxu1  ;;  %v1690_v56 = vmul.f32 %v6431_v25, %v7412_v4  ;;  %6432 = vpow2.f32 %v5573_v33  ;;  %v5574_v58 = vmul.f32 -1.442695, %v1995_v24  ;;  %v7766_v33 = vld [vmem:[%s8824_s3 + $0xc0] ss:$16 sps:$4 sm:$0xff]   ;;  %v7771_v24 = vld [vmem:[%s8824_s3 + $0xc8] ss:$16 sps:$4 sm:$0xff]  }
 0x300   :  { %v1951_v61 = vpop.f32.mrf.mxu0  ;;  %v5575_v53 = vmul.f32 -1.442695, %v1997_v51  ;;  %v7776_v25 = vld [vmem:[%s8824_s3 + $0xcc] ss:$16 sps:$4 sm:$0xff]   ;;  %v7795_v30 = vld [vmem:[%s8824_s3 + $0xa0] ss:$16 sps:$4 sm:$0xff]  }
 0x301   :  { %v1992_v31 = vpop.f32.mrf.mxu1  ;;  %v1692_v35 = vadd.f32 %v1691_v1, %v1690_v56  ;;  %6434 = vpow2.f32 %v5574_v58  ;;  %v7790_v43 = vld [vmem:[%s8824_s3 + $0xac] ss:$16 sps:$4 sm:$0xff]   ;;  %v7800_v1 = vld [vmem:[%s8824_s3 + $0xa8] ss:$16 sps:$4 sm:$0xff]   ;;  %v7809_v56 = vld [vmem:[%s8824_s3 + $0x84] ss:$16 sps:$4 sm:$0xff]  }
 0x302   :  { %6436 = vrcp.f32 %v1687_v44  ;;  %v7785_v44 = vld [vmem:[%s8824_s3 + $0xa4] ss:$16 sps:$4 sm:$0xff]   ;;  %v7814_v58 = vld [vmem:[%s8824_s3 + $0x8c] ss:$16 sps:$4 sm:$0xff]   ;;  %v7819_v61 = vld [vmem:[%s8824_s3 + $0x80] ss:$16 sps:$4 sm:$0xff]  }
 0x303   :  { %6438 = vtanh.f32 %v1692_v35  ;;  %v7673_v48 = vsel %vm1701_vm14, %v1692_v35, %v7412_v4  ;;  %v7824_v31 = vld [vmem:[%s8824_s3 + $0x88] ss:$16 sps:$4 sm:$0xff]   ;;  %v7838_v35 = vld [vmem:[%s8824_s3 + $0x6c] ss:$16 sps:$4 sm:$0xff]   ;;  %v7857_v51 = vld [vmem:[%s8824_s3 + $0x44] ss:$16 sps:$4 sm:$0xff]  }
 0x304   :  { %6440 = vpow2.f32 %v5575_v53  ;;  %v7867_v53 = vld [vmem:[%s8824_s3 + $0x40] ss:$16 sps:$4 sm:$0xff]  }
 0x30c   :  { %v6433_v55 = vpop.eup %6432 }
 0x30d   :  { %v2001_v62 = vadd.f32 1.0, %v6433_v55  ;;  %v7872_v55 = vld [vmem:[%s8824_s3 + $0x48] ss:$16 sps:$4 sm:$0xff]  }
 0x30e   :  { %v6435_v63 = vpop.eup %6434 }
 0x30f   :  { %v6437_v0 = vpop.eup %6436  ;;  %6442 = vrcp.f32 %v2001_v62  ;;  %v2007_v2 = vadd.f32 1.0, %v6435_v63  ;;  %v7886_v62 = vld [vmem:[%s8824_s3 + $0x2c] ss:$16 sps:$4 sm:$0xff]   ;;  %v7891_v63 = vld [vmem:[%s8824_s3 + $0x20] ss:$16 sps:$4 sm:$0xff]  }
 0x310   :  { %v6439_v3 = vpop.eup %6438  ;;  %6444 = vtanh.f32 %v1996_v60  ;;  %v7881_v60 = vld [vmem:[%s8824_s3 + $0x24] ss:$16 sps:$4 sm:$0xff]  }
 0x311   :  { %6446 = vrcp.f32 %v2007_v2  ;;  %v1694_v5 = vmul.f32 %v6439_v3, %v6437_v0  ;;  %v7896_v0 = vld [vmem:[%s8824_s3 + $0x28] ss:$16 sps:$4 sm:$0xff]   ;;  %v7905_v2 = vld [vmem:[%s8824_s3 + $0x4] ss:$16 sps:$4 sm:$0xff]   ;;  %v7910_v3 = vld [vmem:[%s8824_s3 + $0xc] ss:$16 sps:$4 sm:$0xff]  }
 0x313   :  { %v7677_v6 = vsel %vm1701_vm14, %v1694_v5, %v7416_v54  ;;  %v1706_v4 = vsel %vm1701_vm14, %v1694_v5, 0.0  ;;  %v6441_v54 = vpop.eup %6440  ;;  %v7915_v5 = vld [vmem:[%s8824_s3] ss:$16 sps:$4 sm:$0xff]  }
 0x314   :  { %5538 = vst [vmem:[%s8829_s5 + $0x10] sm:$0xff] %v1706_v4  ;;  %v2046_v7 = vpack.c.bf16 %v7677_v6, %v7677_v6  ;;  %v2014_v9 = vadd.f32 1.0, %v6441_v54  ;;  %v7920_v4 = vld [vmem:[%s8824_s3 + $0x8] ss:$16 sps:$4 sm:$0xff]   ;;  %v7934_v54 = vld [vmem:[%s8825_s4 + $0xec] ss:$16 sps:$4 sm:$0xff]  }
 0x316   :  { %2272 = vmatmul.mubr.bf16.vlgmr.msra.gmra.mxu0 %v2046_v7  ;;  %2313 = vmatmul.mubr.bf16.vlgmr.msra.gmra.mxu1 %v2046_v7  ;;  %6448 = vrcp.f32 %v2014_v9  ;;  %v7929_v7 = vld [vmem:[%s8825_s4 + $0xe4] ss:$16 sps:$4 sm:$0xff]  }
 0x317   :  { %2567 = vmatpush1.bf16.msra.mxu0 %v7422_v41  ;;  %2608 = vmatpush1.bf16.msra.mxu1 %v7427_v50 }
 0x318   :  { %2568 = vmatprep.subr.bf16.mxu0 %v7437_v59  ;;  %2609 = vmatprep.subr.bf16.mxu1 %v7442_v29 }
 0x319   :  { %2598 = vmatprep.mubr.bf16.mxu0 %v8891_v57  ;;  %2639 = vmatprep.mubr.bf16.mxu1 %v8891_v57 }
 0x31b   :  { %2569 = vmatpush1.bf16.msra.mxu0 %v7449_v37  ;;  %2610 = vmatpush1.bf16.msra.mxu1 %v7454_v20  ;;  %v2027_v37 = vpop.permute.xlu1 %2026 }
 0x31c   :  { %v6443_v8 = vpop.eup %6442  ;;  %2570 = vmatprep.subr.bf16.mxu0 %v7461_v21  ;;  %2611 = vmatprep.subr.bf16.mxu1 %v7466_v23  ;;  %vm2028_vm15 = vcmp.eq.s32.totalorder %v2027_v37, 1  ;;  %v8915_v23 = vld [vmem:[#allocation6_spill] sm:$0xff] }
 0x31d   :  { %v6445_v41 = vpop.eup %6444 }
 0x31e   :  { %v6447_v50 = vpop.eup %6446  ;;  %v2018_v59 = vmul.f32 %v6445_v41, %v6443_v8  ;;  %v5577_v8 = vld [vmem:[%s8827_s1 + $0x30] sm:$0xff] }
 0x31f   :  { %v2017_v29 = vmul.f32 %v6447_v50, %v7534_v42  ;;  %2571 = vmatpush1.bf16.msra.mxu0 %v7475_v40  ;;  %2612 = vmatpush1.bf16.msra.mxu1 %v7480_v19  ;;  %v8916_v40 = vld [vmem:[#allocation9_spill] sm:$0xff]  ;;  %v8917_v19 = vld [vmem:[#allocation7_spill] sm:$0xff]  ;;  %v2042_v41 = vunpack.c.l.bf16 %v5577_v8  ;;  %v2043_v50 = vunpack.c.h.bf16 %v5577_v8  ;;  %v5615_v8 = vld [vmem:[%s8828_s2 + $0xc0] sm:$0xff] }
 0x320   :  { %2572 = vmatprep.subr.bf16.mxu0 %v7487_v34  ;;  %2613 = vmatprep.subr.bf16.mxu1 %v7492_v39  ;;  %v8918_v34 = vld [vmem:[#allocation8_spill] sm:$0xff] }
 0x321   :  { %v2019_v20 = vadd.f32 %v2018_v59, %v2017_v29  ;;  %v8919_v39 = vld [vmem:[#allocation12_spill] sm:$0xff] }
 0x323   :  { %6450 = vtanh.f32 %v2019_v20  ;;  %2573 = vmatpush1.bf16.msra.mxu0 %v7502_v26  ;;  %2614 = vmatpush1.bf16.msra.mxu1 %v7507_v27  ;;  %v7704_v21 = vsel %vm2028_vm15, %v2019_v20, %v7534_v42  ;;  %v8921_v26 = vld [vmem:[#allocation11_spill] sm:$0xff]  ;;  %v8923_v42 = vld [vmem:[#allocation13_spill] sm:$0xff]  ;;  %v6449_v11 = vpop.eup %6448 }
 0x324   :  { %2574 = vmatprep.subr.bf16.mxu0 %v7514_v38  ;;  %2615 = vmatprep.subr.bf16.mxu1 %v8915_v23  ;;  %v8922_v27 = vld [vmem:[#allocation15_spill] sm:$0xff]  ;;  %v8924_v38 = vld [vmem:[#allocation14_spill] sm:$0xff] }
 0x327   :  { %2575 = vmatpush1.bf16.msra.mxu0 %v8916_v40  ;;  %2616 = vmatpush1.bf16.msra.mxu1 %v8917_v19 }
 0x328   :  { %2576 = vmatprep.subr.bf16.mxu0 %v8918_v34  ;;  %2617 = vmatprep.subr.bf16.mxu1 %v8919_v39 }
 0x32b   :  { %2577 = vmatpush1.bf16.msra.mxu0 %v8920_v10  ;;  %2618 = vmatpush1.bf16.msra.mxu1 %v8921_v26 }
 0x32c   :  { %2578 = vmatprep.subr.bf16.mxu0 %v8922_v27  ;;  %2619 = vmatprep.subr.bf16.mxu1 %v8923_v42  ;;  %v5578_v27 = vld [vmem:[%s8827_s1 + $0x38] sm:$0xff] }
 0x32d   :  { %v2045_v42 = vunpack.c.h.bf16 %v5578_v27 }
 0x32f   :  { %2579 = vmatpush1.bf16.msra.mxu0 %v8924_v38  ;;  %2620 = vmatpush1.bf16.msra.mxu1 %v8925_v12  ;;  %v2044_v38 = vunpack.c.l.bf16 %v5578_v27 }
 0x330   :  { %v6451_v13 = vpop.eup %6450  ;;  %2580 = vmatprep.subr.bf16.mxu0 %v8926_v14  ;;  %2621 = vmatprep.subr.bf16.mxu1 %v7594_v49  ;;  %v7742_v49 = vld [vmem:[%s8824_s3 + $0xec] ss:$16 sps:$4 sm:$0xff]  }
 0x331   :  { %v2021_v15 = vmul.f32 %v6451_v13, %v6449_v11 }
 0x333   :  { %2581 = vmatpush1.bf16.msra.mxu0 %v7601_v46  ;;  %2622 = vmatpush1.bf16.msra.mxu1 %v7606_v22  ;;  %v7724_v16 = vsel %vm2028_vm15, %v2021_v15, %v7614_v45  ;;  %v2033_v17 = vsel %vm2028_vm15, %v2021_v15, 0.0  ;;  %v7737_v45 = vld [vmem:[%s8824_s3 + $0xe4] ss:$16 sps:$4 sm:$0xff]   ;;  %v7747_v46 = vld [vmem:[%s8824_s3 + $0xe0] ss:$16 sps:$4 sm:$0xff]  }
 0x334   :  { %5576 = vst [vmem:[%s8830_s6 + $0x28] sm:$0xff] %v2033_v17  ;;  %v2373_v18 = vpack.c.bf16 %v7724_v16, %v7724_v16  ;;  %v7752_v22 = vld [vmem:[%s8824_s3 + $0xe8] ss:$16 sps:$4 sm:$0xff]   ;;  %2893 = vmatprep.subr.bf16.mxu0 %v7737_v45  ;;  %2934 = vmatprep.subr.bf16.mxu1 %v7742_v49 }
 0x336   :  { %2599 = vmatmul.mubr.bf16.vlgmr.msra.gmra.mxu0 %v2373_v18  ;;  %2640 = vmatmul.mubr.bf16.vlgmr.msra.gmra.mxu1 %v2373_v18 }
 0x337   :  { %2925 = vmatprep.mubr.bf16.mxu0 %v8891_v57  ;;  %2966 = vmatprep.mubr.bf16.mxu1 %v8891_v57 }
 0x338   :  { %2894 = vmatpush1.bf16.msra.mxu0 %v7747_v46  ;;  %2935 = vmatpush1.bf16.msra.mxu1 %v7752_v22 }
 0x339   :  { %2895 = vmatprep.subr.bf16.mxu0 %v7761_v28  ;;  %2936 = vmatprep.subr.bf16.mxu1 %v7776_v25 }
 0x33c   :  { %2896 = vmatpush1.bf16.msra.mxu0 %v7766_v33  ;;  %2937 = vmatpush1.bf16.msra.mxu1 %v7771_v24 }
 0x33d   :  { %2897 = vmatprep.subr.bf16.mxu0 %v7785_v44  ;;  %2938 = vmatprep.subr.bf16.mxu1 %v7790_v43 }
 0x340   :  { %2898 = vmatpush1.bf16.msra.mxu0 %v7795_v30  ;;  %2939 = vmatpush1.bf16.msra.mxu1 %v7800_v1 }
 0x341   :  { %2899 = vmatprep.subr.bf16.mxu0 %v7809_v56  ;;  %2940 = vmatprep.subr.bf16.mxu1 %v7814_v58 }
 0x344   :  { %2900 = vmatpush1.bf16.msra.mxu0 %v7819_v61  ;;  %2941 = vmatpush1.bf16.msra.mxu1 %v7824_v31 }
 0x345   :  { %2901 = vmatprep.subr.bf16.mxu0 %v7833_v32  ;;  %2942 = vmatprep.subr.bf16.mxu1 %v7838_v35 }
 0x348   :  { %2902 = vmatpush1.bf16.msra.mxu0 %v7843_v36  ;;  %2943 = vmatpush1.bf16.msra.mxu1 %v7848_v47 }
 0x349   :  { %2903 = vmatprep.subr.bf16.mxu0 %v7857_v51  ;;  %2944 = vmatprep.subr.bf16.mxu1 %v7862_v52 }
 0x34c   :  { %2904 = vmatpush1.bf16.msra.mxu0 %v7867_v53  ;;  %2945 = vmatpush1.bf16.msra.mxu1 %v7872_v55 }
 0x34d   :  { %2905 = vmatprep.subr.bf16.mxu0 %v7881_v60  ;;  %2946 = vmatprep.subr.bf16.mxu1 %v7886_v62 }
 0x350   :  { %2906 = vmatpush1.bf16.msra.mxu0 %v7891_v63  ;;  %2947 = vmatpush1.bf16.msra.mxu1 %v7896_v0 }
 0x351   :  { %2907 = vmatprep.subr.bf16.mxu0 %v7905_v2  ;;  %2948 = vmatprep.subr.bf16.mxu1 %v7910_v3 }
 0x354   :  { %2908 = vmatpush1.bf16.msra.mxu0 %v7915_v5  ;;  %2949 = vmatpush1.bf16.msra.mxu1 %v7920_v4 }
 0x355   :  { %3220 = vmatprep.subr.bf16.mxu0 %v7929_v7  ;;  %3261 = vmatprep.subr.bf16.mxu1 %v7934_v54 }
 0x3d6   :  { %v2273_v9 = vpop.f32.mrf.mxu0  ;;  %v2314_v59 = vpop.f32.mrf.mxu1 }
 0x3d7   :  { %v2321_v29 = vadd.f32 %v2273_v9, %v2042_v41  ;;  %v2323_v14 = vadd.f32 %v2314_v59, %v2044_v38  ;;  %v2369_v41 = vunpack.c.l.bf16 %v5615_v8 }
 0x3d8   :  { %v2275_v37 = vpop.f32.mrf.mxu0  ;;  %v2316_v20 = vpop.f32.mrf.mxu1 }
 0x3d9   :  { %v5611_v23 = vmul.f32 -1.442695, %v2321_v29  ;;  %v2322_v40 = vadd.f32 %v2275_v37, %v2043_v50  ;;  %v2324_v11 = vadd.f32 %v2316_v20, %v2045_v42  ;;  %v2370_v50 = vunpack.c.h.bf16 %v5615_v8 }
 0x3da   :  { %v2277_v19 = vpop.f32.mrf.mxu0  ;;  %v2318_v34 = vpop.f32.mrf.mxu1 }
 0x3db   :  { %6452 = vpow2.f32 %v5611_v23  ;;  %v5612_v39 = vmul.f32 -1.442695, %v2322_v40  ;;  %v5613_v12 = vmul.f32 -1.442695, %v2324_v11 }
 0x3dc   :  { %v2278_v10 = vpop.f32.mrf.mxu0  ;;  %v2319_v26 = vpop.f32.mrf.mxu1 }
 0x3dd   :  { %6454 = vpow2.f32 %v5612_v39 }
 0x3de   :  { %6456 = vpow2.f32 %v5613_v12 }
 0x3e8   :  { %v6453_v13 = vpop.eup %6452 }
 0x3e9   :  { %v2328_v15 = vadd.f32 1.0, %v6453_v13 }
 0x3ea   :  { %v6455_v17 = vpop.eup %6454 }
 0x3eb   :  { %6458 = vrcp.f32 %v2328_v15  ;;  %v2334_v18 = vadd.f32 1.0, %v6455_v17  ;;  %v6457_v37 = vpop.eup %6456  ;;  %v2354_v15 = vpop.permute.xlu0 %2353 }
 0x3ec   :  { %6460 = vtanh.f32 %v2323_v14  ;;  %v2341_v26 = vadd.f32 1.0, %v6457_v37  ;;  %vm2355_vm0 = vcmp.eq.s32.totalorder %v2354_v15, 1 }
 0x3ed   :  { %6462 = vrcp.f32 %v2334_v18  ;;  %v5616_v18 = vld [vmem:[%s8828_s2 + $0xc8] sm:$0xff] }
 0x3ee   :  { %v2372_v8 = vunpack.c.h.bf16 %v5616_v18 }
 0x3f6   :  { %v2600_v9 = vpop.f32.mrf.mxu0  ;;  %v2641_v29 = vpop.f32.mrf.mxu1 }
 0x3f7   :  { %v2648_v20 = vadd.f32 %v2600_v9, %v2369_v41  ;;  %v2371_v9 = vunpack.c.l.bf16 %v5616_v18  ;;  %v8021_v18 = vld [vmem:[%s8825_s4 + $0xa8] ss:$16 sps:$4 sm:$0xff]  }
 0x3f8   :  { %v6459_v23 = vpop.eup %6458  ;;  %v2602_v40 = vpop.f32.mrf.mxu0 }
 0x3f9   :  { %v2643_v59 = vpop.f32.mrf.mxu1  ;;  %v6461_v19 = vpop.eup %6460  ;;  %v5649_v34 = vmul.f32 -1.442695, %v2648_v20  ;;  %v2649_v39 = vadd.f32 %v2602_v40, %v2370_v50 }
 0x3fa   :  { %v6463_v10 = vpop.eup %6462  ;;  %v2604_v27 = vpop.f32.mrf.mxu0  ;;  %v2345_v11 = vmul.f32 %v6461_v19, %v6459_v23  ;;  %v2651_v50 = vadd.f32 %v2643_v59, %v2372_v8  ;;  %v2650_v23 = vadd.f32 %v2641_v29, %v2371_v9  ;;  %v7963_v29 = vld [vmem:[%s8825_s4 + $0xe0] ss:$16 sps:$4 sm:$0xff]   ;;  %v7968_v59 = vld [vmem:[%s8825_s4 + $0xe8] ss:$16 sps:$4 sm:$0xff]   ;;  %v8033_v9 = vld [vmem:[%s8825_s4 + $0x8c] ss:$16 sps:$4 sm:$0xff]  }
 0x3fb   :  { %v2645_v42 = vpop.f32.mrf.mxu1  ;;  %v2344_v38 = vmul.f32 %v6463_v10, %v7673_v48  ;;  %6464 = vpow2.f32 %v5649_v34  ;;  %v5650_v12 = vmul.f32 -1.442695, %v2649_v39 }
 0x3fc   :  { %v2605_v13 = vpop.f32.mrf.mxu0  ;;  %v5651_v37 = vmul.f32 -1.442695, %v2651_v50  ;;  %v7978_v42 = vld [vmem:[%s8825_s4 + $0xc4] ss:$16 sps:$4 sm:$0xff]  }
 0x3fd   :  { %v2646_v14 = vpop.f32.mrf.mxu1  ;;  %v2346_v17 = vadd.f32 %v2345_v11, %v2344_v38  ;;  %6466 = vpow2.f32 %v5650_v12  ;;  %v7983_v11 = vld [vmem:[%s8825_s4 + $0xcc] ss:$16 sps:$4 sm:$0xff]   ;;  %v7990_v38 = vld [vmem:[%s8825_s4 + $0xc0] ss:$16 sps:$4 sm:$0xff]   ;;  %v7995_v12 = vld [vmem:[%s8825_s4 + $0xc8] ss:$16 sps:$4 sm:$0xff]  }
 0x3fe   :  { %6468 = vrcp.f32 %v2341_v26  ;;  %v8002_v13 = vld [vmem:[%s8825_s4 + $0xa4] ss:$16 sps:$4 sm:$0xff]   ;;  %v8007_v14 = vld [vmem:[%s8825_s4 + $0xac] ss:$16 sps:$4 sm:$0xff]  }
 0x3ff   :  { %6470 = vtanh.f32 %v2346_v17  ;;  %v7953_v41 = vsel %vm2355_vm0, %v2346_v17, %v7673_v48  ;;  %v8016_v17 = vld [vmem:[%s8825_s4 + $0xa0] ss:$16 sps:$4 sm:$0xff]   ;;  %v8028_v50 = vld [vmem:[%s8825_s4 + $0x84] ss:$16 sps:$4 sm:$0xff]  }
 0x400   :  { %6472 = vpow2.f32 %v5651_v37 }
 0x408   :  { %v6465_v20 = vpop.eup %6464 }
 0x409   :  { %v2655_v40 = vadd.f32 1.0, %v6465_v20 }
 0x40a   :  { %v6467_v19 = vpop.eup %6466 }
 0x40b   :  { %v6469_v34 = vpop.eup %6468  ;;  %6474 = vrcp.f32 %v2655_v40  ;;  %v2661_v39 = vadd.f32 1.0, %v6467_v19 }
 0x40c   :  { %v6471_v10 = vpop.eup %6470  ;;  %6476 = vtanh.f32 %v2650_v23 }
 0x40d   :  { %6478 = vrcp.f32 %v2661_v39  ;;  %v2348_v26 = vmul.f32 %v6471_v10, %v6469_v34  ;;  %v6473_v15 = vpop.eup %6472  ;;  %v8041_v34 = vld [vmem:[%s8825_s4 + $0x80] ss:$16 sps:$4 sm:$0xff]   ;;  %v8046_v39 = vld [vmem:[%s8825_s4 + $0x88] ss:$16 sps:$4 sm:$0xff]   ;;  %v8053_v10 = vld [vmem:[%s8825_s4 + $0x64] ss:$16 sps:$4 sm:$0xff]  }
 0x40e   :  { %v2668_v23 = vadd.f32 1.0, %v6473_v15  ;;  %v8065_v15 = vld [vmem:[%s8825_s4 + $0x60] ss:$16 sps:$4 sm:$0xff]  }
 0x40f   :  { %v7957_v27 = vsel %vm2355_vm0, %v2348_v26, %v7677_v6  ;;  %v2360_v48 = vsel %vm2355_vm0, %v2348_v26, 0.0  ;;  %v8058_v26 = vld [vmem:[%s8825_s4 + $0x6c] ss:$16 sps:$4 sm:$0xff]   ;;  %8928 = vst [vmem:[#allocation9_spill] sm:$0xff] %v8065_v15 }
 0x410   :  { %5614 = vst [vmem:[%s8829_s5 + $0x18] sm:$0xff] %v2360_v48  ;;  %v2700_v6 = vpack.c.bf16 %v7957_v27, %v7957_v27  ;;  %8927 = vst [vmem:[#allocation6_spill] sm:$0xff] %v8058_v26  ;;  %v2681_v48 = vpop.permute.xlu1 %2680  ;;  %6480 = vrcp.f32 %v2668_v23  ;;  %v8086_v23 = vld [vmem:[%s8825_s4 + $0x4c] ss:$16 sps:$4 sm:$0xff]  }
 0x411   :  { %vm2682_vm1 = vcmp.eq.s32.totalorder %v2681_v48, 1  ;;  %8931 = vst [vmem:[#allocation12_spill] sm:$0xff] %v8086_v23 }
 0x412   :  { %2926 = vmatmul.mubr.bf16.vlgmr.msra.gmra.mxu0 %v2700_v6  ;;  %2967 = vmatmul.mubr.bf16.vlgmr.msra.gmra.mxu1 %v2700_v6 }
 0x413   :  { %3221 = vmatpush1.bf16.msra.mxu0 %v7963_v29  ;;  %3262 = vmatpush1.bf16.msra.mxu1 %v7968_v59 }
 0x414   :  { %3222 = vmatprep.subr.bf16.mxu0 %v7978_v42  ;;  %3263 = vmatprep.subr.bf16.mxu1 %v7983_v11 }
 0x415   :  { %3252 = vmatprep.mubr.bf16.mxu0 %v8891_v57  ;;  %3293 = vmatprep.mubr.bf16.mxu1 %v8891_v57 }
 0x417   :  { %3223 = vmatpush1.bf16.msra.mxu0 %v7990_v38  ;;  %3264 = vmatpush1.bf16.msra.mxu1 %v7995_v12 }
 0x418   :  { %v6475_v8 = vpop.eup %6474  ;;  %3224 = vmatprep.subr.bf16.mxu0 %v8002_v13  ;;  %3265 = vmatprep.subr.bf16.mxu1 %v8007_v14 }
 0x419   :  { %v6477_v37 = vpop.eup %6476 }
 0x41a   :  { %v6479_v20 = vpop.eup %6478  ;;  %v2672_v40 = vmul.f32 %v6477_v37, %v6475_v8  ;;  %v8070_v8 = vld [vmem:[%s8825_s4 + $0x68] ss:$16 sps:$4 sm:$0xff]  }
 0x41b   :  { %v2671_v19 = vmul.f32 %v6479_v20, %v7704_v21  ;;  %3225 = vmatpush1.bf16.msra.mxu0 %v8016_v17  ;;  %3266 = vmatpush1.bf16.msra.mxu1 %v8021_v18  ;;  %8929 = vst [vmem:[#allocation7_spill] sm:$0xff] %v8070_v8  ;;  %v8081_v20 = vld [vmem:[%s8825_s4 + $0x44] ss:$16 sps:$4 sm:$0xff]  }
 0x41c   :  { %3226 = vmatprep.subr.bf16.mxu0 %v8028_v50  ;;  %3267 = vmatprep.subr.bf16.mxu1 %v8033_v9  ;;  %8930 = vst [vmem:[#allocation8_spill] sm:$0xff] %v8081_v20 }
 0x41d   :  { %v2673_v6 = vadd.f32 %v2672_v40, %v2671_v19  ;;  %v8098_v40 = vld [vmem:[%s8825_s4 + $0x48] ss:$16 sps:$4 sm:$0xff]   ;;  %v8105_v19 = vld [vmem:[%s8825_s4 + $0x24] ss:$16 sps:$4 sm:$0xff]  }
 0x41e   :  { %8933 = vst [vmem:[#allocation11_spill] sm:$0xff] %v8098_v40  ;;  %8934 = vst [vmem:[#allocation15_spill] sm:$0xff] %v8105_v19 }
 0x41f   :  { %6482 = vtanh.f32 %v2673_v6  ;;  %3227 = vmatpush1.bf16.msra.mxu0 %v8041_v34  ;;  %3268 = vmatpush1.bf16.msra.mxu1 %v8046_v39  ;;  %v8074_v37 = vsel %vm2682_vm1, %v2673_v6, %v7704_v21  ;;  %v8093_v21 = vld [vmem:[%s8825_s4 + $0x40] ss:$16 sps:$4 sm:$0xff]   ;;  %v8110_v6 = vld [vmem:[%s8825_s4 + $0x2c] ss:$16 sps:$4 sm:$0xff]  }
 0x420   :  { %3228 = vmatprep.subr.bf16.mxu0 %v8053_v10  ;;  %3269 = vmatprep.subr.bf16.mxu1 %v8058_v26  ;;  %8932 = vst [vmem:[#allocation10_spill] sm:$0xff] %v8093_v21  ;;  %8935 = vst [vmem:[#allocation13_spill] sm:$0xff] %v8110_v6 }
 0x423   :  { %3229 = vmatpush1.bf16.msra.mxu0 %v8065_v15  ;;  %3270 = vmatpush1.bf16.msra.mxu1 %v8070_v8  ;;  %v6481_v8 = vpop.eup %6480 }
 0x424   :  { %3230 = vmatprep.subr.bf16.mxu0 %v8081_v20  ;;  %3271 = vmatprep.subr.bf16.mxu1 %v8086_v23  ;;  %v8117_v20 = vld [vmem:[%s8825_s4 + $0x20] ss:$16 sps:$4 sm:$0xff]   ;;  %v8122_v23 = vld [vmem:[%s8825_s4 + $0x28] ss:$16 sps:$4 sm:$0xff]  }
 0x425   :  { %8936 = vst [vmem:[#allocation14_spill] sm:$0xff] %v8117_v20  ;;  %8937 = vst [vmem:[#allocation16_spill] sm:$0xff] %v8122_v23 }
 0x427   :  { %3231 = vmatpush1.bf16.msra.mxu0 %v8093_v21  ;;  %3272 = vmatpush1.bf16.msra.mxu1 %v8098_v40  ;;  %v8129_v21 = vld [vmem:[%s8825_s4 + $0x4] ss:$16 sps:$4 sm:$0xff]   ;;  %v8134_v40 = vld [vmem:[%s8825_s4 + $0xc] ss:$16 sps:$4 sm:$0xff]  }
 0x428   :  { %3232 = vmatprep.subr.bf16.mxu0 %v8105_v19  ;;  %3273 = vmatprep.subr.bf16.mxu1 %v8110_v6  ;;  %8938 = vst [vmem:[#allocation17_spill] sm:$0xff] %v8129_v21  ;;  %v8141_v19 = vld [vmem:[%s8825_s4] ss:$16 sps:$4 sm:$0xff]   ;;  %v8146_v6 = vld [vmem:[%s8825_s4 + $0x8] ss:$16 sps:$4 sm:$0xff]  }
 0x42b   :  { %3233 = vmatpush1.bf16.msra.mxu0 %v8117_v20  ;;  %3274 = vmatpush1.bf16.msra.mxu1 %v8122_v23 }
 0x42c   :  { %v6483_v15 = vpop.eup %6482  ;;  %3234 = vmatprep.subr.bf16.mxu0 %v8129_v21  ;;  %3275 = vmatprep.subr.bf16.mxu1 %v8134_v40 }
 0x42d   :  { %v2675_v26 = vmul.f32 %v6483_v15, %v6481_v8 }
 0x42f   :  { %3235 = vmatpush1.bf16.msra.mxu0 %v8141_v19  ;;  %3276 = vmatpush1.bf16.msra.mxu1 %v8146_v6  ;;  %v8154_v23 = vsel %vm2682_vm1, %v2675_v26, %v7724_v16  ;;  %v2687_v20 = vsel %vm2682_vm1, %v2675_v26, 0.0  ;;  %v5653_v16 = vld [vmem:[%s8827_s1 + $0x40] sm:$0xff] }
 0x430   :  { %5652 = vst [vmem:[%s8830_s6 + $0x20] sm:$0xff] %v2687_v20  ;;  %v3027_v21 = vpack.c.bf16 %v8154_v23, %v8154_v23  ;;  %3547 = vmatprep.subr.bf16.mxu0 %v7737_v45  ;;  %3588 = vmatprep.subr.bf16.mxu1 %v7742_v49  ;;  %v2696_v45 = vunpack.c.l.bf16 %v5653_v16  ;;  %v2697_v49 = vunpack.c.h.bf16 %v5653_v16 }
 0x432   :  { %3253 = vmatmul.mubr.bf16.vlgmr.msra.gmra.mxu0 %v3027_v21  ;;  %3294 = vmatmul.mubr.bf16.vlgmr.msra.gmra.mxu1 %v3027_v21 }
 0x433   :  { %3548 = vmatpush1.bf16.msra.mxu0 %v7747_v46  ;;  %3589 = vmatpush1.bf16.msra.mxu1 %v7752_v22 }
 0x434   :  { %3549 = vmatprep.subr.bf16.mxu0 %v7761_v28  ;;  %3590 = vmatprep.subr.bf16.mxu1 %v7776_v25 }
 0x435   :  { %3579 = vmatprep.mubr.bf16.mxu0 %v8891_v57  ;;  %3620 = vmatprep.mubr.bf16.mxu1 %v8891_v57 }
 0x437   :  { %3550 = vmatpush1.bf16.msra.mxu0 %v7766_v33  ;;  %3591 = vmatpush1.bf16.msra.mxu1 %v7771_v24 }
 0x438   :  { %3551 = vmatprep.subr.bf16.mxu0 %v7785_v44  ;;  %3592 = vmatprep.subr.bf16.mxu1 %v7790_v43 }
 0x43b   :  { %3552 = vmatpush1.bf16.msra.mxu0 %v7795_v30  ;;  %3593 = vmatpush1.bf16.msra.mxu1 %v7800_v1 }
 0x43c   :  { %3553 = vmatprep.subr.bf16.mxu0 %v7809_v56  ;;  %3594 = vmatprep.subr.bf16.mxu1 %v7814_v58 }
 0x43f   :  { %3554 = vmatpush1.bf16.msra.mxu0 %v7819_v61  ;;  %3595 = vmatpush1.bf16.msra.mxu1 %v7824_v31  ;;  %v5654_v61 = vld [vmem:[%s8827_s1 + $0x48] sm:$0xff] }
 0x440   :  { %3555 = vmatprep.subr.bf16.mxu0 %v7833_v32  ;;  %3596 = vmatprep.subr.bf16.mxu1 %v7838_v35  ;;  %v2699_v31 = vunpack.c.h.bf16 %v5654_v61  ;;  %v2698_v35 = vunpack.c.l.bf16 %v5654_v61 }
 0x443   :  { %3556 = vmatpush1.bf16.msra.mxu0 %v7843_v36  ;;  %3597 = vmatpush1.bf16.msra.mxu1 %v7848_v47 }
 0x444   :  { %3557 = vmatprep.subr.bf16.mxu0 %v7857_v51  ;;  %3598 = vmatprep.subr.bf16.mxu1 %v7862_v52 }
 0x447   :  { %3558 = vmatpush1.bf16.msra.mxu0 %v7867_v53  ;;  %3599 = vmatpush1.bf16.msra.mxu1 %v7872_v55 }
 0x448   :  { %3559 = vmatprep.subr.bf16.mxu0 %v7881_v60  ;;  %3600 = vmatprep.subr.bf16.mxu1 %v7886_v62  ;;  %v5691_v60 = vld [vmem:[%s8828_s2 + $0xb0] sm:$0xff] }
 0x449   :  { %v3023_v62 = vunpack.c.l.bf16 %v5691_v60 }
 0x44b   :  { %3560 = vmatpush1.bf16.msra.mxu0 %v7891_v63  ;;  %3601 = vmatpush1.bf16.msra.mxu1 %v7896_v0  ;;  %v3024_v63 = vunpack.c.h.bf16 %v5691_v60 }
 0x44c   :  { %3561 = vmatprep.subr.bf16.mxu0 %v7905_v2  ;;  %3602 = vmatprep.subr.bf16.mxu1 %v7910_v3 }
 0x44f   :  { %3562 = vmatpush1.bf16.msra.mxu0 %v7915_v5  ;;  %3603 = vmatpush1.bf16.msra.mxu1 %v7920_v4 }
 0x450   :  { %3874 = vmatprep.subr.bf16.mxu0 %v7929_v7  ;;  %3915 = vmatprep.subr.bf16.mxu1 %v7934_v54 }
 0x4d2   :  { %v2927_v46 = vpop.f32.mrf.mxu0  ;;  %v2968_v22 = vpop.f32.mrf.mxu1 }
 0x4d3   :  { %v2975_v28 = vadd.f32 %v2927_v46, %v2696_v45  ;;  %v2977_v51 = vadd.f32 %v2968_v22, %v2698_v35 }
 0x4d4   :  { %v2929_v33 = vpop.f32.mrf.mxu0  ;;  %v2970_v24 = vpop.f32.mrf.mxu1 }
 0x4d5   :  { %v5687_v25 = vmul.f32 -1.442695, %v2975_v28  ;;  %v2976_v44 = vadd.f32 %v2929_v33, %v2697_v49  ;;  %v2978_v32 = vadd.f32 %v2970_v24, %v2699_v31  ;;  %v3008_v33 = vpop.permute.xlu0 %3007 }
 0x4d6   :  { %v2931_v43 = vpop.f32.mrf.mxu0  ;;  %v2972_v30 = vpop.f32.mrf.mxu1  ;;  %vm3009_vm2 = vcmp.eq.s32.totalorder %v3008_v33, 1  ;;  %v8373_v33 = vld [vmem:[%s8824_s3 + $0x64] ss:$16 sps:$4 sm:$0xff]  }
 0x4d7   :  { %6484 = vpow2.f32 %v5687_v25  ;;  %v5688_v1 = vmul.f32 -1.442695, %v2976_v44  ;;  %v5689_v36 = vmul.f32 -1.442695, %v2978_v32  ;;  %v5692_v25 = vld [vmem:[%s8828_s2 + $0xb8] sm:$0xff] }
 0x4d8   :  { %v2932_v56 = vpop.f32.mrf.mxu0  ;;  %v2973_v58 = vpop.f32.mrf.mxu1  ;;  %v3026_v44 = vunpack.c.h.bf16 %v5692_v25 }
 0x4d9   :  { %6486 = vpow2.f32 %v5688_v1  ;;  %v3025_v1 = vunpack.c.l.bf16 %v5692_v25  ;;  %v8383_v25 = vld [vmem:[%s8824_s3 + $0x60] ss:$16 sps:$4 sm:$0xff]  }
 0x4da   :  { %6488 = vpow2.f32 %v5689_v36 }
 0x4e4   :  { %v6485_v47 = vpop.eup %6484 }
 0x4e5   :  { %v2982_v52 = vadd.f32 1.0, %v6485_v47 }
 0x4e6   :  { %v6487_v53 = vpop.eup %6486 }
 0x4e7   :  { %6490 = vrcp.f32 %v2982_v52  ;;  %v2988_v55 = vadd.f32 1.0, %v6487_v53  ;;  %v6489_v3 = vpop.eup %6488 }
 0x4e8   :  { %6492 = vtanh.f32 %v2977_v51  ;;  %v2995_v20 = vadd.f32 1.0, %v6489_v3  ;;  %v8950_v3 = vld [vmem:[#allocation17_spill] sm:$0xff] }
 0x4e9   :  { %6494 = vrcp.f32 %v2988_v55 }
 0x4f2   :  { %v3254_v0 = vpop.f32.mrf.mxu0  ;;  %v3295_v2 = vpop.f32.mrf.mxu1 }
 0x4f3   :  { %v3302_v5 = vadd.f32 %v3254_v0, %v3023_v62  ;;  %v3304_v61 = vadd.f32 %v3295_v2, %v3025_v1  ;;  %v8944_v62 = vld [vmem:[#allocation10_spill] sm:$0xff]  ;;  %v8949_v0 = vld [vmem:[#allocation16_spill] sm:$0xff]  ;;  %v8402_v1 = vld [vmem:[%s8824_s3 + $0x4c] ss:$16 sps:$4 sm:$0xff]  }
 0x4f4   :  { %v6491_v4 = vpop.eup %6490  ;;  %v3256_v7 = vpop.f32.mrf.mxu0 }
 0x4f5   :  { %v3297_v54 = vpop.f32.mrf.mxu1  ;;  %v6493_v26 = vpop.eup %6492  ;;  %v5725_v48 = vmul.f32 -1.442695, %v3302_v5  ;;  %v3303_v15 = vadd.f32 %v3256_v7, %v3024_v63 }
 0x4f6   :  { %v6495_v8 = vpop.eup %6494  ;;  %v3258_v21 = vpop.f32.mrf.mxu0  ;;  %v2999_v45 = vmul.f32 %v6493_v26, %v6491_v4  ;;  %v3305_v30 = vadd.f32 %v3297_v54, %v3026_v44  ;;  %v8301_v26 = vld [vmem:[%s8824_s3 + $0xc4] ss:$16 sps:$4 sm:$0xff]   ;;  %v8388_v44 = vld [vmem:[%s8824_s3 + $0x68] ss:$16 sps:$4 sm:$0xff]  }
 0x4f7   :  { %v3299_v16 = vpop.f32.mrf.mxu1  ;;  %v2998_v49 = vmul.f32 %v6495_v8, %v7953_v41  ;;  %6496 = vpow2.f32 %v5725_v48  ;;  %v5726_v46 = vmul.f32 -1.442695, %v3303_v15  ;;  %v8306_v48 = vld [vmem:[%s8824_s3 + $0xc0] ss:$16 sps:$4 sm:$0xff]   ;;  %v8311_v15 = vld [vmem:[%s8824_s3 + $0xc8] ss:$16 sps:$4 sm:$0xff]  }
 0x4f8   :  { %v3259_v22 = vpop.f32.mrf.mxu0  ;;  %v5727_v56 = vmul.f32 -1.442695, %v3305_v30  ;;  %v8316_v8 = vld [vmem:[%s8824_s3 + $0xcc] ss:$16 sps:$4 sm:$0xff]   ;;  %v8335_v16 = vld [vmem:[%s8824_s3 + $0xa0] ss:$16 sps:$4 sm:$0xff]  }
 0x4f9   :  { %v3300_v28 = vpop.f32.mrf.mxu1  ;;  %v3000_v24 = vadd.f32 %v2999_v45, %v2998_v49  ;;  %6498 = vpow2.f32 %v5726_v46  ;;  %v8330_v21 = vld [vmem:[%s8824_s3 + $0xac] ss:$16 sps:$4 sm:$0xff]   ;;  %v8340_v45 = vld [vmem:[%s8824_s3 + $0xa8] ss:$16 sps:$4 sm:$0xff]   ;;  %v8349_v49 = vld [vmem:[%s8824_s3 + $0x84] ss:$16 sps:$4 sm:$0xff]  }
 0x4fa   :  { %6500 = vrcp.f32 %v2995_v20  ;;  %v8325_v20 = vld [vmem:[%s8824_s3 + $0xa4] ss:$16 sps:$4 sm:$0xff]   ;;  %v8354_v46 = vld [vmem:[%s8824_s3 + $0x8c] ss:$16 sps:$4 sm:$0xff]   ;;  %v8359_v22 = vld [vmem:[%s8824_s3 + $0x80] ss:$16 sps:$4 sm:$0xff]  }
 0x4fb   :  { %6502 = vtanh.f32 %v3000_v24  ;;  %v8213_v43 = vsel %vm3009_vm2, %v3000_v24, %v7953_v41  ;;  %v8364_v28 = vld [vmem:[%s8824_s3 + $0x88] ss:$16 sps:$4 sm:$0xff]   ;;  %v8378_v24 = vld [vmem:[%s8824_s3 + $0x6c] ss:$16 sps:$4 sm:$0xff]   ;;  %v8397_v30 = vld [vmem:[%s8824_s3 + $0x44] ss:$16 sps:$4 sm:$0xff]  }
 0x4fc   :  { %6504 = vpow2.f32 %v5727_v56  ;;  %v8407_v56 = vld [vmem:[%s8824_s3 + $0x40] ss:$16 sps:$4 sm:$0xff]  }
 0x504   :  { %v6497_v58 = vpop.eup %6496 }
 0x505   :  { %v3309_v31 = vadd.f32 1.0, %v6497_v58  ;;  %v8412_v58 = vld [vmem:[%s8824_s3 + $0x48] ss:$16 sps:$4 sm:$0xff]  }
 0x506   :  { %v6499_v32 = vpop.eup %6498 }
 0x507   :  { %v6501_v35 = vpop.eup %6500  ;;  %6506 = vrcp.f32 %v3309_v31  ;;  %v3315_v36 = vadd.f32 1.0, %v6499_v32  ;;  %v8426_v31 = vld [vmem:[%s8824_s3 + $0x2c] ss:$16 sps:$4 sm:$0xff]   ;;  %v8431_v32 = vld [vmem:[%s8824_s3 + $0x20] ss:$16 sps:$4 sm:$0xff]  }
 0x508   :  { %v6503_v47 = vpop.eup %6502  ;;  %6508 = vtanh.f32 %v3304_v61  ;;  %v8421_v61 = vld [vmem:[%s8824_s3 + $0x24] ss:$16 sps:$4 sm:$0xff]  }
 0x509   :  { %6510 = vrcp.f32 %v3315_v36  ;;  %v3002_v51 = vmul.f32 %v6503_v47, %v6501_v35  ;;  %v8436_v35 = vld [vmem:[%s8824_s3 + $0x28] ss:$16 sps:$4 sm:$0xff]   ;;  %v8445_v36 = vld [vmem:[%s8824_s3 + $0x4] ss:$16 sps:$4 sm:$0xff]   ;;  %v8450_v47 = vld [vmem:[%s8824_s3 + $0xc] ss:$16 sps:$4 sm:$0xff]  }
 0x50b   :  { %v8217_v52 = vsel %vm3009_vm2, %v3002_v51, %v7957_v27  ;;  %v3014_v41 = vsel %vm3009_vm2, %v3002_v51, 0.0  ;;  %v6505_v27 = vpop.eup %6504  ;;  %v8455_v51 = vld [vmem:[%s8824_s3] ss:$16 sps:$4 sm:$0xff]  }
 0x50c   :  { %5690 = vst [vmem:[%s8829_s5 + $0x20] sm:$0xff] %v3014_v41  ;;  %v3354_v53 = vpack.c.bf16 %v8217_v52, %v8217_v52  ;;  %v3322_v60 = vadd.f32 1.0, %v6505_v27  ;;  %v8460_v41 = vld [vmem:[%s8824_s3 + $0x8] ss:$16 sps:$4 sm:$0xff]   ;;  %v8474_v27 = vld [vmem:[%s8825_s4 + $0xec] ss:$16 sps:$4 sm:$0xff]  }
 0x50e   :  { %3580 = vmatmul.mubr.bf16.vlgmr.msra.gmra.mxu0 %v3354_v53  ;;  %3621 = vmatmul.mubr.bf16.vlgmr.msra.gmra.mxu1 %v3354_v53  ;;  %6512 = vrcp.f32 %v3322_v60  ;;  %v8469_v53 = vld [vmem:[%s8825_s4 + $0xe4] ss:$16 sps:$4 sm:$0xff]  }
 0x50f   :  { %3875 = vmatpush1.bf16.msra.mxu0 %v7963_v29  ;;  %3916 = vmatpush1.bf16.msra.mxu1 %v7968_v59 }
 0x510   :  { %3876 = vmatprep.subr.bf16.mxu0 %v7978_v42  ;;  %3917 = vmatprep.subr.bf16.mxu1 %v7983_v11 }
 0x511   :  { %3906 = vmatprep.mubr.bf16.mxu0 %v8891_v57  ;;  %3947 = vmatprep.mubr.bf16.mxu1 %v8891_v57 }
 0x513   :  { %3877 = vmatpush1.bf16.msra.mxu0 %v7990_v38  ;;  %3918 = vmatpush1.bf16.msra.mxu1 %v7995_v12  ;;  %v3335_v38 = vpop.permute.xlu1 %3334 }
 0x514   :  { %v6507_v55 = vpop.eup %6506  ;;  %3878 = vmatprep.subr.bf16.mxu0 %v8002_v13  ;;  %3919 = vmatprep.subr.bf16.mxu1 %v8007_v14  ;;  %vm3336_vm3 = vcmp.eq.s32.totalorder %v3335_v38, 1  ;;  %v8939_v14 = vld [vmem:[#allocation6_spill] sm:$0xff] }
 0x515   :  { %v6509_v29 = vpop.eup %6508 }
 0x516   :  { %v6511_v59 = vpop.eup %6510  ;;  %v3326_v42 = vmul.f32 %v6509_v29, %v6507_v55  ;;  %v5729_v55 = vld [vmem:[%s8827_s1 + $0x50] sm:$0xff] }
 0x517   :  { %v3325_v11 = vmul.f32 %v6511_v59, %v8074_v37  ;;  %3879 = vmatpush1.bf16.msra.mxu0 %v8016_v17  ;;  %3920 = vmatpush1.bf16.msra.mxu1 %v8021_v18  ;;  %v8940_v17 = vld [vmem:[#allocation9_spill] sm:$0xff]  ;;  %v8941_v18 = vld [vmem:[#allocation7_spill] sm:$0xff]  ;;  %v3350_v29 = vunpack.c.l.bf16 %v5729_v55  ;;  %v3351_v59 = vunpack.c.h.bf16 %v5729_v55  ;;  %v5767_v55 = vld [vmem:[%s8828_s2 + $0xa0] sm:$0xff] }
 0x518   :  { %3880 = vmatprep.subr.bf16.mxu0 %v8028_v50  ;;  %3921 = vmatprep.subr.bf16.mxu1 %v8033_v9  ;;  %v8942_v50 = vld [vmem:[#allocation8_spill] sm:$0xff] }
 0x519   :  { %v3327_v12 = vadd.f32 %v3326_v42, %v3325_v11  ;;  %v8943_v9 = vld [vmem:[#allocation12_spill] sm:$0xff] }
 0x51b   :  { %6514 = vtanh.f32 %v3327_v12  ;;  %3881 = vmatpush1.bf16.msra.mxu0 %v8041_v34  ;;  %3922 = vmatpush1.bf16.msra.mxu1 %v8046_v39  ;;  %v8244_v13 = vsel %vm3336_vm3, %v3327_v12, %v8074_v37  ;;  %v8945_v34 = vld [vmem:[#allocation11_spill] sm:$0xff]  ;;  %v8947_v37 = vld [vmem:[#allocation13_spill] sm:$0xff]  ;;  %v6513_v63 = vpop.eup %6512 }
 0x51c   :  { %3882 = vmatprep.subr.bf16.mxu0 %v8053_v10  ;;  %3923 = vmatprep.subr.bf16.mxu1 %v8939_v14  ;;  %v8946_v39 = vld [vmem:[#allocation15_spill] sm:$0xff]  ;;  %v8948_v10 = vld [vmem:[#allocation14_spill] sm:$0xff] }
 0x51f   :  { %3883 = vmatpush1.bf16.msra.mxu0 %v8940_v17  ;;  %3924 = vmatpush1.bf16.msra.mxu1 %v8941_v18 }
 0x520   :  { %3884 = vmatprep.subr.bf16.mxu0 %v8942_v50  ;;  %3925 = vmatprep.subr.bf16.mxu1 %v8943_v9 }
 0x523   :  { %3885 = vmatpush1.bf16.msra.mxu0 %v8944_v62  ;;  %3926 = vmatpush1.bf16.msra.mxu1 %v8945_v34 }
 0x524   :  { %3886 = vmatprep.subr.bf16.mxu0 %v8946_v39  ;;  %3927 = vmatprep.subr.bf16.mxu1 %v8947_v37  ;;  %v5730_v39 = vld [vmem:[%s8827_s1 + $0x58] sm:$0xff] }
 0x525   :  { %v3353_v37 = vunpack.c.h.bf16 %v5730_v39 }
 0x527   :  { %3887 = vmatpush1.bf16.msra.mxu0 %v8948_v10  ;;  %3928 = vmatpush1.bf16.msra.mxu1 %v8949_v0  ;;  %v3352_v10 = vunpack.c.l.bf16 %v5730_v39 }
 0x528   :  { %v6515_v2 = vpop.eup %6514  ;;  %3888 = vmatprep.subr.bf16.mxu0 %v8950_v3  ;;  %3929 = vmatprep.subr.bf16.mxu1 %v8134_v40  ;;  %v8282_v40 = vld [vmem:[%s8824_s3 + $0xec] ss:$16 sps:$4 sm:$0xff]  }
 0x529   :  { %v3329_v5 = vmul.f32 %v6515_v2, %v6513_v63 }
 0x52b   :  { %3889 = vmatpush1.bf16.msra.mxu0 %v8141_v19  ;;  %3930 = vmatpush1.bf16.msra.mxu1 %v8146_v6  ;;  %v8264_v4 = vsel %vm3336_vm3, %v3329_v5, %v8154_v23  ;;  %v3341_v7 = vsel %vm3336_vm3, %v3329_v5, 0.0  ;;  %v8277_v23 = vld [vmem:[%s8824_s3 + $0xe4] ss:$16 sps:$4 sm:$0xff]   ;;  %v8287_v19 = vld [vmem:[%s8824_s3 + $0xe0] ss:$16 sps:$4 sm:$0xff]  }
 0x52c   :  { %5728 = vst [vmem:[%s8830_s6 + $0x18] sm:$0xff] %v3341_v7  ;;  %v3681_v54 = vpack.c.bf16 %v8264_v4, %v8264_v4  ;;  %v8292_v6 = vld [vmem:[%s8824_s3 + $0xe8] ss:$16 sps:$4 sm:$0xff]   ;;  %4201 = vmatprep.subr.bf16.mxu0 %v8277_v23  ;;  %4242 = vmatprep.subr.bf16.mxu1 %v8282_v40 }
 0x52e   :  { %3907 = vmatmul.mubr.bf16.vlgmr.msra.gmra.mxu0 %v3681_v54  ;;  %3948 = vmatmul.mubr.bf16.vlgmr.msra.gmra.mxu1 %v3681_v54 }
 0x52f   :  { %4233 = vmatprep.mubr.bf16.mxu0 %v8891_v57  ;;  %4274 = vmatprep.mubr.bf16.mxu1 %v8891_v57 }
 0x530   :  { %4202 = vmatpush1.bf16.msra.mxu0 %v8287_v19  ;;  %4243 = vmatpush1.bf16.msra.mxu1 %v8292_v6 }
 0x531   :  { %4203 = vmatprep.subr.bf16.mxu0 %v8301_v26  ;;  %4244 = vmatprep.subr.bf16.mxu1 %v8316_v8 }
 0x534   :  { %4204 = vmatpush1.bf16.msra.mxu0 %v8306_v48  ;;  %4245 = vmatpush1.bf16.msra.mxu1 %v8311_v15 }
 0x535   :  { %4205 = vmatprep.subr.bf16.mxu0 %v8325_v20  ;;  %4246 = vmatprep.subr.bf16.mxu1 %v8330_v21 }
 0x538   :  { %4206 = vmatpush1.bf16.msra.mxu0 %v8335_v16  ;;  %4247 = vmatpush1.bf16.msra.mxu1 %v8340_v45 }
 0x539   :  { %4207 = vmatprep.subr.bf16.mxu0 %v8349_v49  ;;  %4248 = vmatprep.subr.bf16.mxu1 %v8354_v46 }
 0x53c   :  { %4208 = vmatpush1.bf16.msra.mxu0 %v8359_v22  ;;  %4249 = vmatpush1.bf16.msra.mxu1 %v8364_v28 }
 0x53d   :  { %4209 = vmatprep.subr.bf16.mxu0 %v8373_v33  ;;  %4250 = vmatprep.subr.bf16.mxu1 %v8378_v24 }
 0x540   :  { %4210 = vmatpush1.bf16.msra.mxu0 %v8383_v25  ;;  %4251 = vmatpush1.bf16.msra.mxu1 %v8388_v44 }
 0x541   :  { %4211 = vmatprep.subr.bf16.mxu0 %v8397_v30  ;;  %4252 = vmatprep.subr.bf16.mxu1 %v8402_v1 }
 0x544   :  { %4212 = vmatpush1.bf16.msra.mxu0 %v8407_v56  ;;  %4253 = vmatpush1.bf16.msra.mxu1 %v8412_v58 }
 0x545   :  { %4213 = vmatprep.subr.bf16.mxu0 %v8421_v61  ;;  %4254 = vmatprep.subr.bf16.mxu1 %v8426_v31 }
 0x548   :  { %4214 = vmatpush1.bf16.msra.mxu0 %v8431_v32  ;;  %4255 = vmatpush1.bf16.msra.mxu1 %v8436_v35 }
 0x549   :  { %4215 = vmatprep.subr.bf16.mxu0 %v8445_v36  ;;  %4256 = vmatprep.subr.bf16.mxu1 %v8450_v47 }
 0x54c   :  { %4216 = vmatpush1.bf16.msra.mxu0 %v8455_v51  ;;  %4257 = vmatpush1.bf16.msra.mxu1 %v8460_v41 }
 0x54d   :  { %4528 = vmatprep.subr.bf16.mxu0 %v8469_v53  ;;  %4569 = vmatprep.subr.bf16.mxu1 %v8474_v27 }
 0x5ce   :  { %v3581_v60 = vpop.f32.mrf.mxu0  ;;  %v3622_v42 = vpop.f32.mrf.mxu1 }
 0x5cf   :  { %v3629_v11 = vadd.f32 %v3581_v60, %v3350_v29  ;;  %v3631_v3 = vadd.f32 %v3622_v42, %v3352_v10  ;;  %v3677_v29 = vunpack.c.l.bf16 %v5767_v55 }
 0x5d0   :  { %v3583_v38 = vpop.f32.mrf.mxu0  ;;  %v3624_v12 = vpop.f32.mrf.mxu1 }
 0x5d1   :  { %v5763_v14 = vmul.f32 -1.442695, %v3629_v11  ;;  %v3630_v17 = vadd.f32 %v3583_v38, %v3351_v59  ;;  %v3632_v63 = vadd.f32 %v3624_v12, %v3353_v37  ;;  %v3678_v59 = vunpack.c.h.bf16 %v5767_v55 }
 0x5d2   :  { %v3585_v18 = vpop.f32.mrf.mxu0  ;;  %v3626_v50 = vpop.f32.mrf.mxu1 }
 0x5d3   :  { %6516 = vpow2.f32 %v5763_v14  ;;  %v5764_v9 = vmul.f32 -1.442695, %v3630_v17  ;;  %v5765_v0 = vmul.f32 -1.442695, %v3632_v63 }
 0x5d4   :  { %v3586_v62 = vpop.f32.mrf.mxu0  ;;  %v3627_v34 = vpop.f32.mrf.mxu1 }
 0x5d5   :  { %6518 = vpow2.f32 %v5764_v9 }
 0x5d6   :  { %6520 = vpow2.f32 %v5765_v0 }
 0x5e0   :  { %v6517_v2 = vpop.eup %6516 }
 0x5e1   :  { %v3636_v5 = vadd.f32 1.0, %v6517_v2 }
 0x5e2   :  { %v6519_v7 = vpop.eup %6518 }
 0x5e3   :  { %6522 = vrcp.f32 %v3636_v5  ;;  %v3642_v54 = vadd.f32 1.0, %v6519_v7  ;;  %v6521_v38 = vpop.eup %6520  ;;  %v3662_v5 = vpop.permute.xlu0 %3661 }
 0x5e4   :  { %6524 = vtanh.f32 %v3631_v3  ;;  %v3649_v34 = vadd.f32 1.0, %v6521_v38  ;;  %vm3663_vm4 = vcmp.eq.s32.totalorder %v3662_v5, 1 }
 0x5e5   :  { %6526 = vrcp.f32 %v3642_v54  ;;  %v5768_v54 = vld [vmem:[%s8828_s2 + $0xa8] sm:$0xff] }
 0x5e6   :  { %v3680_v55 = vunpack.c.h.bf16 %v5768_v54 }
 0x5ee   :  { %v3908_v60 = vpop.f32.mrf.mxu0  ;;  %v3949_v11 = vpop.f32.mrf.mxu1 }
 0x5ef   :  { %v3956_v12 = vadd.f32 %v3908_v60, %v3677_v29  ;;  %v3679_v60 = vunpack.c.l.bf16 %v5768_v54  ;;  %v8561_v54 = vld [vmem:[%s8825_s4 + $0xa8] ss:$16 sps:$4 sm:$0xff]  }
 0x5f0   :  { %v6523_v14 = vpop.eup %6522  ;;  %v3910_v17 = vpop.f32.mrf.mxu0 }
 0x5f1   :  { %v3951_v42 = vpop.f32.mrf.mxu1  ;;  %v6525_v18 = vpop.eup %6524  ;;  %v5801_v50 = vmul.f32 -1.442695, %v3956_v12  ;;  %v3957_v9 = vadd.f32 %v3910_v17, %v3678_v59 }
 0x5f2   :  { %v6527_v62 = vpop.eup %6526  ;;  %v3912_v39 = vpop.f32.mrf.mxu0  ;;  %v3653_v63 = vmul.f32 %v6525_v18, %v6523_v14  ;;  %v3959_v59 = vadd.f32 %v3951_v42, %v3680_v55  ;;  %v3958_v14 = vadd.f32 %v3949_v11, %v3679_v60  ;;  %v8503_v11 = vld [vmem:[%s8825_s4 + $0xe0] ss:$16 sps:$4 sm:$0xff]   ;;  %v8508_v42 = vld [vmem:[%s8825_s4 + $0xe8] ss:$16 sps:$4 sm:$0xff]   ;;  %v8573_v60 = vld [vmem:[%s8825_s4 + $0x8c] ss:$16 sps:$4 sm:$0xff]  }
 0x5f3   :  { %v3953_v37 = vpop.f32.mrf.mxu1  ;;  %v3652_v10 = vmul.f32 %v6527_v62, %v8213_v43  ;;  %6528 = vpow2.f32 %v5801_v50  ;;  %v5802_v0 = vmul.f32 -1.442695, %v3957_v9 }
 0x5f4   :  { %v3913_v2 = vpop.f32.mrf.mxu0  ;;  %v5803_v38 = vmul.f32 -1.442695, %v3959_v59  ;;  %v8518_v37 = vld [vmem:[%s8825_s4 + $0xc4] ss:$16 sps:$4 sm:$0xff]  }
 0x5f5   :  { %v3954_v3 = vpop.f32.mrf.mxu1  ;;  %v3654_v7 = vadd.f32 %v3653_v63, %v3652_v10  ;;  %6530 = vpow2.f32 %v5802_v0  ;;  %v8523_v63 = vld [vmem:[%s8825_s4 + $0xcc] ss:$16 sps:$4 sm:$0xff]   ;;  %v8530_v10 = vld [vmem:[%s8825_s4 + $0xc0] ss:$16 sps:$4 sm:$0xff]   ;;  %v8535_v0 = vld [vmem:[%s8825_s4 + $0xc8] ss:$16 sps:$4 sm:$0xff]  }
 0x5f6   :  { %6532 = vrcp.f32 %v3649_v34  ;;  %v8542_v2 = vld [vmem:[%s8825_s4 + $0xa4] ss:$16 sps:$4 sm:$0xff]   ;;  %v8547_v3 = vld [vmem:[%s8825_s4 + $0xac] ss:$16 sps:$4 sm:$0xff]  }
 0x5f7   :  { %6534 = vtanh.f32 %v3654_v7  ;;  %v8493_v29 = vsel %vm3663_vm4, %v3654_v7, %v8213_v43  ;;  %v8556_v7 = vld [vmem:[%s8825_s4 + $0xa0] ss:$16 sps:$4 sm:$0xff]   ;;  %v8568_v59 = vld [vmem:[%s8825_s4 + $0x84] ss:$16 sps:$4 sm:$0xff]  }
 0x5f8   :  { %6536 = vpow2.f32 %v5803_v38 }
 0x600   :  { %v6529_v12 = vpop.eup %6528 }
 0x601   :  { %v3963_v17 = vadd.f32 1.0, %v6529_v12 }
 0x602   :  { %v6531_v18 = vpop.eup %6530 }
 0x603   :  { %v6533_v50 = vpop.eup %6532  ;;  %6538 = vrcp.f32 %v3963_v17  ;;  %v3969_v9 = vadd.f32 1.0, %v6531_v18 }
 0x604   :  { %v6535_v62 = vpop.eup %6534  ;;  %6540 = vtanh.f32 %v3958_v14 }
 0x605   :  { %6542 = vrcp.f32 %v3969_v9  ;;  %v3656_v34 = vmul.f32 %v6535_v62, %v6533_v50  ;;  %v6537_v5 = vpop.eup %6536  ;;  %v8581_v50 = vld [vmem:[%s8825_s4 + $0x80] ss:$16 sps:$4 sm:$0xff]   ;;  %v8586_v9 = vld [vmem:[%s8825_s4 + $0x88] ss:$16 sps:$4 sm:$0xff]   ;;  %v8593_v62 = vld [vmem:[%s8825_s4 + $0x64] ss:$16 sps:$4 sm:$0xff]  }
 0x606   :  { %v3976_v14 = vadd.f32 1.0, %v6537_v5  ;;  %v8605_v5 = vld [vmem:[%s8825_s4 + $0x60] ss:$16 sps:$4 sm:$0xff]  }
 0x607   :  { %v8497_v39 = vsel %vm3663_vm4, %v3656_v34, %v8217_v52  ;;  %v3668_v43 = vsel %vm3663_vm4, %v3656_v34, 0.0  ;;  %v8598_v34 = vld [vmem:[%s8825_s4 + $0x6c] ss:$16 sps:$4 sm:$0xff]   ;;  %8952 = vst [vmem:[#allocation9_spill] sm:$0xff] %v8605_v5 }
 0x608   :  { %5766 = vst [vmem:[%s8829_s5 + $0x28] sm:$0xff] %v3668_v43  ;;  %v4008_v52 = vpack.c.bf16 %v8497_v39, %v8497_v39  ;;  %8951 = vst [vmem:[#allocation6_spill] sm:$0xff] %v8598_v34  ;;  %v3989_v43 = vpop.permute.xlu1 %3988  ;;  %6544 = vrcp.f32 %v3976_v14  ;;  %v8626_v14 = vld [vmem:[%s8825_s4 + $0x4c] ss:$16 sps:$4 sm:$0xff]  }
 0x609   :  { %vm3990_vm5 = vcmp.eq.s32.totalorder %v3989_v43, 1  ;;  %8955 = vst [vmem:[#allocation12_spill] sm:$0xff] %v8626_v14 }
 0x60a   :  { %4234 = vmatmul.mubr.bf16.vlgmr.msra.gmra.mxu0 %v4008_v52  ;;  %4275 = vmatmul.mubr.bf16.vlgmr.msra.gmra.mxu1 %v4008_v52 }
 0x60b   :  { %4529 = vmatpush1.bf16.msra.mxu0 %v8503_v11  ;;  %4570 = vmatpush1.bf16.msra.mxu1 %v8508_v42 }
 0x60c   :  { %4530 = vmatprep.subr.bf16.mxu0 %v8518_v37  ;;  %4571 = vmatprep.subr.bf16.mxu1 %v8523_v63 }
 0x60d   :  { %4560 = vmatprep.mubr.bf16.mxu0 %v8891_v57  ;;  %4601 = vmatprep.mubr.bf16.mxu1 %v8891_v57 }
 0x60f   :  { %4531 = vmatpush1.bf16.msra.mxu0 %v8530_v10  ;;  %4572 = vmatpush1.bf16.msra.mxu1 %v8535_v0 }
 0x610   :  { %v6539_v55 = vpop.eup %6538  ;;  %4532 = vmatprep.subr.bf16.mxu0 %v8542_v2  ;;  %4573 = vmatprep.subr.bf16.mxu1 %v8547_v3 }
 0x611   :  { %v6541_v38 = vpop.eup %6540 }
 0x612   :  { %v6543_v12 = vpop.eup %6542  ;;  %v3980_v17 = vmul.f32 %v6541_v38, %v6539_v55  ;;  %v8610_v55 = vld [vmem:[%s8825_s4 + $0x68] ss:$16 sps:$4 sm:$0xff]  }
 0x613   :  { %v3979_v18 = vmul.f32 %v6543_v12, %v8244_v13  ;;  %4533 = vmatpush1.bf16.msra.mxu0 %v8556_v7  ;;  %4574 = vmatpush1.bf16.msra.mxu1 %v8561_v54  ;;  %8953 = vst [vmem:[#allocation7_spill] sm:$0xff] %v8610_v55  ;;  %v8621_v12 = vld [vmem:[%s8825_s4 + $0x44] ss:$16 sps:$4 sm:$0xff]  }
 0x614   :  { %4534 = vmatprep.subr.bf16.mxu0 %v8568_v59  ;;  %4575 = vmatprep.subr.bf16.mxu1 %v8573_v60  ;;  %8954 = vst [vmem:[#allocation8_spill] sm:$0xff] %v8621_v12 }
 0x615   :  { %v3981_v52 = vadd.f32 %v3980_v17, %v3979_v18  ;;  %v8638_v17 = vld [vmem:[%s8825_s4 + $0x48] ss:$16 sps:$4 sm:$0xff]   ;;  %v8645_v18 = vld [vmem:[%s8825_s4 + $0x24] ss:$16 sps:$4 sm:$0xff]  }
 0x616   :  { %8957 = vst [vmem:[#allocation11_spill] sm:$0xff] %v8638_v17  ;;  %8958 = vst [vmem:[#allocation15_spill] sm:$0xff] %v8645_v18 }
 0x617   :  { %6546 = vtanh.f32 %v3981_v52  ;;  %4535 = vmatpush1.bf16.msra.mxu0 %v8581_v50  ;;  %4576 = vmatpush1.bf16.msra.mxu1 %v8586_v9  ;;  %v8614_v38 = vsel %vm3990_vm5, %v3981_v52, %v8244_v13  ;;  %v8633_v13 = vld [vmem:[%s8825_s4 + $0x40] ss:$16 sps:$4 sm:$0xff]   ;;  %v8650_v52 = vld [vmem:[%s8825_s4 + $0x2c] ss:$16 sps:$4 sm:$0xff]  }
 0x618   :  { %4536 = vmatprep.subr.bf16.mxu0 %v8593_v62  ;;  %4577 = vmatprep.subr.bf16.mxu1 %v8598_v34  ;;  %8956 = vst [vmem:[#allocation10_spill] sm:$0xff] %v8633_v13  ;;  %8959 = vst [vmem:[#allocation13_spill] sm:$0xff] %v8650_v52 }
 0x61b   :  { %4537 = vmatpush1.bf16.msra.mxu0 %v8605_v5  ;;  %4578 = vmatpush1.bf16.msra.mxu1 %v8610_v55  ;;  %v6545_v55 = vpop.eup %6544 }
 0x61c   :  { %4538 = vmatprep.subr.bf16.mxu0 %v8621_v12  ;;  %4579 = vmatprep.subr.bf16.mxu1 %v8626_v14  ;;  %v8657_v12 = vld [vmem:[%s8825_s4 + $0x20] ss:$16 sps:$4 sm:$0xff]   ;;  %v8662_v14 = vld [vmem:[%s8825_s4 + $0x28] ss:$16 sps:$4 sm:$0xff]  }
 0x61d   :  { %8960 = vst [vmem:[#allocation14_spill] sm:$0xff] %v8657_v12  ;;  %8961 = vst [vmem:[#allocation16_spill] sm:$0xff] %v8662_v14 }
 0x61f   :  { %4539 = vmatpush1.bf16.msra.mxu0 %v8633_v13  ;;  %4580 = vmatpush1.bf16.msra.mxu1 %v8638_v17  ;;  %v8669_v13 = vld [vmem:[%s8825_s4 + $0x4] ss:$16 sps:$4 sm:$0xff]   ;;  %v8674_v17 = vld [vmem:[%s8825_s4 + $0xc] ss:$16 sps:$4 sm:$0xff]  }
 0x620   :  { %4540 = vmatprep.subr.bf16.mxu0 %v8645_v18  ;;  %4581 = vmatprep.subr.bf16.mxu1 %v8650_v52  ;;  %8962 = vst [vmem:[#allocation17_spill] sm:$0xff] %v8669_v13  ;;  %v8681_v18 = vld [vmem:[%s8825_s4] ss:$16 sps:$4 sm:$0xff]   ;;  %v8686_v52 = vld [vmem:[%s8825_s4 + $0x8] ss:$16 sps:$4 sm:$0xff]  }
 0x623   :  { %4541 = vmatpush1.bf16.msra.mxu0 %v8657_v12  ;;  %4582 = vmatpush1.bf16.msra.mxu1 %v8662_v14 }
 0x624   :  { %v6547_v5 = vpop.eup %6546  ;;  %4542 = vmatprep.subr.bf16.mxu0 %v8669_v13  ;;  %4583 = vmatprep.subr.bf16.mxu1 %v8674_v17 }
 0x625   :  { %v3983_v34 = vmul.f32 %v6547_v5, %v6545_v55 }
 0x627   :  { %4543 = vmatpush1.bf16.msra.mxu0 %v8681_v18  ;;  %4584 = vmatpush1.bf16.msra.mxu1 %v8686_v52  ;;  %v8694_v14 = vsel %vm3990_vm5, %v3983_v34, %v8264_v4  ;;  %v3995_v12 = vsel %vm3990_vm5, %v3983_v34, 0.0  ;;  %v5805_v4 = vld [vmem:[%s8827_s1 + $0x60] sm:$0xff] }
 0x628   :  { %5804 = vst [vmem:[%s8830_s6 + $0x10] sm:$0xff] %v3995_v12  ;;  %v4335_v13 = vpack.c.bf16 %v8694_v14, %v8694_v14  ;;  %4855 = vmatprep.subr.bf16.mxu0 %v8277_v23  ;;  %4896 = vmatprep.subr.bf16.mxu1 %v8282_v40  ;;  %v4004_v23 = vunpack.c.l.bf16 %v5805_v4  ;;  %v4005_v40 = vunpack.c.h.bf16 %v5805_v4 }
 0x62a   :  { %4561 = vmatmul.mubr.bf16.vlgmr.msra.gmra.mxu0 %v4335_v13  ;;  %4602 = vmatmul.mubr.bf16.vlgmr.msra.gmra.mxu1 %v4335_v13 }
 0x62b   :  { %4856 = vmatpush1.bf16.msra.mxu0 %v8287_v19  ;;  %4897 = vmatpush1.bf16.msra.mxu1 %v8292_v6 }
 0x62c   :  { %4857 = vmatprep.subr.bf16.mxu0 %v8301_v26  ;;  %4898 = vmatprep.subr.bf16.mxu1 %v8316_v8 }
 0x62d   :  { %4887 = vmatprep.mubr.bf16.mxu0 %v8891_v57  ;;  %4928 = vmatprep.mubr.bf16.mxu1 %v8891_v57 }
 0x62f   :  { %4858 = vmatpush1.bf16.msra.mxu0 %v8306_v48  ;;  %4899 = vmatpush1.bf16.msra.mxu1 %v8311_v15 }
 0x630   :  { %4859 = vmatprep.subr.bf16.mxu0 %v8325_v20  ;;  %4900 = vmatprep.subr.bf16.mxu1 %v8330_v21 }
 0x633   :  { %4860 = vmatpush1.bf16.msra.mxu0 %v8335_v16  ;;  %4901 = vmatpush1.bf16.msra.mxu1 %v8340_v45 }
 0x634   :  { %4861 = vmatprep.subr.bf16.mxu0 %v8349_v49  ;;  %4902 = vmatprep.subr.bf16.mxu1 %v8354_v46 }
 0x637   :  { %4862 = vmatpush1.bf16.msra.mxu0 %v8359_v22  ;;  %4903 = vmatpush1.bf16.msra.mxu1 %v8364_v28  ;;  %v5806_v22 = vld [vmem:[%s8827_s1 + $0x68] sm:$0xff] }
 0x638   :  { %4863 = vmatprep.subr.bf16.mxu0 %v8373_v33  ;;  %4904 = vmatprep.subr.bf16.mxu1 %v8378_v24  ;;  %v4007_v28 = vunpack.c.h.bf16 %v5806_v22  ;;  %v4006_v24 = vunpack.c.l.bf16 %v5806_v22 }
 0x63b   :  { %4864 = vmatpush1.bf16.msra.mxu0 %v8383_v25  ;;  %4905 = vmatpush1.bf16.msra.mxu1 %v8388_v44 }
 0x63c   :  { %4865 = vmatprep.subr.bf16.mxu0 %v8397_v30  ;;  %4906 = vmatprep.subr.bf16.mxu1 %v8402_v1 }
 0x63f   :  { %4866 = vmatpush1.bf16.msra.mxu0 %v8407_v56  ;;  %4907 = vmatpush1.bf16.msra.mxu1 %v8412_v58 }
 0x640   :  { %4867 = vmatprep.subr.bf16.mxu0 %v8421_v61  ;;  %4908 = vmatprep.subr.bf16.mxu1 %v8426_v31  ;;  %v5843_v61 = vld [vmem:[%s8828_s2 + $0x90] sm:$0xff] }
 0x641   :  { %v4331_v31 = vunpack.c.l.bf16 %v5843_v61 }
 0x643   :  { %4868 = vmatpush1.bf16.msra.mxu0 %v8431_v32  ;;  %4909 = vmatpush1.bf16.msra.mxu1 %v8436_v35  ;;  %v4332_v32 = vunpack.c.h.bf16 %v5843_v61 }
 0x644   :  { %4869 = vmatprep.subr.bf16.mxu0 %v8445_v36  ;;  %4910 = vmatprep.subr.bf16.mxu1 %v8450_v47 }
 0x647   :  { %4870 = vmatpush1.bf16.msra.mxu0 %v8455_v51  ;;  %4911 = vmatpush1.bf16.msra.mxu1 %v8460_v41 }
 0x648   :  { %5180 = vmatprep.subr.bf16.mxu0 %v8469_v53  ;;  %5221 = vmatprep.subr.bf16.mxu1 %v8474_v27 }
 0x6ca   :  { %v4235_v19 = vpop.f32.mrf.mxu0  ;;  %v4276_v6 = vpop.f32.mrf.mxu1 }
 0x6cb   :  { %v4283_v26 = vadd.f32 %v4235_v19, %v4004_v23  ;;  %v4285_v30 = vadd.f32 %v4276_v6, %v4006_v24 }
 0x6cc   :  { %v4237_v48 = vpop.f32.mrf.mxu0  ;;  %v4278_v15 = vpop.f32.mrf.mxu1 }
 0x6cd   :  { %v5839_v8 = vmul.f32 -1.442695, %v4283_v26  ;;  %v4284_v20 = vadd.f32 %v4237_v48, %v4005_v40  ;;  %v4286_v33 = vadd.f32 %v4278_v15, %v4007_v28  ;;  %v4316_v48 = vpop.permute.xlu0 %4315 }
 0x6ce   :  { %v4239_v21 = vpop.f32.mrf.mxu0  ;;  %v4280_v16 = vpop.f32.mrf.mxu1  ;;  %vm4317_vm6 = vcmp.eq.s32.totalorder %v4316_v48, 1 }
 0x6cf   :  { %6548 = vpow2.f32 %v5839_v8  ;;  %v5840_v45 = vmul.f32 -1.442695, %v4284_v20  ;;  %v5841_v25 = vmul.f32 -1.442695, %v4286_v33  ;;  %v5844_v8 = vld [vmem:[%s8828_s2 + $0x98] sm:$0xff] }
 0x6d0   :  { %v4240_v49 = vpop.f32.mrf.mxu0  ;;  %v4281_v46 = vpop.f32.mrf.mxu1  ;;  %v4334_v20 = vunpack.c.h.bf16 %v5844_v8 }
 0x6d1   :  { %6550 = vpow2.f32 %v5840_v45  ;;  %v4333_v45 = vunpack.c.l.bf16 %v5844_v8 }
 0x6d2   :  { %6552 = vpow2.f32 %v5841_v25 }
 0x6dc   :  { %v6549_v44 = vpop.eup %6548 }
 0x6dd   :  { %v4290_v1 = vadd.f32 1.0, %v6549_v44 }
 0x6de   :  { %v6551_v56 = vpop.eup %6550 }
 0x6df   :  { %6554 = vrcp.f32 %v4290_v1  ;;  %v4296_v58 = vadd.f32 1.0, %v6551_v56  ;;  %v6553_v47 = vpop.eup %6552 }
 0x6e0   :  { %6556 = vtanh.f32 %v4285_v30  ;;  %v4303_v12 = vadd.f32 1.0, %v6553_v47 }
 0x6e1   :  { %6558 = vrcp.f32 %v4296_v58 }
 0x6ea   :  { %v4562_v35 = vpop.f32.mrf.mxu0  ;;  %v4603_v36 = vpop.f32.mrf.mxu1 }
 0x6eb   :  { %v4610_v51 = vadd.f32 %v4562_v35, %v4331_v31  ;;  %v4612_v22 = vadd.f32 %v4603_v36, %v4333_v45  ;;  %v8974_v36 = vld [vmem:[#allocation17_spill] sm:$0xff] }
 0x6ec   :  { %v6555_v41 = vpop.eup %6554  ;;  %v4564_v53 = vpop.f32.mrf.mxu0 }
 0x6ed   :  { %v4605_v27 = vpop.f32.mrf.mxu1  ;;  %v6557_v34 = vpop.eup %6556  ;;  %v5877_v43 = vmul.f32 -1.442695, %v4610_v51  ;;  %v4611_v5 = vadd.f32 %v4564_v53, %v4332_v32  ;;  %v8973_v32 = vld [vmem:[#allocation16_spill] sm:$0xff] }
 0x6ee   :  { %v6559_v55 = vpop.eup %6558  ;;  %v4566_v13 = vpop.f32.mrf.mxu0  ;;  %v4307_v23 = vmul.f32 %v6557_v34, %v6555_v41  ;;  %v4613_v16 = vadd.f32 %v4605_v27, %v4334_v20 }
 0x6ef   :  { %v4607_v4 = vpop.f32.mrf.mxu1  ;;  %v4306_v40 = vmul.f32 %v6559_v55, %v8493_v29  ;;  %6560 = vpow2.f32 %v5877_v43  ;;  %v5878_v19 = vmul.f32 -1.442695, %v4611_v5 }
 0x6f0   :  { %v4567_v6 = vpop.f32.mrf.mxu0  ;;  %v5879_v49 = vmul.f32 -1.442695, %v4613_v16 }
 0x6f1   :  { %v4608_v26 = vpop.f32.mrf.mxu1  ;;  %v4308_v15 = vadd.f32 %v4307_v23, %v4306_v40  ;;  %6562 = vpow2.f32 %v5878_v19  ;;  %v5882_v6 = vld [vmem:[%s8827_s1 + $0x78] sm:$0xff] }
 0x6f2   :  { %6564 = vrcp.f32 %v4303_v12  ;;  %v4661_v26 = vunpack.c.h.bf16 %v5882_v6 }
 0x6f3   :  { %6566 = vtanh.f32 %v4308_v15  ;;  %v8753_v21 = vsel %vm4317_vm6, %v4308_v15, %v8493_v29  ;;  %v4660_v15 = vunpack.c.l.bf16 %v5882_v6 }
 0x6f4   :  { %6568 = vpow2.f32 %v5879_v49 }
 0x6fc   :  { %v6561_v46 = vpop.eup %6560 }
 0x6fd   :  { %v4617_v28 = vadd.f32 1.0, %v6561_v46 }
 0x6fe   :  { %v6563_v33 = vpop.eup %6562 }
 0x6ff   :  { %v6565_v24 = vpop.eup %6564  ;;  %6570 = vrcp.f32 %v4617_v28  ;;  %v4623_v25 = vadd.f32 1.0, %v6563_v33 }
 0x700   :  { %v6567_v44 = vpop.eup %6566  ;;  %6572 = vtanh.f32 %v4612_v22  ;;  %v5919_v22 = vld [vmem:[%s8828_s2 + $0x80] sm:$0xff] }
 0x701   :  { %6574 = vrcp.f32 %v4623_v25  ;;  %v4310_v30 = vmul.f32 %v6567_v44, %v6565_v24  ;;  %v4983_v28 = vunpack.c.l.bf16 %v5919_v22  ;;  %v4984_v33 = vunpack.c.h.bf16 %v5919_v22 }
 0x703   :  { %v4318_v1 = vsel %vm4317_vm6, %v4310_v30, %v8497_v39  ;;  %v4322_v29 = vsel %vm4317_vm6, %v4310_v30, 0.0  ;;  %v6569_v39 = vpop.eup %6568 }
 0x704   :  { %5842 = vst [vmem:[%s8829_s5 + $0x30] sm:$0xff] %v4322_v29  ;;  %v4662_v56 = vpack.c.bf16 %v4318_v1, %v4318_v1  ;;  %v4630_v61 = vadd.f32 1.0, %v6569_v39 }
 0x706   :  { %4888 = vmatmul.mubr.bf16.vlgmr.msra.gmra.mxu0 %v4662_v56  ;;  %4929 = vmatmul.mubr.bf16.vlgmr.msra.gmra.mxu1 %v4662_v56  ;;  %6576 = vrcp.f32 %v4630_v61 }
 0x707   :  { %5181 = vmatpush1.bf16.msra.mxu0 %v8503_v11  ;;  %5222 = vmatpush1.bf16.msra.mxu1 %v8508_v42 }
 0x708   :  { %5182 = vmatprep.subr.bf16.mxu0 %v8518_v37  ;;  %5223 = vmatprep.subr.bf16.mxu1 %v8523_v63 }
 0x709   :  { %5212 = vmatprep.mubr.bf16.mxu0 %v8891_v57  ;;  %5253 = vmatprep.mubr.bf16.mxu1 %v8891_v57  ;;  %v4643_v57 = vpop.permute.xlu1 %4642 }
 0x70a   :  { %vm4644_vm7 = vcmp.eq.s32.totalorder %v4643_v57, 1 }
 0x70b   :  { %5183 = vmatpush1.bf16.msra.mxu0 %v8530_v10  ;;  %5224 = vmatpush1.bf16.msra.mxu1 %v8535_v0 }
 0x70c   :  { %v6571_v58 = vpop.eup %6570  ;;  %5184 = vmatprep.subr.bf16.mxu0 %v8542_v2  ;;  %5225 = vmatprep.subr.bf16.mxu1 %v8547_v3  ;;  %v8963_v2 = vld [vmem:[#allocation6_spill] sm:$0xff]  ;;  %v8964_v3 = vld [vmem:[#allocation9_spill] sm:$0xff] }
 0x70d   :  { %v6573_v11 = vpop.eup %6572 }
 0x70e   :  { %v6575_v42 = vpop.eup %6574  ;;  %v4634_v37 = vmul.f32 %v6573_v11, %v6571_v58 }
 0x70f   :  { %v4633_v63 = vmul.f32 %v6575_v42, %v8614_v38  ;;  %5185 = vmatpush1.bf16.msra.mxu0 %v8556_v7  ;;  %5226 = vmatpush1.bf16.msra.mxu1 %v8561_v54  ;;  %v8965_v7 = vld [vmem:[#allocation7_spill] sm:$0xff]  ;;  %v8966_v54 = vld [vmem:[#allocation8_spill] sm:$0xff] }
 0x710   :  { %5186 = vmatprep.subr.bf16.mxu0 %v8568_v59  ;;  %5227 = vmatprep.subr.bf16.mxu1 %v8573_v60  ;;  %v8967_v59 = vld [vmem:[#allocation12_spill] sm:$0xff]  ;;  %v8968_v60 = vld [vmem:[#allocation10_spill] sm:$0xff] }
 0x711   :  { %v4635_v10 = vadd.f32 %v4634_v37, %v4633_v63 }
 0x713   :  { %6578 = vtanh.f32 %v4635_v10  ;;  %5187 = vmatpush1.bf16.msra.mxu0 %v8581_v50  ;;  %5228 = vmatpush1.bf16.msra.mxu1 %v8586_v9  ;;  %v8780_v0 = vsel %vm4644_vm7, %v4635_v10, %v8614_v38  ;;  %v8969_v50 = vld [vmem:[#allocation11_spill] sm:$0xff]  ;;  %v8971_v38 = vld [vmem:[#allocation13_spill] sm:$0xff]  ;;  %v6577_v31 = vpop.eup %6576 }
 0x714   :  { %5188 = vmatprep.subr.bf16.mxu0 %v8593_v62  ;;  %5229 = vmatprep.subr.bf16.mxu1 %v8963_v2  ;;  %v8970_v9 = vld [vmem:[#allocation15_spill] sm:$0xff]  ;;  %v8972_v62 = vld [vmem:[#allocation14_spill] sm:$0xff] }
 0x717   :  { %5189 = vmatpush1.bf16.msra.mxu0 %v8964_v3  ;;  %5230 = vmatpush1.bf16.msra.mxu1 %v8965_v7 }
 0x718   :  { %5190 = vmatprep.subr.bf16.mxu0 %v8966_v54  ;;  %5231 = vmatprep.subr.bf16.mxu1 %v8967_v59  ;;  %v5920_v59 = vld [vmem:[%s8828_s2 + $0x88] sm:$0xff] }
 0x71b   :  { %5191 = vmatpush1.bf16.msra.mxu0 %v8968_v60  ;;  %5232 = vmatpush1.bf16.msra.mxu1 %v8969_v50  ;;  %v4986_v60 = vunpack.c.h.bf16 %v5920_v59 }
 0x71c   :  { %5192 = vmatprep.subr.bf16.mxu0 %v8970_v9  ;;  %5233 = vmatprep.subr.bf16.mxu1 %v8971_v38  ;;  %v4985_v9 = vunpack.c.l.bf16 %v5920_v59 }
 0x71f   :  { %5193 = vmatpush1.bf16.msra.mxu0 %v8972_v62  ;;  %5234 = vmatpush1.bf16.msra.mxu1 %v8973_v32 }
 0x720   :  { %v6579_v35 = vpop.eup %6578  ;;  %5194 = vmatprep.subr.bf16.mxu0 %v8974_v36  ;;  %5235 = vmatprep.subr.bf16.mxu1 %v8674_v17  ;;  %v5881_v17 = vld [vmem:[%s8827_s1 + $0x70] sm:$0xff]  ;;  %v4970_v36 = vpop.permute.xlu0 %4969 }
 0x721   :  { %v4637_v47 = vmul.f32 %v6579_v35, %v6577_v31  ;;  %v4658_v27 = vunpack.c.l.bf16 %v5881_v17  ;;  %vm4971_vm8 = vcmp.eq.s32.totalorder %v4970_v36, 1 }
 0x723   :  { %5195 = vmatpush1.bf16.msra.mxu0 %v8681_v18  ;;  %5236 = vmatpush1.bf16.msra.mxu1 %v8686_v52  ;;  %v4645_v51 = vsel %vm4644_vm7, %v4637_v47, %v8694_v14  ;;  %v4649_v41 = vsel %vm4644_vm7, %v4637_v47, 0.0  ;;  %v4659_v18 = vunpack.c.h.bf16 %v5881_v17 }
 0x724   :  { %5880 = vst [vmem:[%s8830_s6 + $0x8] sm:$0xff] %v4649_v41  ;;  %v4987_v53 = vpack.c.bf16 %v4645_v51, %v4645_v51 }
 0x726   :  { %5213 = vmatmul.mubr.bf16.vlgmr.msra.gmra.mxu0 %v4987_v53  ;;  %5254 = vmatmul.mubr.bf16.vlgmr.msra.gmra.mxu1 %v4987_v53 }
 0x7c6   :  { %v4889_v34 = vpop.f32.mrf.mxu0  ;;  %v4930_v52 = vpop.f32.mrf.mxu1 }
 0x7c7   :  { %v4937_v43 = vadd.f32 %v4889_v34, %v4658_v27  ;;  %v4939_v16 = vadd.f32 %v4930_v52, %v4660_v15 }
 0x7c8   :  { %v4891_v5 = vpop.f32.mrf.mxu0  ;;  %v4932_v14 = vpop.f32.mrf.mxu1 }
 0x7c9   :  { %v5915_v55 = vmul.f32 -1.442695, %v4937_v43  ;;  %v4938_v12 = vadd.f32 %v4891_v5, %v4659_v18  ;;  %v4940_v48 = vadd.f32 %v4932_v14, %v4661_v26 }
 0x7ca   :  { %v4893_v13 = vpop.f32.mrf.mxu0  ;;  %v4934_v4 = vpop.f32.mrf.mxu1 }
 0x7cb   :  { %6580 = vpow2.f32 %v5915_v55  ;;  %v5916_v23 = vmul.f32 -1.442695, %v4938_v12  ;;  %v5917_v8 = vmul.f32 -1.442695, %v4940_v48  ;;  %v5295_v12 = vpop.permute.xlu1 %5294 }
 0x7cc   :  { %v4894_v40 = vpop.f32.mrf.mxu0  ;;  %v4935_v19 = vpop.f32.mrf.mxu1  ;;  %vm5296_vm9 = vcmp.eq.s32.totalorder %v5295_v12, 1 }
 0x7cd   :  { %6582 = vpow2.f32 %v5916_v23 }
 0x7ce   :  { %6584 = vpow2.f32 %v5917_v8 }
 0x7d8   :  { %v6581_v20 = vpop.eup %6580 }
 0x7d9   :  { %v4944_v45 = vadd.f32 1.0, %v6581_v20 }
 0x7da   :  { %v6583_v49 = vpop.eup %6582 }
 0x7db   :  { %6586 = vrcp.f32 %v4944_v45  ;;  %v4950_v46 = vadd.f32 1.0, %v6583_v49  ;;  %v6585_v44 = vpop.eup %6584 }
 0x7dc   :  { %6588 = vtanh.f32 %v4939_v16  ;;  %v4957_v61 = vadd.f32 1.0, %v6585_v44 }
 0x7dd   :  { %6590 = vrcp.f32 %v4950_v46 }
 0x7e6   :  { %v5214_v24 = vpop.f32.mrf.mxu0  ;;  %v5255_v25 = vpop.f32.mrf.mxu1 }
 0x7e7   :  { %v5262_v30 = vadd.f32 %v5214_v24, %v4983_v28  ;;  %v5264_v62 = vadd.f32 %v5255_v25, %v4985_v9 }
 0x7e8   :  { %v6587_v1 = vpop.eup %6586  ;;  %v5216_v29 = vpop.f32.mrf.mxu0 }
 0x7e9   :  { %v5257_v56 = vpop.f32.mrf.mxu1  ;;  %v6589_v39 = vpop.eup %6588  ;;  %v5953_v58 = vmul.f32 -1.442695, %v5262_v30  ;;  %v5263_v11 = vadd.f32 %v5216_v29, %v4984_v33 }
 0x7ea   :  { %v6591_v42 = vpop.eup %6590  ;;  %v5218_v37 = vpop.f32.mrf.mxu0  ;;  %v4961_v57 = vmul.f32 %v6589_v39, %v6587_v1  ;;  %v5265_v50 = vadd.f32 %v5257_v56, %v4986_v60 }
 0x7eb   :  { %v5259_v63 = vpop.f32.mrf.mxu1  ;;  %v4960_v10 = vmul.f32 %v6591_v42, %v8753_v21  ;;  %6592 = vpow2.f32 %v5953_v58  ;;  %v5954_v2 = vmul.f32 -1.442695, %v5263_v11 }
 0x7ec   :  { %v5219_v3 = vpop.f32.mrf.mxu0  ;;  %v5955_v38 = vmul.f32 -1.442695, %v5265_v50 }
 0x7ed   :  { %v5260_v7 = vpop.f32.mrf.mxu1  ;;  %v4962_v54 = vadd.f32 %v4961_v57, %v4960_v10  ;;  %6594 = vpow2.f32 %v5954_v2 }
 0x7ee   :  { %6596 = vrcp.f32 %v4957_v61 }
 0x7ef   :  { %6598 = vtanh.f32 %v4962_v54 }
 0x7f0   :  { %6600 = vpow2.f32 %v5955_v38 }
 0x7f8   :  { %v6593_v31 = vpop.eup %6592 }
 0x7f9   :  { %v5269_v32 = vadd.f32 1.0, %v6593_v31 }
 0x7fa   :  { %v6595_v21 = vpop.eup %6594 }
 0x7fb   :  { %v6597_v35 = vpop.eup %6596  ;;  %6602 = vrcp.f32 %v5269_v32  ;;  %v5275_v47 = vadd.f32 1.0, %v6595_v21 }
 0x7fc   :  { %v6599_v51 = vpop.eup %6598  ;;  %6604 = vtanh.f32 %v5264_v62 }
 0x7fd   :  { %v4964_v41 = vmul.f32 %v6599_v51, %v6597_v35  ;;  %6606 = vrcp.f32 %v5275_v47  ;;  %v6601_v17 = vpop.eup %6600 }
 0x7fe   :  { %v5282_v52 = vadd.f32 1.0, %v6601_v17 }
 0x7ff   :  { %v4976_v53 = vsel %vm4971_vm8, %v4964_v41, 0.0 }
 0x800   :  { %5918 = vst [vmem:[%s8829_s5 + $0x38] sm:$0xff] %v4976_v53  ;;  %6608 = vrcp.f32 %v5282_v52 }
 0x808   :  { %v6603_v27 = vpop.eup %6602 }
 0x809   :  { %v6605_v18 = vpop.eup %6604 }
 0x80a   :  { %v6607_v34 = vpop.eup %6606  ;;  %v5286_v43 = vmul.f32 %v6605_v18, %v6603_v27 }
 0x80b   :  { %v5285_v5 = vmul.f32 %v6607_v34, %v8780_v0 }
 0x80d   :  { %v5287_v14 = vadd.f32 %v5286_v43, %v5285_v5  ;;  %v6609_v55 = vpop.eup %6608 }
 0x80f   :  { %6610 = vtanh.f32 %v5287_v14 }
 0x81c   :  { %v6611_v13 = vpop.eup %6610 }
 0x81d   :  { %v5289_v4 = vmul.f32 %v6611_v13, %v6609_v55 }
 0x81f   :  { %v5301_v23 = vsel %vm5296_vm9, %v5289_v4, 0.0 }
 0x820   :  { %5302 = vst [vmem:[%s8830_s6] sm:$0xff] %v5301_v23 }

</bundles_post_ra>
